<compile_context>
chip_gen: v7x
topology: tpu7x:2x2x1
jax: 0.10.0
libtpu: 0.0.40
codegen_flags: <defaults>
</compile_context>

<pallas_src>
import math
import functools

import jax
import jax.numpy as jnp
from jax import lax
from jax.experimental import pallas as pl
from jax.experimental.pallas import tpu as pltpu

F32 = jnp.float32
MXU_DTYPE = jnp.bfloat16   # MXU input dtype (f32 accumulation everywhere)


def _pick_tile(dim, candidates):
    """Largest candidate that evenly divides `dim`, else the full dim."""
    for c in candidates:
        if dim % c == 0:
            return c
    return dim


# ----------------------------- Pallas kernels ------------------------------

def _linear_kernel(x_ref, w_ref, b_ref, o_ref, acc_ref, *, activation, n_k):
    @pl.when(pl.program_id(2) == 0)
    def _():
        acc_ref[...] = jnp.zeros_like(acc_ref)

    acc_ref[...] += jnp.dot(x_ref[...].astype(MXU_DTYPE),
                            w_ref[...].astype(MXU_DTYPE),
                            preferred_element_type=jnp.float32)

    @pl.when(pl.program_id(2) == n_k - 1)
    def _():
        y = acc_ref[...] + b_ref[...]
        if activation == "relu":
            y = jnp.maximum(y, 0.0)
        o_ref[...] = y.astype(o_ref.dtype)


def linear(x, w, b, activation=None):
    """y = x @ w + b.  x: (N, K), w: (K, M) (in,out layout), b: (1, M)."""
    N, K = x.shape
    M = w.shape[1]
    tm = _pick_tile(N, (256, 128, 64, 32, 16, 8))
    tk = _pick_tile(K, (512, 256, 128))
    tn = _pick_tile(M, (512, 256, 128))
    gm, gn, gk = N // tm, M // tn, K // tk
    return pl.pallas_call(
        functools.partial(_linear_kernel, activation=activation, n_k=gk),
        out_shape=jax.ShapeDtypeStruct((N, M), x.dtype),
        grid=(gm, gn, gk),
        in_specs=[pl.BlockSpec((tm, tk), lambda i, j, k: (i, k)),
                  pl.BlockSpec((tk, tn), lambda i, j, k: (k, j)),
                  pl.BlockSpec((1, tn), lambda i, j, k: (0, j))],
        out_specs=pl.BlockSpec((tm, tn), lambda i, j, k: (i, j)),
        scratch_shapes=[pltpu.VMEM((tm, tn), jnp.float32)],
        compiler_params=pltpu.CompilerParams(
            dimension_semantics=("parallel", "parallel", "arbitrary")),
        cost_estimate=pl.CostEstimate(
            flops=int(2 * N * M * K), transcendentals=0,
            bytes_accessed=int(4 * (N * K + K * M + N * M))),
    )(x, w, b)


def _ffn_kernel(x_ref, w1_ref, b1_ref, w2_ref, b2_ref, o_ref):
    h = jnp.dot(x_ref[...].astype(MXU_DTYPE), w1_ref[...].astype(MXU_DTYPE),
                preferred_element_type=jnp.float32) + b1_ref[...]
    h = jnp.maximum(h, 0.0)
    y = jnp.dot(h.astype(MXU_DTYPE), w2_ref[...].astype(MXU_DTYPE),
                preferred_element_type=jnp.float32) + b2_ref[...]
    o_ref[...] = y.astype(o_ref.dtype)


def ffn(x, w1, b1, w2, b2):
    """Fused linear1 + ReLU + linear2; (tm, FF) intermediate stays in VMEM."""
    N, E = x.shape
    FF = w1.shape[1]
    tm = _pick_tile(N, (256, 128, 64, 32, 16, 8))
    return pl.pallas_call(
        _ffn_kernel,
        out_shape=jax.ShapeDtypeStruct((N, E), x.dtype),
        grid=(N // tm,),
        in_specs=[pl.BlockSpec((tm, E), lambda i: (i, 0)),
                  pl.BlockSpec((E, FF), lambda i: (0, 0)),
                  pl.BlockSpec((1, FF), lambda i: (0, 0)),
                  pl.BlockSpec((FF, E), lambda i: (0, 0)),
                  pl.BlockSpec((1, E), lambda i: (0, 0))],
        out_specs=pl.BlockSpec((tm, E), lambda i: (i, 0)),
        compiler_params=pltpu.CompilerParams(
            dimension_semantics=("parallel",)),
        cost_estimate=pl.CostEstimate(
            flops=int(4 * N * E * FF), transcendentals=0,
            bytes_accessed=int(4 * (2 * N * E + 2 * E * FF))),
    )(x, w1, b1, w2, b2)


def _add_ln_kernel(x_ref, a_ref, g_ref, b_ref, o_ref, *, eps):
    x = x_ref[...] + a_ref[...]
    mean = jnp.mean(x, axis=-1, keepdims=True)
    var = jnp.mean(jnp.square(x - mean), axis=-1, keepdims=True)
    xn = (x - mean) * lax.rsqrt(var + eps)
    o_ref[...] = (xn * g_ref[...] + b_ref[...]).astype(o_ref.dtype)


def add_layernorm(x, a, gamma, beta, eps=1e-5):
    """LayerNorm(x + a) — residual add fused into the norm kernel."""
    N, E = x.shape
    tm = _pick_tile(N, (512, 256, 128, 64, 32, 16, 8))
    return pl.pallas_call(
        functools.partial(_add_ln_kernel, eps=eps),
        out_shape=jax.ShapeDtypeStruct((N, E), x.dtype),
        grid=(N // tm,),
        in_specs=[pl.BlockSpec((tm, E), lambda i: (i, 0)),
                  pl.BlockSpec((tm, E), lambda i: (i, 0)),
                  pl.BlockSpec((1, E), lambda i: (0, 0)),
                  pl.BlockSpec((1, E), lambda i: (0, 0))],
        out_specs=pl.BlockSpec((tm, E), lambda i: (i, 0)),
        compiler_params=pltpu.CompilerParams(
            dimension_semantics=("parallel",)),
    )(x, a, gamma, beta)


def _ln_kernel(x_ref, g_ref, b_ref, o_ref, *, eps):
    x = x_ref[...]
    mean = jnp.mean(x, axis=-1, keepdims=True)
    var = jnp.mean(jnp.square(x - mean), axis=-1, keepdims=True)
    xn = (x - mean) * lax.rsqrt(var + eps)
    o_ref[...] = (xn * g_ref[...] + b_ref[...]).astype(o_ref.dtype)


def layernorm(x, gamma, beta, eps=1e-5):
    N, E = x.shape
    tm = _pick_tile(N, (512, 256, 128, 64, 32, 16, 8))
    return pl.pallas_call(
        functools.partial(_ln_kernel, eps=eps),
        out_shape=jax.ShapeDtypeStruct((N, E), x.dtype),
        grid=(N // tm,),
        in_specs=[pl.BlockSpec((tm, E), lambda i: (i, 0)),
                  pl.BlockSpec((1, E), lambda i: (0, 0)),
                  pl.BlockSpec((1, E), lambda i: (0, 0))],
        out_specs=pl.BlockSpec((tm, E), lambda i: (i, 0)),
        compiler_params=pltpu.CompilerParams(
            dimension_semantics=("parallel",)),
    )(x, gamma, beta)


def _mha_kernel(q_ref, k_ref, v_ref, am_ref, pad_ref, o_ref, *, scale):
    # q: (H, T, Dh), k/v: (H, S, Dh) — all heads of one batch per grid step.
    q = q_ref[0].astype(MXU_DTYPE)
    k = k_ref[0].astype(MXU_DTYPE)
    v = v_ref[0].astype(MXU_DTYPE)
    s = lax.dot_general(q, k, (((2,), (2,)), ((0,), (0,))),
                        preferred_element_type=jnp.float32) * scale   # (H,T,S)
    # build the additive mask in-kernel: (T,S) attn mask + (1,1,S) key padding
    s = s + am_ref[...][None, :, :] + pad_ref[...]
    m = jnp.max(s, axis=-1, keepdims=True)
    m = jnp.where(m == -jnp.inf, 0.0, m)         # guard fully-masked rows
    p = jnp.exp(s - m)
    denom = jnp.maximum(jnp.sum(p, axis=-1, keepdims=True), 1e-30)
    p = p * pl.reciprocal(denom, approx=True)
    o = lax.dot_general(p.astype(MXU_DTYPE), v, (((2,), (1,)), ((0,), (0,))),
                        preferred_element_type=jnp.float32)           # (H,T,Dh)
    o_ref[0] = o.astype(o_ref.dtype)


def attention(q, k, v, attn_mask, pad_mask, scale):
    """q: (B,H,T,Dh), k/v: (B,H,S,Dh), attn_mask: (T,S), pad_mask: (B,1,S)."""
    B, H, T, Dh = q.shape
    S = k.shape[2]
    return pl.pallas_call(
        functools.partial(_mha_kernel, scale=scale),
        out_shape=jax.ShapeDtypeStruct((B, H, T, Dh), q.dtype),
        grid=(B,),
        in_specs=[pl.BlockSpec((1, H, T, Dh), lambda b: (b, 0, 0, 0)),
                  pl.BlockSpec((1, H, S, Dh), lambda b: (b, 0, 0, 0)),
                  pl.BlockSpec((1, H, S, Dh), lambda b: (b, 0, 0, 0)),
                  pl.BlockSpec((T, S), lambda b: (0, 0)),
                  pl.BlockSpec((1, 1, S), lambda b: (b, 0, 0))],
        out_specs=pl.BlockSpec((1, H, T, Dh), lambda b: (b, 0, 0, 0)),
        compiler_params=pltpu.CompilerParams(
            dimension_semantics=("parallel",)),
        cost_estimate=pl.CostEstimate(
            flops=int(4 * B * H * T * S * Dh),
            transcendentals=int(B * H * T * S),
            bytes_accessed=int(4 * (2 * B * H * T * Dh + 2 * B * H * S * Dh))),
    )(q, k, v, attn_mask, pad_mask)


def _embed_pe_kernel(e_ref, pe_ref, o_ref, *, scale):
    o_ref[...] = (e_ref[...] * scale + pe_ref[...]).astype(o_ref.dtype)


# --------------------------- model building blocks --------------------------

def positional_encoding_table(emb_size, max_size=5000):
    den = jnp.exp(-jnp.arange(0, emb_size, 2, dtype=F32)
                  * (math.log(10000.0) / emb_size))
    pos = jnp.arange(max_size, dtype=F32)[:, None]
    pe = jnp.zeros((max_size, emb_size), F32)
    pe = pe.at[:, 0::2].set(jnp.sin(pos * den))
    pe = pe.at[:, 1::2].set(jnp.cos(pos * den))
    return pe


def embed(tokens_lb, table, pe):
    """Gather embedding + sqrt(E) scale + positional encoding, batch-first out."""
    L, B = tokens_lb.shape
    V, E = table.shape
    emb = jnp.take(table, tokens_lb.T, axis=0)          # (B, L, E) gather
    pe_l = pe[:L]                                       # (L, E)
    return pl.pallas_call(
        functools.partial(_embed_pe_kernel, scale=math.sqrt(E)),
        out_shape=jax.ShapeDtypeStruct((B, L, E), table.dtype),
        grid=(B,),
        in_specs=[pl.BlockSpec((1, L, E), lambda b: (b, 0, 0)),
                  pl.BlockSpec((L, E), lambda b: (0, 0))],
        out_specs=pl.BlockSpec((1, L, E), lambda b: (b, 0, 0)),
        compiler_params=pltpu.CompilerParams(
            dimension_semantics=("parallel",)),
    )(emb, pe_l)


def multi_head_attention(q_in, kv_in, p, nhead, attn_mask, key_padding_mask):
    """q_in: (B, T, E), kv_in: (B, S, E) batch-first activations."""
    B, T, E = q_in.shape
    S = kv_in.shape[1]
    H = nhead
    Dh = E // H

    q = linear(q_in.reshape(B * T, E), p["q_w"], p["q_b"])
    k = linear(kv_in.reshape(B * S, E), p["k_w"], p["k_b"])
    v = linear(kv_in.reshape(B * S, E), p["v_w"], p["v_b"])

    q = q.reshape(B, T, H, Dh).transpose(0, 2, 1, 3)    # (B, H, T, Dh)
    k = k.reshape(B, S, H, Dh).transpose(0, 2, 1, 3)
    v = v.reshape(B, S, H, Dh).transpose(0, 2, 1, 3)

    am = jnp.zeros((T, S), F32) if attn_mask is None else attn_mask.astype(F32)
    if key_padding_mask is None:
        pad = jnp.zeros((B, 1, S), F32)
    else:
        pad = jnp.where(key_padding_mask, -jnp.inf, 0.0).astype(F32)
        pad = pad.reshape(B, 1, S)

    o = attention(q, k, v, am, pad, 1.0 / math.sqrt(Dh))  # (B, H, T, Dh)
    o = o.transpose(0, 2, 1, 3).reshape(B * T, E)
    out = linear(o, p["out_w"], p["out_b"])
    return out.reshape(B, T, E)


def encoder_layer(x, p, nhead, src_mask, src_kpm):
    B, S, E = x.shape
    a = multi_head_attention(x, x, p["self_attn"], nhead, src_mask, src_kpm)
    h = add_layernorm(x.reshape(B * S, E), a.reshape(B * S, E),
                      p["norm1_w"], p["norm1_b"])
    f = ffn(h, p["linear1_w"], p["linear1_b"], p["linear2_w"], p["linear2_b"])
    h = add_layernorm(h, f, p["norm2_w"], p["norm2_b"])
    return h.reshape(B, S, E)


def decoder_layer(y, memory, p, nhead, tgt_mask, tgt_kpm, mem_kpm):
    B, T, E = y.shape
    a = multi_head_attention(y, y, p["self_attn"], nhead, tgt_mask, tgt_kpm)
    h = add_layernorm(y.reshape(B * T, E), a.reshape(B * T, E),
                      p["norm1_w"], p["norm1_b"])
    hx = h.reshape(B, T, E)
    c = multi_head_attention(hx, memory, p["cross_attn"], nhead, None, mem_kpm)
    h = add_layernorm(h, c.reshape(B * T, E), p["norm2_w"], p["norm2_b"])
    f = ffn(h, p["linear1_w"], p["linear1_b"], p["linear2_w"], p["linear2_b"])
    h = add_layernorm(h, f, p["norm3_w"], p["norm3_b"])
    return h.reshape(B, T, E)


def transformer_forward(params, src, trg, src_mask, trg_mask,
                        src_padding_mask, trg_padding_mask,
                        memory_key_padding_mask, *, head_count):
    pe = params["pos_encoding"]

    # batch-first internal layout: (B, L, E)
    src_emb = embed(src, params["src_token_embedding"], pe)
    trg_emb = embed(trg, params["trg_token_embedding"], pe)

    # encoder (post-norm layers + final encoder LayerNorm, as in nn.Transformer)
    x = src_emb
    for lp in params["encoder_layers"]:
        x = encoder_layer(x, lp, head_count, src_mask, src_padding_mask)
    B, S, E = x.shape
    memory = layernorm(x.reshape(B * S, E),
                       params["encoder_norm_w"],
                       params["encoder_norm_b"]).reshape(B, S, E)

    # decoder
    y = trg_emb
    for lp in params["decoder_layers"]:
        y = decoder_layer(y, memory, lp, head_count, trg_mask,
                          trg_padding_mask, memory_key_padding_mask)
    B, T, E = y.shape
    y = layernorm(y.reshape(B * T, E),
                  params["decoder_norm_w"], params["decoder_norm_b"])

    # generator
    V = params["generator_w"].shape[1]
    logits = linear(y, params["generator_w"], params["generator_b"])
    # back to PyTorch sequence-first (T, B, V)
    return logits.reshape(B, T, V).transpose(1, 0, 2)


# ------------------------------ param init ----------------------------------

def _w(key, in_dim, out_dim, scale=0.05):
    # stored pre-transposed: (in, out) layout so no .T at forward time
    return jax.random.normal(key, (in_dim, out_dim), F32) * scale


def _attn_params(key, E):
    ks = jax.random.split(key, 4)
    return {
        "q_w": _w(ks[0], E, E), "q_b": jnp.zeros((1, E), F32),
        "k_w": _w(ks[1], E, E), "k_b": jnp.zeros((1, E), F32),
        "v_w": _w(ks[2], E, E), "v_b": jnp.zeros((1, E), F32),
        "out_w": _w(ks[3], E, E), "out_b": jnp.zeros((1, E), F32),
    }


def _layer_params(key, E, FF, cross):
    ks = jax.random.split(key, 4)
    p = {
        "self_attn": _attn_params(ks[0], E),
        "linear1_w": _w(ks[1], E, FF), "linear1_b": jnp.zeros((1, FF), F32),
        "linear2_w": _w(ks[2], FF, E), "linear2_b": jnp.zeros((1, E), F32),
        "norm1_w": jnp.ones((1, E), F32), "norm1_b": jnp.zeros((1, E), F32),
        "norm2_w": jnp.ones((1, E), F32), "norm2_b": jnp.zeros((1, E), F32),
    }
    if cross:
        p["cross_attn"] = _attn_params(ks[3], E)
        p["norm3_w"] = jnp.ones((1, E), F32)
        p["norm3_b"] = jnp.zeros((1, E), F32)
    return p


def init_params(key, source_vocab_size, target_vocab_size,
                num_encoder_layers, num_decoder_layers,
                embedding_size, feedforward_size, head_count,
                pos_encoding_size=5000):
    E, FF = embedding_size, feedforward_size
    keys = jax.random.split(key, num_encoder_layers + num_decoder_layers + 3)
    enc = [_layer_params(keys[i], E, FF, False)
           for i in range(num_encoder_layers)]
    dec = [_layer_params(keys[num_encoder_layers + i], E, FF, True)
           for i in range(num_decoder_layers)]
    ke, kd, kg = keys[-3], keys[-2], keys[-1]
    return {
        "encoder_layers": enc,
        "decoder_layers": dec,
        "encoder_norm_w": jnp.ones((1, E), F32),
        "encoder_norm_b": jnp.zeros((1, E), F32),
        "decoder_norm_w": jnp.ones((1, E), F32),
        "decoder_norm_b": jnp.zeros((1, E), F32),
        "src_token_embedding": jax.random.normal(
            ke, (source_vocab_size, E), F32) * 0.1,
        "trg_token_embedding": jax.random.normal(
            kd, (target_vocab_size, E), F32) * 0.1,
        "generator_w": _w(kg, E, target_vocab_size),
        "generator_b": jnp.zeros((1, target_vocab_size), F32),
        "pos_encoding": positional_encoding_table(E, pos_encoding_size),
    }


# ---------------------------------- main -------------------------------------

if __name__ == "__main__":
    SRC_VOCAB, TGT_VOCAB = 50, 60
    NUM_ENC, NUM_DEC = 2, 2
    EMB, FF, HEADS = 32, 64, 4
    S_LEN, T_LEN, BATCH = 8, 6, 2

    key = jax.random.PRNGKey(0)
    kp, ks, kt = jax.random.split(key, 3)
    params = init_params(kp, SRC_VOCAB, TGT_VOCAB, NUM_ENC, NUM_DEC,
                         EMB, FF, HEADS, pos_encoding_size=128)

    src = jax.random.randint(ks, (S_LEN, BATCH), 0, SRC_VOCAB, jnp.int32)
    trg = jax.random.randint(kt, (T_LEN, BATCH), 0, TGT_VOCAB, jnp.int32)

    # additive float attention masks (PyTorch convention)
    src_mask = jnp.zeros((S_LEN, S_LEN), F32)
    trg_mask = jnp.where(
        jnp.arange(T_LEN)[:, None] >= jnp.arange(T_LEN)[None, :],
        0.0, -jnp.inf).astype(F32)
    # boolean key-padding masks (True == padded position)
    src_padding_mask = jnp.zeros((BATCH, S_LEN), bool).at[1, -1].set(True)
    trg_padding_mask = jnp.zeros((BATCH, T_LEN), bool).at[1, -1].set(True)
    memory_key_padding_mask = src_padding_mask

    fwd = jax.jit(functools.partial(transformer_forward, head_count=HEADS))
    logits = fwd(params, src, trg, src_mask, trg_mask,
                 src_padding_mask, trg_padding_mask, memory_key_padding_mask)
    logits = jax.block_until_ready(logits)
    assert logits.shape == (T_LEN, BATCH, TGT_VOCAB)
    assert bool(jnp.all(jnp.isfinite(logits)))
    print("KERNEL_OK")
</pallas_src>

<mosaic_0001>
module attributes {stable_mosaic.version = 11 : i64} {
  func.func @_embed_pe_kernel(%arg0: i32, %arg1: memref<1x8x32xf32, #tpu.memory_space<vmem>>, %arg2: memref<8x32xf32, #tpu.memory_space<vmem>>, %arg3: memref<1x8x32xf32, #tpu.memory_space<vmem>>) attributes {dimension_semantics = [#tpu.dimension_semantics<parallel>], iteration_bounds = array<i64: 2>, scalar_prefetch = 0 : i64, scratch_operands = 0 : i64, tpu.core_type = #tpu.core_type<tc>, window_params = [{transform_indices = @transform_0, window_bounds = array<i64: 1, 8, 32>}, {pipeline_mode = #tpu.pipeline_mode<synchronous>, transform_indices = @transform_1, window_bounds = array<i64: 8, 32>}, {transform_indices = @transform_2, window_bounds = array<i64: 1, 8, 32>}]} {
    %c0 = arith.constant 0 : index
    %c0_0 = arith.constant 0 : index
    %c0_1 = arith.constant 0 : index
    %0 = vector.load %arg1[%c0, %c0_0, %c0_1] : memref<1x8x32xf32, #tpu.memory_space<vmem>>, vector<1x8x32xf32>
    %cst = arith.constant 5.65685415 : f32
    %1 = vector.broadcast %cst : f32 to vector<1x8x32xf32>
    %2 = arith.mulf %0, %1 : vector<1x8x32xf32>
    %c0_2 = arith.constant 0 : index
    %c0_3 = arith.constant 0 : index
    %3 = vector.load %arg2[%c0_2, %c0_3] : memref<8x32xf32, #tpu.memory_space<vmem>>, vector<8x32xf32>
    %4 = vector.shape_cast %3 : vector<8x32xf32> to vector<1x8x32xf32>
    %5 = arith.addf %2, %4 : vector<1x8x32xf32>
    %c0_4 = arith.constant 0 : index
    %c0_5 = arith.constant 0 : index
    %c0_6 = arith.constant 0 : index
    %6 = vector.load %arg3[%c0_4, %c0_5, %c0_6] : memref<1x8x32xf32, #tpu.memory_space<vmem>>, vector<1x8x32xf32>
    tpu.vector_store %arg3[%c0_4, %c0_5, %c0_6], %5 {strides = array<i32>} : memref<1x8x32xf32, #tpu.memory_space<vmem>>, vector<1x8x32xf32>,
    return
  }
  func.func @transform_0(%arg0: i32) -> (i32, i32, i32) {
    %c0_i32 = arith.constant 0 : i32
    %c0_i32_0 = arith.constant 0 : i32
    %c0_i32_1 = arith.constant 0 : i32
    return %arg0, %c0_i32, %c0_i32_0 : i32, i32, i32
  }
  func.func @transform_1(%arg0: i32) -> (i32, i32) {
    %c0_i32 = arith.constant 0 : i32
    %c0_i32_0 = arith.constant 0 : i32
    %c0_i32_1 = arith.constant 0 : i32
    return %c0_i32, %c0_i32_0 : i32, i32
  }
  func.func @transform_2(%arg0: i32) -> (i32, i32, i32) {
    %c0_i32 = arith.constant 0 : i32
    %c0_i32_0 = arith.constant 0 : i32
    %c0_i32_1 = arith.constant 0 : i32
    return %arg0, %c0_i32, %c0_i32_0 : i32, i32, i32
  }
}

module attributes {stable_mosaic.version = 11 : i64} {
  func.func @_mha_kernel(%arg0: i32, %arg1: memref<1x4x8x8xf32, #tpu.memory_space<vmem>>, %arg2: memref<1x4x8x8xf32, #tpu.memory_space<vmem>>, %arg3: memref<1x4x8x8xf32, #tpu.memory_space<vmem>>, %arg4: memref<8x8xf32, #tpu.memory_space<vmem>>, %arg5: memref<1x1x8xf32, #tpu.memory_space<vmem>>, %arg6: memref<1x4x8x8xf32, #tpu.memory_space<vmem>>) attributes {dimension_semantics = [#tpu.dimension_semantics<parallel>], iteration_bounds = array<i64: 2>, scalar_prefetch = 0 : i64, scratch_operands = 0 : i64, tpu.core_type = #tpu.core_type<tc>, window_params = [{transform_indices = @transform_0, window_bounds = array<i64: 1, 4, 8, 8>}, {transform_indices = @transform_1, window_bounds = array<i64: 1, 4, 8, 8>}, {transform_indices = @transform_2, window_bounds = array<i64: 1, 4, 8, 8>}, {pipeline_mode = #tpu.pipeline_mode<synchronous>, transform_indices = @transform_3, window_bounds = array<i64: 8, 8>}, {transform_indices = @transform_4, window_bounds = array<i64: 1, 1, 8>}, {transform_indices = @transform_5, window_bounds = array<i64: 1, 4, 8, 8>}]} {
    %c0 = arith.constant 0 : index
    %c0_0 = arith.constant 0 : index
    %c0_1 = arith.constant 0 : index
    %c0_2 = arith.constant 0 : index
    %0 = vector.load %arg1[%c0, %c0_0, %c0_1, %c0_2] : memref<1x4x8x8xf32, #tpu.memory_space<vmem>>, vector<1x4x8x8xf32>
    %1 = vector.shape_cast %0 : vector<1x4x8x8xf32> to vector<4x8x8xf32>
    %2 = arith.truncf %1 : vector<4x8x8xf32> to vector<4x8x8xbf16>
    %c0_3 = arith.constant 0 : index
    %c0_4 = arith.constant 0 : index
    %c0_5 = arith.constant 0 : index
    %c0_6 = arith.constant 0 : index
    %3 = vector.load %arg2[%c0_3, %c0_4, %c0_5, %c0_6] : memref<1x4x8x8xf32, #tpu.memory_space<vmem>>, vector<1x4x8x8xf32>
    %4 = vector.shape_cast %3 : vector<1x4x8x8xf32> to vector<4x8x8xf32>
    %5 = arith.truncf %4 : vector<4x8x8xf32> to vector<4x8x8xbf16>
    %c0_7 = arith.constant 0 : index
    %c0_8 = arith.constant 0 : index
    %c0_9 = arith.constant 0 : index
    %c0_10 = arith.constant 0 : index
    %6 = vector.load %arg3[%c0_7, %c0_8, %c0_9, %c0_10] : memref<1x4x8x8xf32, #tpu.memory_space<vmem>>, vector<1x4x8x8xf32>
    %7 = vector.shape_cast %6 : vector<1x4x8x8xf32> to vector<4x8x8xf32>
    %8 = arith.truncf %7 : vector<4x8x8xf32> to vector<4x8x8xbf16>
    %cst = arith.constant dense<0.000000e+00> : vector<4x8x8xf32>
    %9 = tpu.matmul %2, %5, %cst {dimension_numbers = #tpu.dot_dimension_numbers<[2], [2], [1], [1], [0, 0, 0, 1, 1, 1], [0], [0]>} : vector<4x8x8xbf16>, vector<4x8x8xbf16>, vector<4x8x8xf32> -> vector<4x8x8xf32>
    %cst_11 = arith.constant 0.353553385 : f32
    %10 = vector.broadcast %cst_11 : f32 to vector<4x8x8xf32>
    %11 = arith.mulf %9, %10 : vector<4x8x8xf32>
    %c0_12 = arith.constant 0 : index
    %c0_13 = arith.constant 0 : index
    %12 = vector.load %arg4[%c0_12, %c0_13] : memref<8x8xf32, #tpu.memory_space<vmem>>, vector<8x8xf32>
    %13 = vector.shape_cast %12 : vector<8x8xf32> to vector<1x8x8xf32>
    %14 = vector.broadcast %13 : vector<1x8x8xf32> to vector<4x8x8xf32>
    %15 = arith.addf %11, %14 : vector<4x8x8xf32>
    %c0_14 = arith.constant 0 : index
    %c0_15 = arith.constant 0 : index
    %c0_16 = arith.constant 0 : index
    %16 = vector.load %arg5[%c0_14, %c0_15, %c0_16] : memref<1x1x8xf32, #tpu.memory_space<vmem>>, vector<1x1x8xf32>
    %17 = vector.broadcast %16 : vector<1x1x8xf32> to vector<4x8x8xf32>
    %18 = arith.addf %15, %17 : vector<4x8x8xf32>
    %cst_17 = arith.constant dense<0xFF800000> : vector<4x8xf32>
    %19 = vector.multi_reduction <maximumf>, %18, %cst_17 [2] : vector<4x8x8xf32> to vector<4x8xf32>
    %20 = vector.shape_cast %19 : vector<4x8xf32> to vector<4x8x1xf32>
    %cst_18 = arith.constant 0xFF800000 : f32
    %21 = vector.broadcast %cst_18 : f32 to vector<4x8x1xf32>
    %22 = arith.cmpf oeq, %20, %21 : vector<4x8x1xf32>
    %cst_19 = arith.constant 0.000000e+00 : f32
    %23 = vector.broadcast %cst_19 : f32 to vector<4x8x1xf32>
    %24 = arith.select %22, %23, %20 : vector<4x8x1xi1>, vector<4x8x1xf32>
    %25 = vector.broadcast %24 : vector<4x8x1xf32> to vector<4x8x8xf32>
    %26 = arith.subf %18, %25 : vector<4x8x8xf32>
    %27 = math.exp %26 : vector<4x8x8xf32>
    %cst_20 = arith.constant dense<0.000000e+00> : vector<4x8xf32>
    %28 = vector.multi_reduction <add>, %27, %cst_20 [2] : vector<4x8x8xf32> to vector<4x8xf32>
    %29 = vector.shape_cast %28 : vector<4x8xf32> to vector<4x8x1xf32>
    %cst_21 = arith.constant 1.000000e-30 : f32
    %30 = vector.broadcast %cst_21 : f32 to vector<4x8x1xf32>
    %31 = arith.maximumf %29, %30 : vector<4x8x1xf32>
    %32 = tpu.reciprocal %31 {approx = true} : vector<4x8x1xf32> -> vector<4x8x1xf32>
    %33 = vector.broadcast %32 : vector<4x8x1xf32> to vector<4x8x8xf32>
    %34 = arith.mulf %27, %33 : vector<4x8x8xf32>
    %35 = arith.truncf %34 : vector<4x8x8xf32> to vector<4x8x8xbf16>
    %cst_22 = arith.constant dense<0.000000e+00> : vector<4x8x8xf32>
    %36 = tpu.matmul %35, %8, %cst_22 {dimension_numbers = #tpu.dot_dimension_numbers<[2], [1], [1], [2], [0, 0, 0, 1, 1, 2], [0], [0]>} : vector<4x8x8xbf16>, vector<4x8x8xbf16>, vector<4x8x8xf32> -> vector<4x8x8xf32>
    %c0_23 = arith.constant 0 : index
    %c0_24 = arith.constant 0 : index
    %c0_25 = arith.constant 0 : index
    %c0_26 = arith.constant 0 : index
    %37 = vector.load %arg6[%c0_23, %c0_24, %c0_25, %c0_26] : memref<1x4x8x8xf32, #tpu.memory_space<vmem>>, vector<1x4x8x8xf32>
    %38 = vector.shape_cast %37 : vector<1x4x8x8xf32> to vector<4x8x8xf32>
    %39 = vector.shape_cast %36 : vector<4x8x8xf32> to vector<1x4x8x8xf32>
    tpu.vector_store %arg6[%c0_23, %c0_24, %c0_25, %c0_26], %39 {strides = array<i32>} : memref<1x4x8x8xf32, #tpu.memory_space<vmem>>, vector<1x4x8x8xf32>,
    return
  }
  func.func @transform_0(%arg0: i32) -> (i32, i32, i32, i32) {
    %c0_i32 = arith.constant 0 : i32
    %c0_i32_0 = arith.constant 0 : i32
    %c0_i32_1 = arith.constant 0 : i32
    %c0_i32_2 = arith.constant 0 : i32
    return %arg0, %c0_i32, %c0_i32_0, %c0_i32_1 : i32, i32, i32, i32
  }
  func.func @transform_1(%arg0: i32) -> (i32, i32, i32, i32) {
    %c0_i32 = arith.constant 0 : i32
    %c0_i32_0 = arith.constant 0 : i32
    %c0_i32_1 = arith.constant 0 : i32
    %c0_i32_2 = arith.constant 0 : i32
    return %arg0, %c0_i32, %c0_i32_0, %c0_i32_1 : i32, i32, i32, i32
  }
  func.func @transform_2(%arg0: i32) -> (i32, i32, i32, i32) {
    %c0_i32 = arith.constant 0 : i32
    %c0_i32_0 = arith.constant 0 : i32
    %c0_i32_1 = arith.constant 0 : i32
    %c0_i32_2 = arith.constant 0 : i32
    return %arg0, %c0_i32, %c0_i32_0, %c0_i32_1 : i32, i32, i32, i32
  }
  func.func @transform_3(%arg0: i32) -> (i32, i32) {
    %c0_i32 = arith.constant 0 : i32
    %c0_i32_0 = arith.constant 0 : i32
    %c0_i32_1 = arith.constant 0 : i32
    return %c0_i32, %c0_i32_0 : i32, i32
  }
  func.func @transform_4(%arg0: i32) -> (i32, i32, i32) {
    %c0_i32 = arith.constant 0 : i32
    %c0_i32_0 = arith.constant 0 : i32
    %c0_i32_1 = arith.constant 0 : i32
    return %arg0, %c0_i32, %c0_i32_0 : i32, i32, i32
  }
  func.func @transform_5(%arg0: i32) -> (i32, i32, i32, i32) {
    %c0_i32 = arith.constant 0 : i32
    %c0_i32_0 = arith.constant 0 : i32
    %c0_i32_1 = arith.constant 0 : i32
    %c0_i32_2 = arith.constant 0 : i32
    return %arg0, %c0_i32, %c0_i32_0, %c0_i32_1 : i32, i32, i32, i32
  }
}

module attributes {stable_mosaic.version = 11 : i64} {
  func.func @_linear_kernel(%arg0: i32, %arg1: i32, %arg2: i32, %arg3: memref<16x32xf32, #tpu.memory_space<vmem>>, %arg4: memref<32x32xf32, #tpu.memory_space<vmem>>, %arg5: memref<1x32xf32, #tpu.memory_space<vmem>>, %arg6: memref<16x32xf32, #tpu.memory_space<vmem>>, %arg7: memref<16x32xf32, #tpu.memory_space<vmem>>) attributes {dimension_semantics = [#tpu.dimension_semantics<parallel>, #tpu.dimension_semantics<parallel>, #tpu.dimension_semantics<arbitrary>], iteration_bounds = array<i64: 1, 1, 1>, scalar_prefetch = 0 : i64, scratch_operands = 1 : i64, tpu.core_type = #tpu.core_type<tc>, window_params = [{transform_indices = @transform_0, window_bounds = array<i64: 16, 32>}, {transform_indices = @transform_1, window_bounds = array<i64: 32, 32>}, {transform_indices = @transform_2, window_bounds = array<i64: 1, 32>}, {transform_indices = @transform_3, window_bounds = array<i64: 16, 32>}]} {
    %c0_i32 = arith.constant 0 : i32
    %0 = arith.cmpi eq, %arg2, %c0_i32 : i32
    %1 = arith.extui %0 : i1 to i32
    %c0_i32_0 = arith.constant 0 : i32
    %2 = arith.cmpi ne, %1, %c0_i32_0 : i32
    scf.if %2 {
      %cst_10 = arith.constant 0.000000e+00 : f32
      %14 = vector.broadcast %cst_10 : f32 to vector<16x32xf32>
      %c0_11 = arith.constant 0 : index
      %c0_12 = arith.constant 0 : index
      %15 = vector.load %arg7[%c0_11, %c0_12] : memref<16x32xf32, #tpu.memory_space<vmem>>, vector<16x32xf32>
      tpu.vector_store %arg7[%c0_11, %c0_12], %14 {strides = array<i32>} : memref<16x32xf32, #tpu.memory_space<vmem>>, vector<16x32xf32>,
    } else {
    }
    %c0 = arith.constant 0 : index
    %c0_1 = arith.constant 0 : index
    %3 = vector.load %arg7[%c0, %c0_1] : memref<16x32xf32, #tpu.memory_space<vmem>>, vector<16x32xf32>
    %c0_2 = arith.constant 0 : index
    %c0_3 = arith.constant 0 : index
    %4 = vector.load %arg3[%c0_2, %c0_3] : memref<16x32xf32, #tpu.memory_space<vmem>>, vector<16x32xf32>
    %5 = arith.truncf %4 : vector<16x32xf32> to vector<16x32xbf16>
    %c0_4 = arith.constant 0 : index
    %c0_5 = arith.constant 0 : index
    %6 = vector.load %arg4[%c0_4, %c0_5] : memref<32x32xf32, #tpu.memory_space<vmem>>, vector<32x32xf32>
    %7 = arith.truncf %6 : vector<32x32xf32> to vector<32x32xbf16>
    %cst = arith.constant dense<0.000000e+00> : vector<16x32xf32>
    %8 = tpu.matmul %5, %7, %cst {dimension_numbers = #tpu.dot_dimension_numbers<[1], [0], [0], [1], [0, 0, 1, 1], [], []>} : vector<16x32xbf16>, vector<32x32xbf16>, vector<16x32xf32> -> vector<16x32xf32>
    %9 = arith.addf %3, %8 : vector<16x32xf32>
    %c0_6 = arith.constant 0 : index
    %c0_7 = arith.constant 0 : index
    %10 = vector.load %arg7[%c0_6, %c0_7] : memref<16x32xf32, #tpu.memory_space<vmem>>, vector<16x32xf32>
    tpu.vector_store %arg7[%c0_6, %c0_7], %9 {strides = array<i32>} : memref<16x32xf32, #tpu.memory_space<vmem>>, vector<16x32xf32>,
    %c0_i32_8 = arith.constant 0 : i32
    %11 = arith.cmpi eq, %arg2, %c0_i32_8 : i32
    %12 = arith.extui %11 : i1 to i32
    %c0_i32_9 = arith.constant 0 : i32
    %13 = arith.cmpi ne, %12, %c0_i32_9 : i32
    scf.if %13 {
      %c0_10 = arith.constant 0 : index
      %c0_11 = arith.constant 0 : index
      %14 = vector.load %arg7[%c0_10, %c0_11] : memref<16x32xf32, #tpu.memory_space<vmem>>, vector<16x32xf32>
      %c0_12 = arith.constant 0 : index
      %c0_13 = arith.constant 0 : index
      %15 = vector.load %arg5[%c0_12, %c0_13] : memref<1x32xf32, #tpu.memory_space<vmem>>, vector<1x32xf32>
      %16 = vector.broadcast %15 : vector<1x32xf32> to vector<16x32xf32>
      %17 = arith.addf %14, %16 : vector<16x32xf32>
      %c0_14 = arith.constant 0 : index
      %c0_15 = arith.constant 0 : index
      %18 = vector.load %arg6[%c0_14, %c0_15] : memref<16x32xf32, #tpu.memory_space<vmem>>, vector<16x32xf32>
      tpu.vector_store %arg6[%c0_14, %c0_15], %17 {strides = array<i32>} : memref<16x32xf32, #tpu.memory_space<vmem>>, vector<16x32xf32>,
    } else {
    }
    return
  }
  func.func @transform_0(%arg0: i32, %arg1: i32, %arg2: i32) -> (i32, i32) {
    %c0_i32 = arith.constant 0 : i32
    return %arg0, %arg2 : i32, i32
  }
  func.func @transform_1(%arg0: i32, %arg1: i32, %arg2: i32) -> (i32, i32) {
    %c0_i32 = arith.constant 0 : i32
    return %arg2, %arg1 : i32, i32
  }
  func.func @transform_2(%arg0: i32, %arg1: i32, %arg2: i32) -> (i32, i32) {
    %c0_i32 = arith.constant 0 : i32
    %c0_i32_0 = arith.constant 0 : i32
    return %c0_i32, %arg1 : i32, i32
  }
  func.func @transform_3(%arg0: i32, %arg1: i32, %arg2: i32) -> (i32, i32) {
    %c0_i32 = arith.constant 0 : i32
    return %arg0, %arg1 : i32, i32
  }
}

module attributes {stable_mosaic.version = 11 : i64} {
  func.func @_add_ln_kernel(%arg0: i32, %arg1: memref<16x32xf32, #tpu.memory_space<vmem>>, %arg2: memref<16x32xf32, #tpu.memory_space<vmem>>, %arg3: memref<1x32xf32, #tpu.memory_space<vmem>>, %arg4: memref<1x32xf32, #tpu.memory_space<vmem>>, %arg5: memref<16x32xf32, #tpu.memory_space<vmem>>) attributes {dimension_semantics = [#tpu.dimension_semantics<parallel>], iteration_bounds = array<i64: 1>, scalar_prefetch = 0 : i64, scratch_operands = 0 : i64, tpu.core_type = #tpu.core_type<tc>, window_params = [{transform_indices = @transform_0, window_bounds = array<i64: 16, 32>}, {transform_indices = @transform_1, window_bounds = array<i64: 16, 32>}, {pipeline_mode = #tpu.pipeline_mode<synchronous>, transform_indices = @transform_2, window_bounds = array<i64: 1, 32>}, {pipeline_mode = #tpu.pipeline_mode<synchronous>, transform_indices = @transform_3, window_bounds = array<i64: 1, 32>}, {transform_indices = @transform_4, window_bounds = array<i64: 16, 32>}]} {
    %c0 = arith.constant 0 : index
    %c0_0 = arith.constant 0 : index
    %0 = vector.load %arg1[%c0, %c0_0] : memref<16x32xf32, #tpu.memory_space<vmem>>, vector<16x32xf32>
    %c0_1 = arith.constant 0 : index
    %c0_2 = arith.constant 0 : index
    %1 = vector.load %arg2[%c0_1, %c0_2] : memref<16x32xf32, #tpu.memory_space<vmem>>, vector<16x32xf32>
    %2 = arith.addf %0, %1 : vector<16x32xf32>
    %cst = arith.constant dense<0.000000e+00> : vector<16xf32>
    %3 = vector.multi_reduction <add>, %2, %cst [1] : vector<16x32xf32> to vector<16xf32>
    %4 = vector.shape_cast %3 : vector<16xf32> to vector<16x1xf32>
    %cst_3 = arith.constant 3.200000e+01 : f32
    %5 = vector.broadcast %cst_3 : f32 to vector<16x1xf32>
    %6 = arith.divf %4, %5 : vector<16x1xf32>
    %7 = vector.broadcast %6 : vector<16x1xf32> to vector<16x32xf32>
    %8 = arith.subf %2, %7 : vector<16x32xf32>
    %9 = arith.mulf %8, %8 : vector<16x32xf32>
    %cst_4 = arith.constant dense<0.000000e+00> : vector<16xf32>
    %10 = vector.multi_reduction <add>, %9, %cst_4 [1] : vector<16x32xf32> to vector<16xf32>
    %11 = vector.shape_cast %10 : vector<16xf32> to vector<16x1xf32>
    %cst_5 = arith.constant 3.200000e+01 : f32
    %12 = vector.broadcast %cst_5 : f32 to vector<16x1xf32>
    %13 = arith.divf %11, %12 : vector<16x1xf32>
    %14 = vector.broadcast %6 : vector<16x1xf32> to vector<16x32xf32>
    %15 = arith.subf %2, %14 : vector<16x32xf32>
    %cst_6 = arith.constant 9.99999974E-6 : f32
    %16 = vector.broadcast %cst_6 : f32 to vector<16x1xf32>
    %17 = arith.addf %13, %16 : vector<16x1xf32>
    %18 = math.rsqrt %17 : vector<16x1xf32>
    %19 = vector.broadcast %18 : vector<16x1xf32> to vector<16x32xf32>
    %20 = arith.mulf %15, %19 : vector<16x32xf32>
    %c0_7 = arith.constant 0 : index
    %c0_8 = arith.constant 0 : index
    %21 = vector.load %arg3[%c0_7, %c0_8] : memref<1x32xf32, #tpu.memory_space<vmem>>, vector<1x32xf32>
    %22 = vector.broadcast %21 : vector<1x32xf32> to vector<16x32xf32>
    %23 = arith.mulf %20, %22 : vector<16x32xf32>
    %c0_9 = arith.constant 0 : index
    %c0_10 = arith.constant 0 : index
    %24 = vector.load %arg4[%c0_9, %c0_10] : memref<1x32xf32, #tpu.memory_space<vmem>>, vector<1x32xf32>
    %25 = vector.broadcast %24 : vector<1x32xf32> to vector<16x32xf32>
    %26 = arith.addf %23, %25 : vector<16x32xf32>
    %c0_11 = arith.constant 0 : index
    %c0_12 = arith.constant 0 : index
    %27 = vector.load %arg5[%c0_11, %c0_12] : memref<16x32xf32, #tpu.memory_space<vmem>>, vector<16x32xf32>
    tpu.vector_store %arg5[%c0_11, %c0_12], %26 {strides = array<i32>} : memref<16x32xf32, #tpu.memory_space<vmem>>, vector<16x32xf32>,
    return
  }
  func.func @transform_0(%arg0: i32) -> (i32, i32) {
    %c0_i32 = arith.constant 0 : i32
    %c0_i32_0 = arith.constant 0 : i32
    return %arg0, %c0_i32 : i32, i32
  }
  func.func @transform_1(%arg0: i32) -> (i32, i32) {
    %c0_i32 = arith.constant 0 : i32
    %c0_i32_0 = arith.constant 0 : i32
    return %arg0, %c0_i32 : i32, i32
  }
  func.func @transform_2(%arg0: i32) -> (i32, i32) {
    %c0_i32 = arith.constant 0 : i32
    %c0_i32_0 = arith.constant 0 : i32
    %c0_i32_1 = arith.constant 0 : i32
    return %c0_i32, %c0_i32_0 : i32, i32
  }
  func.func @transform_3(%arg0: i32) -> (i32, i32) {
    %c0_i32 = arith.constant 0 : i32
    %c0_i32_0 = arith.constant 0 : i32
    %c0_i32_1 = arith.constant 0 : i32
    return %c0_i32, %c0_i32_0 : i32, i32
  }
  func.func @transform_4(%arg0: i32) -> (i32, i32) {
    %c0_i32 = arith.constant 0 : i32
    %c0_i32_0 = arith.constant 0 : i32
    return %arg0, %c0_i32 : i32, i32
  }
}

module attributes {stable_mosaic.version = 11 : i64} {
  func.func @_ffn_kernel(%arg0: i32, %arg1: memref<16x32xf32, #tpu.memory_space<vmem>>, %arg2: memref<32x64xf32, #tpu.memory_space<vmem>>, %arg3: memref<1x64xf32, #tpu.memory_space<vmem>>, %arg4: memref<64x32xf32, #tpu.memory_space<vmem>>, %arg5: memref<1x32xf32, #tpu.memory_space<vmem>>, %arg6: memref<16x32xf32, #tpu.memory_space<vmem>>) attributes {dimension_semantics = [#tpu.dimension_semantics<parallel>], iteration_bounds = array<i64: 1>, scalar_prefetch = 0 : i64, scratch_operands = 0 : i64, tpu.core_type = #tpu.core_type<tc>, window_params = [{transform_indices = @transform_0, window_bounds = array<i64: 16, 32>}, {pipeline_mode = #tpu.pipeline_mode<synchronous>, transform_indices = @transform_1, window_bounds = array<i64: 32, 64>}, {pipeline_mode = #tpu.pipeline_mode<synchronous>, transform_indices = @transform_2, window_bounds = array<i64: 1, 64>}, {pipeline_mode = #tpu.pipeline_mode<synchronous>, transform_indices = @transform_3, window_bounds = array<i64: 64, 32>}, {pipeline_mode = #tpu.pipeline_mode<synchronous>, transform_indices = @transform_4, window_bounds = array<i64: 1, 32>}, {transform_indices = @transform_5, window_bounds = array<i64: 16, 32>}]} {
    %c0 = arith.constant 0 : index
    %c0_0 = arith.constant 0 : index
    %0 = vector.load %arg1[%c0, %c0_0] : memref<16x32xf32, #tpu.memory_space<vmem>>, vector<16x32xf32>
    %1 = arith.truncf %0 : vector<16x32xf32> to vector<16x32xbf16>
    %c0_1 = arith.constant 0 : index
    %c0_2 = arith.constant 0 : index
    %2 = vector.load %arg2[%c0_1, %c0_2] : memref<32x64xf32, #tpu.memory_space<vmem>>, vector<32x64xf32>
    %3 = arith.truncf %2 : vector<32x64xf32> to vector<32x64xbf16>
    %cst = arith.constant dense<0.000000e+00> : vector<16x64xf32>
    %4 = tpu.matmul %1, %3, %cst {dimension_numbers = #tpu.dot_dimension_numbers<[1], [0], [0], [1], [0, 0, 1, 1], [], []>} : vector<16x32xbf16>, vector<32x64xbf16>, vector<16x64xf32> -> vector<16x64xf32>
    %c0_3 = arith.constant 0 : index
    %c0_4 = arith.constant 0 : index
    %5 = vector.load %arg3[%c0_3, %c0_4] : memref<1x64xf32, #tpu.memory_space<vmem>>, vector<1x64xf32>
    %6 = vector.broadcast %5 : vector<1x64xf32> to vector<16x64xf32>
    %7 = arith.addf %4, %6 : vector<16x64xf32>
    %cst_5 = arith.constant 0.000000e+00 : f32
    %8 = vector.broadcast %cst_5 : f32 to vector<16x64xf32>
    %9 = arith.maximumf %7, %8 : vector<16x64xf32>
    %10 = arith.truncf %9 : vector<16x64xf32> to vector<16x64xbf16>
    %c0_6 = arith.constant 0 : index
    %c0_7 = arith.constant 0 : index
    %11 = vector.load %arg4[%c0_6, %c0_7] : memref<64x32xf32, #tpu.memory_space<vmem>>, vector<64x32xf32>
    %12 = arith.truncf %11 : vector<64x32xf32> to vector<64x32xbf16>
    %cst_8 = arith.constant dense<0.000000e+00> : vector<16x32xf32>
    %13 = tpu.matmul %10, %12, %cst_8 {dimension_numbers = #tpu.dot_dimension_numbers<[1], [0], [0], [1], [0, 0, 1, 1], [], []>} : vector<16x64xbf16>, vector<64x32xbf16>, vector<16x32xf32> -> vector<16x32xf32>
    %c0_9 = arith.constant 0 : index
    %c0_10 = arith.constant 0 : index
    %14 = vector.load %arg5[%c0_9, %c0_10] : memref<1x32xf32, #tpu.memory_space<vmem>>, vector<1x32xf32>
    %15 = vector.broadcast %14 : vector<1x32xf32> to vector<16x32xf32>
    %16 = arith.addf %13, %15 : vector<16x32xf32>
    %c0_11 = arith.constant 0 : index
    %c0_12 = arith.constant 0 : index
    %17 = vector.load %arg6[%c0_11, %c0_12] : memref<16x32xf32, #tpu.memory_space<vmem>>, vector<16x32xf32>
    tpu.vector_store %arg6[%c0_11, %c0_12], %16 {strides = array<i32>} : memref<16x32xf32, #tpu.memory_space<vmem>>, vector<16x32xf32>,
    return
  }
  func.func @transform_0(%arg0: i32) -> (i32, i32) {
    %c0_i32 = arith.constant 0 : i32
    %c0_i32_0 = arith.constant 0 : i32
    return %arg0, %c0_i32 : i32, i32
  }
  func.func @transform_1(%arg0: i32) -> (i32, i32) {
    %c0_i32 = arith.constant 0 : i32
    %c0_i32_0 = arith.constant 0 : i32
    %c0_i32_1 = arith.constant 0 : i32
    return %c0_i32, %c0_i32_0 : i32, i32
  }
  func.func @transform_2(%arg0: i32) -> (i32, i32) {
    %c0_i32 = arith.constant 0 : i32
    %c0_i32_0 = arith.constant 0 : i32
    %c0_i32_1 = arith.constant 0 : i32
    return %c0_i32, %c0_i32_0 : i32, i32
  }
  func.func @transform_3(%arg0: i32) -> (i32, i32) {
    %c0_i32 = arith.constant 0 : i32
    %c0_i32_0 = arith.constant 0 : i32
    %c0_i32_1 = arith.constant 0 : i32
    return %c0_i32, %c0_i32_0 : i32, i32
  }
  func.func @transform_4(%arg0: i32) -> (i32, i32) {
    %c0_i32 = arith.constant 0 : i32
    %c0_i32_0 = arith.constant 0 : i32
    %c0_i32_1 = arith.constant 0 : i32
    return %c0_i32, %c0_i32_0 : i32, i32
  }
  func.func @transform_5(%arg0: i32) -> (i32, i32) {
    %c0_i32 = arith.constant 0 : i32
    %c0_i32_0 = arith.constant 0 : i32
    return %arg0, %c0_i32 : i32, i32
  }
}

module attributes {stable_mosaic.version = 11 : i64} {
  func.func @_ln_kernel(%arg0: i32, %arg1: memref<16x32xf32, #tpu.memory_space<vmem>>, %arg2: memref<1x32xf32, #tpu.memory_space<vmem>>, %arg3: memref<1x32xf32, #tpu.memory_space<vmem>>, %arg4: memref<16x32xf32, #tpu.memory_space<vmem>>) attributes {dimension_semantics = [#tpu.dimension_semantics<parallel>], iteration_bounds = array<i64: 1>, scalar_prefetch = 0 : i64, scratch_operands = 0 : i64, tpu.core_type = #tpu.core_type<tc>, window_params = [{transform_indices = @transform_0, window_bounds = array<i64: 16, 32>}, {pipeline_mode = #tpu.pipeline_mode<synchronous>, transform_indices = @transform_1, window_bounds = array<i64: 1, 32>}, {pipeline_mode = #tpu.pipeline_mode<synchronous>, transform_indices = @transform_2, window_bounds = array<i64: 1, 32>}, {transform_indices = @transform_3, window_bounds = array<i64: 16, 32>}]} {
    %c0 = arith.constant 0 : index
    %c0_0 = arith.constant 0 : index
    %0 = vector.load %arg1[%c0, %c0_0] : memref<16x32xf32, #tpu.memory_space<vmem>>, vector<16x32xf32>
    %cst = arith.constant dense<0.000000e+00> : vector<16xf32>
    %1 = vector.multi_reduction <add>, %0, %cst [1] : vector<16x32xf32> to vector<16xf32>
    %2 = vector.shape_cast %1 : vector<16xf32> to vector<16x1xf32>
    %cst_1 = arith.constant 3.200000e+01 : f32
    %3 = vector.broadcast %cst_1 : f32 to vector<16x1xf32>
    %4 = arith.divf %2, %3 : vector<16x1xf32>
    %5 = vector.broadcast %4 : vector<16x1xf32> to vector<16x32xf32>
    %6 = arith.subf %0, %5 : vector<16x32xf32>
    %7 = arith.mulf %6, %6 : vector<16x32xf32>
    %cst_2 = arith.constant dense<0.000000e+00> : vector<16xf32>
    %8 = vector.multi_reduction <add>, %7, %cst_2 [1] : vector<16x32xf32> to vector<16xf32>
    %9 = vector.shape_cast %8 : vector<16xf32> to vector<16x1xf32>
    %cst_3 = arith.constant 3.200000e+01 : f32
    %10 = vector.broadcast %cst_3 : f32 to vector<16x1xf32>
    %11 = arith.divf %9, %10 : vector<16x1xf32>
    %12 = vector.broadcast %4 : vector<16x1xf32> to vector<16x32xf32>
    %13 = arith.subf %0, %12 : vector<16x32xf32>
    %cst_4 = arith.constant 9.99999974E-6 : f32
    %14 = vector.broadcast %cst_4 : f32 to vector<16x1xf32>
    %15 = arith.addf %11, %14 : vector<16x1xf32>
    %16 = math.rsqrt %15 : vector<16x1xf32>
    %17 = vector.broadcast %16 : vector<16x1xf32> to vector<16x32xf32>
    %18 = arith.mulf %13, %17 : vector<16x32xf32>
    %c0_5 = arith.constant 0 : index
    %c0_6 = arith.constant 0 : index
    %19 = vector.load %arg2[%c0_5, %c0_6] : memref<1x32xf32, #tpu.memory_space<vmem>>, vector<1x32xf32>
    %20 = vector.broadcast %19 : vector<1x32xf32> to vector<16x32xf32>
    %21 = arith.mulf %18, %20 : vector<16x32xf32>
    %c0_7 = arith.constant 0 : index
    %c0_8 = arith.constant 0 : index
    %22 = vector.load %arg3[%c0_7, %c0_8] : memref<1x32xf32, #tpu.memory_space<vmem>>, vector<1x32xf32>
    %23 = vector.broadcast %22 : vector<1x32xf32> to vector<16x32xf32>
    %24 = arith.addf %21, %23 : vector<16x32xf32>
    %c0_9 = arith.constant 0 : index
    %c0_10 = arith.constant 0 : index
    %25 = vector.load %arg4[%c0_9, %c0_10] : memref<16x32xf32, #tpu.memory_space<vmem>>, vector<16x32xf32>
    tpu.vector_store %arg4[%c0_9, %c0_10], %24 {strides = array<i32>} : memref<16x32xf32, #tpu.memory_space<vmem>>, vector<16x32xf32>,
    return
  }
  func.func @transform_0(%arg0: i32) -> (i32, i32) {
    %c0_i32 = arith.constant 0 : i32
    %c0_i32_0 = arith.constant 0 : i32
    return %arg0, %c0_i32 : i32, i32
  }
  func.func @transform_1(%arg0: i32) -> (i32, i32) {
    %c0_i32 = arith.constant 0 : i32
    %c0_i32_0 = arith.constant 0 : i32
    %c0_i32_1 = arith.constant 0 : i32
    return %c0_i32, %c0_i32_0 : i32, i32
  }
  func.func @transform_2(%arg0: i32) -> (i32, i32) {
    %c0_i32 = arith.constant 0 : i32
    %c0_i32_0 = arith.constant 0 : i32
    %c0_i32_1 = arith.constant 0 : i32
    return %c0_i32, %c0_i32_0 : i32, i32
  }
  func.func @transform_3(%arg0: i32) -> (i32, i32) {
    %c0_i32 = arith.constant 0 : i32
    %c0_i32_0 = arith.constant 0 : i32
    return %arg0, %c0_i32 : i32, i32
  }
}

module attributes {stable_mosaic.version = 11 : i64} {
  func.func @_embed_pe_kernel(%arg0: i32, %arg1: memref<1x6x32xf32, #tpu.memory_space<vmem>>, %arg2: memref<6x32xf32, #tpu.memory_space<vmem>>, %arg3: memref<1x6x32xf32, #tpu.memory_space<vmem>>) attributes {dimension_semantics = [#tpu.dimension_semantics<parallel>], iteration_bounds = array<i64: 2>, scalar_prefetch = 0 : i64, scratch_operands = 0 : i64, tpu.core_type = #tpu.core_type<tc>, window_params = [{transform_indices = @transform_0, window_bounds = array<i64: 1, 6, 32>}, {pipeline_mode = #tpu.pipeline_mode<synchronous>, transform_indices = @transform_1, window_bounds = array<i64: 6, 32>}, {transform_indices = @transform_2, window_bounds = array<i64: 1, 6, 32>}]} {
    %c0 = arith.constant 0 : index
    %c0_0 = arith.constant 0 : index
    %c0_1 = arith.constant 0 : index
    %0 = vector.load %arg1[%c0, %c0_0, %c0_1] : memref<1x6x32xf32, #tpu.memory_space<vmem>>, vector<1x6x32xf32>
    %cst = arith.constant 5.65685415 : f32
    %1 = vector.broadcast %cst : f32 to vector<1x6x32xf32>
    %2 = arith.mulf %0, %1 : vector<1x6x32xf32>
    %c0_2 = arith.constant 0 : index
    %c0_3 = arith.constant 0 : index
    %3 = vector.load %arg2[%c0_2, %c0_3] : memref<6x32xf32, #tpu.memory_space<vmem>>, vector<6x32xf32>
    %4 = vector.shape_cast %3 : vector<6x32xf32> to vector<1x6x32xf32>
    %5 = arith.addf %2, %4 : vector<1x6x32xf32>
    %c0_4 = arith.constant 0 : index
    %c0_5 = arith.constant 0 : index
    %c0_6 = arith.constant 0 : index
    %6 = vector.load %arg3[%c0_4, %c0_5, %c0_6] : memref<1x6x32xf32, #tpu.memory_space<vmem>>, vector<1x6x32xf32>
    tpu.vector_store %arg3[%c0_4, %c0_5, %c0_6], %5 {strides = array<i32>} : memref<1x6x32xf32, #tpu.memory_space<vmem>>, vector<1x6x32xf32>,
    return
  }
  func.func @transform_0(%arg0: i32) -> (i32, i32, i32) {
    %c0_i32 = arith.constant 0 : i32
    %c0_i32_0 = arith.constant 0 : i32
    %c0_i32_1 = arith.constant 0 : i32
    return %arg0, %c0_i32, %c0_i32_0 : i32, i32, i32
  }
  func.func @transform_1(%arg0: i32) -> (i32, i32) {
    %c0_i32 = arith.constant 0 : i32
    %c0_i32_0 = arith.constant 0 : i32
    %c0_i32_1 = arith.constant 0 : i32
    return %c0_i32, %c0_i32_0 : i32, i32
  }
  func.func @transform_2(%arg0: i32) -> (i32, i32, i32) {
    %c0_i32 = arith.constant 0 : i32
    %c0_i32_0 = arith.constant 0 : i32
    %c0_i32_1 = arith.constant 0 : i32
    return %arg0, %c0_i32, %c0_i32_0 : i32, i32, i32
  }
}

module attributes {stable_mosaic.version = 11 : i64} {
  func.func @_linear_kernel(%arg0: i32, %arg1: i32, %arg2: i32, %arg3: memref<12x32xf32, #tpu.memory_space<vmem>>, %arg4: memref<32x32xf32, #tpu.memory_space<vmem>>, %arg5: memref<1x32xf32, #tpu.memory_space<vmem>>, %arg6: memref<12x32xf32, #tpu.memory_space<vmem>>, %arg7: memref<12x32xf32, #tpu.memory_space<vmem>>) attributes {dimension_semantics = [#tpu.dimension_semantics<parallel>, #tpu.dimension_semantics<parallel>, #tpu.dimension_semantics<arbitrary>], iteration_bounds = array<i64: 1, 1, 1>, scalar_prefetch = 0 : i64, scratch_operands = 1 : i64, tpu.core_type = #tpu.core_type<tc>, window_params = [{transform_indices = @transform_0, window_bounds = array<i64: 12, 32>}, {transform_indices = @transform_1, window_bounds = array<i64: 32, 32>}, {transform_indices = @transform_2, window_bounds = array<i64: 1, 32>}, {transform_indices = @transform_3, window_bounds = array<i64: 12, 32>}]} {
    %c0_i32 = arith.constant 0 : i32
    %0 = arith.cmpi eq, %arg2, %c0_i32 : i32
    %1 = arith.extui %0 : i1 to i32
    %c0_i32_0 = arith.constant 0 : i32
    %2 = arith.cmpi ne, %1, %c0_i32_0 : i32
    scf.if %2 {
      %cst_10 = arith.constant 0.000000e+00 : f32
      %14 = vector.broadcast %cst_10 : f32 to vector<12x32xf32>
      %c0_11 = arith.constant 0 : index
      %c0_12 = arith.constant 0 : index
      %15 = vector.load %arg7[%c0_11, %c0_12] : memref<12x32xf32, #tpu.memory_space<vmem>>, vector<12x32xf32>
      tpu.vector_store %arg7[%c0_11, %c0_12], %14 {strides = array<i32>} : memref<12x32xf32, #tpu.memory_space<vmem>>, vector<12x32xf32>,
    } else {
    }
    %c0 = arith.constant 0 : index
    %c0_1 = arith.constant 0 : index
    %3 = vector.load %arg7[%c0, %c0_1] : memref<12x32xf32, #tpu.memory_space<vmem>>, vector<12x32xf32>
    %c0_2 = arith.constant 0 : index
    %c0_3 = arith.constant 0 : index
    %4 = vector.load %arg3[%c0_2, %c0_3] : memref<12x32xf32, #tpu.memory_space<vmem>>, vector<12x32xf32>
    %5 = arith.truncf %4 : vector<12x32xf32> to vector<12x32xbf16>
    %c0_4 = arith.constant 0 : index
    %c0_5 = arith.constant 0 : index
    %6 = vector.load %arg4[%c0_4, %c0_5] : memref<32x32xf32, #tpu.memory_space<vmem>>, vector<32x32xf32>
    %7 = arith.truncf %6 : vector<32x32xf32> to vector<32x32xbf16>
    %cst = arith.constant dense<0.000000e+00> : vector<12x32xf32>
    %8 = tpu.matmul %5, %7, %cst {dimension_numbers = #tpu.dot_dimension_numbers<[1], [0], [0], [1], [0, 0, 1, 1], [], []>} : vector<12x32xbf16>, vector<32x32xbf16>, vector<12x32xf32> -> vector<12x32xf32>
    %9 = arith.addf %3, %8 : vector<12x32xf32>
    %c0_6 = arith.constant 0 : index
    %c0_7 = arith.constant 0 : index
    %10 = vector.load %arg7[%c0_6, %c0_7] : memref<12x32xf32, #tpu.memory_space<vmem>>, vector<12x32xf32>
    tpu.vector_store %arg7[%c0_6, %c0_7], %9 {strides = array<i32>} : memref<12x32xf32, #tpu.memory_space<vmem>>, vector<12x32xf32>,
    %c0_i32_8 = arith.constant 0 : i32
    %11 = arith.cmpi eq, %arg2, %c0_i32_8 : i32
    %12 = arith.extui %11 : i1 to i32
    %c0_i32_9 = arith.constant 0 : i32
    %13 = arith.cmpi ne, %12, %c0_i32_9 : i32
    scf.if %13 {
      %c0_10 = arith.constant 0 : index
      %c0_11 = arith.constant 0 : index
      %14 = vector.load %arg7[%c0_10, %c0_11] : memref<12x32xf32, #tpu.memory_space<vmem>>, vector<12x32xf32>
      %c0_12 = arith.constant 0 : index
      %c0_13 = arith.constant 0 : index
      %15 = vector.load %arg5[%c0_12, %c0_13] : memref<1x32xf32, #tpu.memory_space<vmem>>, vector<1x32xf32>
      %16 = vector.broadcast %15 : vector<1x32xf32> to vector<12x32xf32>
      %17 = arith.addf %14, %16 : vector<12x32xf32>
      %c0_14 = arith.constant 0 : index
      %c0_15 = arith.constant 0 : index
      %18 = vector.load %arg6[%c0_14, %c0_15] : memref<12x32xf32, #tpu.memory_space<vmem>>, vector<12x32xf32>
      tpu.vector_store %arg6[%c0_14, %c0_15], %17 {strides = array<i32>} : memref<12x32xf32, #tpu.memory_space<vmem>>, vector<12x32xf32>,
    } else {
    }
    return
  }
  func.func @transform_0(%arg0: i32, %arg1: i32, %arg2: i32) -> (i32, i32) {
    %c0_i32 = arith.constant 0 : i32
    return %arg0, %arg2 : i32, i32
  }
  func.func @transform_1(%arg0: i32, %arg1: i32, %arg2: i32) -> (i32, i32) {
    %c0_i32 = arith.constant 0 : i32
    return %arg2, %arg1 : i32, i32
  }
  func.func @transform_2(%arg0: i32, %arg1: i32, %arg2: i32) -> (i32, i32) {
    %c0_i32 = arith.constant 0 : i32
    %c0_i32_0 = arith.constant 0 : i32
    return %c0_i32, %arg1 : i32, i32
  }
  func.func @transform_3(%arg0: i32, %arg1: i32, %arg2: i32) -> (i32, i32) {
    %c0_i32 = arith.constant 0 : i32
    return %arg0, %arg1 : i32, i32
  }
}

module attributes {stable_mosaic.version = 11 : i64} {
  func.func @_mha_kernel(%arg0: i32, %arg1: memref<1x4x6x8xf32, #tpu.memory_space<vmem>>, %arg2: memref<1x4x6x8xf32, #tpu.memory_space<vmem>>, %arg3: memref<1x4x6x8xf32, #tpu.memory_space<vmem>>, %arg4: memref<6x6xf32, #tpu.memory_space<vmem>>, %arg5: memref<1x1x6xf32, #tpu.memory_space<vmem>>, %arg6: memref<1x4x6x8xf32, #tpu.memory_space<vmem>>) attributes {dimension_semantics = [#tpu.dimension_semantics<parallel>], iteration_bounds = array<i64: 2>, scalar_prefetch = 0 : i64, scratch_operands = 0 : i64, tpu.core_type = #tpu.core_type<tc>, window_params = [{transform_indices = @transform_0, window_bounds = array<i64: 1, 4, 6, 8>}, {transform_indices = @transform_1, window_bounds = array<i64: 1, 4, 6, 8>}, {transform_indices = @transform_2, window_bounds = array<i64: 1, 4, 6, 8>}, {pipeline_mode = #tpu.pipeline_mode<synchronous>, transform_indices = @transform_3, window_bounds = array<i64: 6, 6>}, {transform_indices = @transform_4, window_bounds = array<i64: 1, 1, 6>}, {transform_indices = @transform_5, window_bounds = array<i64: 1, 4, 6, 8>}]} {
    %c0 = arith.constant 0 : index
    %c0_0 = arith.constant 0 : index
    %c0_1 = arith.constant 0 : index
    %c0_2 = arith.constant 0 : index
    %0 = vector.load %arg1[%c0, %c0_0, %c0_1, %c0_2] : memref<1x4x6x8xf32, #tpu.memory_space<vmem>>, vector<1x4x6x8xf32>
    %1 = vector.shape_cast %0 : vector<1x4x6x8xf32> to vector<4x6x8xf32>
    %2 = arith.truncf %1 : vector<4x6x8xf32> to vector<4x6x8xbf16>
    %c0_3 = arith.constant 0 : index
    %c0_4 = arith.constant 0 : index
    %c0_5 = arith.constant 0 : index
    %c0_6 = arith.constant 0 : index
    %3 = vector.load %arg2[%c0_3, %c0_4, %c0_5, %c0_6] : memref<1x4x6x8xf32, #tpu.memory_space<vmem>>, vector<1x4x6x8xf32>
    %4 = vector.shape_cast %3 : vector<1x4x6x8xf32> to vector<4x6x8xf32>
    %5 = arith.truncf %4 : vector<4x6x8xf32> to vector<4x6x8xbf16>
    %c0_7 = arith.constant 0 : index
    %c0_8 = arith.constant 0 : index
    %c0_9 = arith.constant 0 : index
    %c0_10 = arith.constant 0 : index
    %6 = vector.load %arg3[%c0_7, %c0_8, %c0_9, %c0_10] : memref<1x4x6x8xf32, #tpu.memory_space<vmem>>, vector<1x4x6x8xf32>
    %7 = vector.shape_cast %6 : vector<1x4x6x8xf32> to vector<4x6x8xf32>
    %8 = arith.truncf %7 : vector<4x6x8xf32> to vector<4x6x8xbf16>
    %cst = arith.constant dense<0.000000e+00> : vector<4x6x6xf32>
    %9 = tpu.matmul %2, %5, %cst {dimension_numbers = #tpu.dot_dimension_numbers<[2], [2], [1], [1], [0, 0, 0, 1, 1, 1], [0], [0]>} : vector<4x6x8xbf16>, vector<4x6x8xbf16>, vector<4x6x6xf32> -> vector<4x6x6xf32>
    %cst_11 = arith.constant 0.353553385 : f32
    %10 = vector.broadcast %cst_11 : f32 to vector<4x6x6xf32>
    %11 = arith.mulf %9, %10 : vector<4x6x6xf32>
    %c0_12 = arith.constant 0 : index
    %c0_13 = arith.constant 0 : index
    %12 = vector.load %arg4[%c0_12, %c0_13] : memref<6x6xf32, #tpu.memory_space<vmem>>, vector<6x6xf32>
    %13 = vector.shape_cast %12 : vector<6x6xf32> to vector<1x6x6xf32>
    %14 = vector.broadcast %13 : vector<1x6x6xf32> to vector<4x6x6xf32>
    %15 = arith.addf %11, %14 : vector<4x6x6xf32>
    %c0_14 = arith.constant 0 : index
    %c0_15 = arith.constant 0 : index
    %c0_16 = arith.constant 0 : index
    %16 = vector.load %arg5[%c0_14, %c0_15, %c0_16] : memref<1x1x6xf32, #tpu.memory_space<vmem>>, vector<1x1x6xf32>
    %17 = vector.broadcast %16 : vector<1x1x6xf32> to vector<4x6x6xf32>
    %18 = arith.addf %15, %17 : vector<4x6x6xf32>
    %cst_17 = arith.constant dense<0xFF800000> : vector<4x6xf32>
    %19 = vector.multi_reduction <maximumf>, %18, %cst_17 [2] : vector<4x6x6xf32> to vector<4x6xf32>
    %20 = vector.shape_cast %19 : vector<4x6xf32> to vector<4x6x1xf32>
    %cst_18 = arith.constant 0xFF800000 : f32
    %21 = vector.broadcast %cst_18 : f32 to vector<4x6x1xf32>
    %22 = arith.cmpf oeq, %20, %21 : vector<4x6x1xf32>
    %cst_19 = arith.constant 0.000000e+00 : f32
    %23 = vector.broadcast %cst_19 : f32 to vector<4x6x1xf32>
    %24 = arith.select %22, %23, %20 : vector<4x6x1xi1>, vector<4x6x1xf32>
    %25 = vector.broadcast %24 : vector<4x6x1xf32> to vector<4x6x6xf32>
    %26 = arith.subf %18, %25 : vector<4x6x6xf32>
    %27 = math.exp %26 : vector<4x6x6xf32>
    %cst_20 = arith.constant dense<0.000000e+00> : vector<4x6xf32>
    %28 = vector.multi_reduction <add>, %27, %cst_20 [2] : vector<4x6x6xf32> to vector<4x6xf32>
    %29 = vector.shape_cast %28 : vector<4x6xf32> to vector<4x6x1xf32>
    %cst_21 = arith.constant 1.000000e-30 : f32
    %30 = vector.broadcast %cst_21 : f32 to vector<4x6x1xf32>
    %31 = arith.maximumf %29, %30 : vector<4x6x1xf32>
    %32 = tpu.reciprocal %31 {approx = true} : vector<4x6x1xf32> -> vector<4x6x1xf32>
    %33 = vector.broadcast %32 : vector<4x6x1xf32> to vector<4x6x6xf32>
    %34 = arith.mulf %27, %33 : vector<4x6x6xf32>
    %35 = arith.truncf %34 : vector<4x6x6xf32> to vector<4x6x6xbf16>
    %cst_22 = arith.constant dense<0.000000e+00> : vector<4x6x8xf32>
    %36 = tpu.matmul %35, %8, %cst_22 {dimension_numbers = #tpu.dot_dimension_numbers<[2], [1], [1], [2], [0, 0, 0, 1, 1, 2], [0], [0]>} : vector<4x6x6xbf16>, vector<4x6x8xbf16>, vector<4x6x8xf32> -> vector<4x6x8xf32>
    %c0_23 = arith.constant 0 : index
    %c0_24 = arith.constant 0 : index
    %c0_25 = arith.constant 0 : index
    %c0_26 = arith.constant 0 : index
    %37 = vector.load %arg6[%c0_23, %c0_24, %c0_25, %c0_26] : memref<1x4x6x8xf32, #tpu.memory_space<vmem>>, vector<1x4x6x8xf32>
    %38 = vector.shape_cast %37 : vector<1x4x6x8xf32> to vector<4x6x8xf32>
    %39 = vector.shape_cast %36 : vector<4x6x8xf32> to vector<1x4x6x8xf32>
    tpu.vector_store %arg6[%c0_23, %c0_24, %c0_25, %c0_26], %39 {strides = array<i32>} : memref<1x4x6x8xf32, #tpu.memory_space<vmem>>, vector<1x4x6x8xf32>,
    return
  }
  func.func @transform_0(%arg0: i32) -> (i32, i32, i32, i32) {
    %c0_i32 = arith.constant 0 : i32
    %c0_i32_0 = arith.constant 0 : i32
    %c0_i32_1 = arith.constant 0 : i32
    %c0_i32_2 = arith.constant 0 : i32
    return %arg0, %c0_i32, %c0_i32_0, %c0_i32_1 : i32, i32, i32, i32
  }
  func.func @transform_1(%arg0: i32) -> (i32, i32, i32, i32) {
    %c0_i32 = arith.constant 0 : i32
    %c0_i32_0 = arith.constant 0 : i32
    %c0_i32_1 = arith.constant 0 : i32
    %c0_i32_2 = arith.constant 0 : i32
    return %arg0, %c0_i32, %c0_i32_0, %c0_i32_1 : i32, i32, i32, i32
  }
  func.func @transform_2(%arg0: i32) -> (i32, i32, i32, i32) {
    %c0_i32 = arith.constant 0 : i32
    %c0_i32_0 = arith.constant 0 : i32
    %c0_i32_1 = arith.constant 0 : i32
    %c0_i32_2 = arith.constant 0 : i32
    return %arg0, %c0_i32, %c0_i32_0, %c0_i32_1 : i32, i32, i32, i32
  }
  func.func @transform_3(%arg0: i32) -> (i32, i32) {
    %c0_i32 = arith.constant 0 : i32
    %c0_i32_0 = arith.constant 0 : i32
    %c0_i32_1 = arith.constant 0 : i32
    return %c0_i32, %c0_i32_0 : i32, i32
  }
  func.func @transform_4(%arg0: i32) -> (i32, i32, i32) {
    %c0_i32 = arith.constant 0 : i32
    %c0_i32_0 = arith.constant 0 : i32
    %c0_i32_1 = arith.constant 0 : i32
    return %arg0, %c0_i32, %c0_i32_0 : i32, i32, i32
  }
  func.func @transform_5(%arg0: i32) -> (i32, i32, i32, i32) {
    %c0_i32 = arith.constant 0 : i32
    %c0_i32_0 = arith.constant 0 : i32
    %c0_i32_1 = arith.constant 0 : i32
    %c0_i32_2 = arith.constant 0 : i32
    return %arg0, %c0_i32, %c0_i32_0, %c0_i32_1 : i32, i32, i32, i32
  }
}

module attributes {stable_mosaic.version = 11 : i64} {
  func.func @_add_ln_kernel(%arg0: i32, %arg1: memref<12x32xf32, #tpu.memory_space<vmem>>, %arg2: memref<12x32xf32, #tpu.memory_space<vmem>>, %arg3: memref<1x32xf32, #tpu.memory_space<vmem>>, %arg4: memref<1x32xf32, #tpu.memory_space<vmem>>, %arg5: memref<12x32xf32, #tpu.memory_space<vmem>>) attributes {dimension_semantics = [#tpu.dimension_semantics<parallel>], iteration_bounds = array<i64: 1>, scalar_prefetch = 0 : i64, scratch_operands = 0 : i64, tpu.core_type = #tpu.core_type<tc>, window_params = [{transform_indices = @transform_0, window_bounds = array<i64: 12, 32>}, {transform_indices = @transform_1, window_bounds = array<i64: 12, 32>}, {pipeline_mode = #tpu.pipeline_mode<synchronous>, transform_indices = @transform_2, window_bounds = array<i64: 1, 32>}, {pipeline_mode = #tpu.pipeline_mode<synchronous>, transform_indices = @transform_3, window_bounds = array<i64: 1, 32>}, {transform_indices = @transform_4, window_bounds = array<i64: 12, 32>}]} {
    %c0 = arith.constant 0 : index
    %c0_0 = arith.constant 0 : index
    %0 = vector.load %arg1[%c0, %c0_0] : memref<12x32xf32, #tpu.memory_space<vmem>>, vector<12x32xf32>
    %c0_1 = arith.constant 0 : index
    %c0_2 = arith.constant 0 : index
    %1 = vector.load %arg2[%c0_1, %c0_2] : memref<12x32xf32, #tpu.memory_space<vmem>>, vector<12x32xf32>
    %2 = arith.addf %0, %1 : vector<12x32xf32>
    %cst = arith.constant dense<0.000000e+00> : vector<12xf32>
    %3 = vector.multi_reduction <add>, %2, %cst [1] : vector<12x32xf32> to vector<12xf32>
    %4 = vector.shape_cast %3 : vector<12xf32> to vector<12x1xf32>
    %cst_3 = arith.constant 3.200000e+01 : f32
    %5 = vector.broadcast %cst_3 : f32 to vector<12x1xf32>
    %6 = arith.divf %4, %5 : vector<12x1xf32>
    %7 = vector.broadcast %6 : vector<12x1xf32> to vector<12x32xf32>
    %8 = arith.subf %2, %7 : vector<12x32xf32>
    %9 = arith.mulf %8, %8 : vector<12x32xf32>
    %cst_4 = arith.constant dense<0.000000e+00> : vector<12xf32>
    %10 = vector.multi_reduction <add>, %9, %cst_4 [1] : vector<12x32xf32> to vector<12xf32>
    %11 = vector.shape_cast %10 : vector<12xf32> to vector<12x1xf32>
    %cst_5 = arith.constant 3.200000e+01 : f32
    %12 = vector.broadcast %cst_5 : f32 to vector<12x1xf32>
    %13 = arith.divf %11, %12 : vector<12x1xf32>
    %14 = vector.broadcast %6 : vector<12x1xf32> to vector<12x32xf32>
    %15 = arith.subf %2, %14 : vector<12x32xf32>
    %cst_6 = arith.constant 9.99999974E-6 : f32
    %16 = vector.broadcast %cst_6 : f32 to vector<12x1xf32>
    %17 = arith.addf %13, %16 : vector<12x1xf32>
    %18 = math.rsqrt %17 : vector<12x1xf32>
    %19 = vector.broadcast %18 : vector<12x1xf32> to vector<12x32xf32>
    %20 = arith.mulf %15, %19 : vector<12x32xf32>
    %c0_7 = arith.constant 0 : index
    %c0_8 = arith.constant 0 : index
    %21 = vector.load %arg3[%c0_7, %c0_8] : memref<1x32xf32, #tpu.memory_space<vmem>>, vector<1x32xf32>
    %22 = vector.broadcast %21 : vector<1x32xf32> to vector<12x32xf32>
    %23 = arith.mulf %20, %22 : vector<12x32xf32>
    %c0_9 = arith.constant 0 : index
    %c0_10 = arith.constant 0 : index
    %24 = vector.load %arg4[%c0_9, %c0_10] : memref<1x32xf32, #tpu.memory_space<vmem>>, vector<1x32xf32>
    %25 = vector.broadcast %24 : vector<1x32xf32> to vector<12x32xf32>
    %26 = arith.addf %23, %25 : vector<12x32xf32>
    %c0_11 = arith.constant 0 : index
    %c0_12 = arith.constant 0 : index
    %27 = vector.load %arg5[%c0_11, %c0_12] : memref<12x32xf32, #tpu.memory_space<vmem>>, vector<12x32xf32>
    tpu.vector_store %arg5[%c0_11, %c0_12], %26 {strides = array<i32>} : memref<12x32xf32, #tpu.memory_space<vmem>>, vector<12x32xf32>,
    return
  }
  func.func @transform_0(%arg0: i32) -> (i32, i32) {
    %c0_i32 = arith.constant 0 : i32
    %c0_i32_0 = arith.constant 0 : i32
    return %arg0, %c0_i32 : i32, i32
  }
  func.func @transform_1(%arg0: i32) -> (i32, i32) {
    %c0_i32 = arith.constant 0 : i32
    %c0_i32_0 = arith.constant 0 : i32
    return %arg0, %c0_i32 : i32, i32
  }
  func.func @transform_2(%arg0: i32) -> (i32, i32) {
    %c0_i32 = arith.constant 0 : i32
    %c0_i32_0 = arith.constant 0 : i32
    %c0_i32_1 = arith.constant 0 : i32
    return %c0_i32, %c0_i32_0 : i32, i32
  }
  func.func @transform_3(%arg0: i32) -> (i32, i32) {
    %c0_i32 = arith.constant 0 : i32
    %c0_i32_0 = arith.constant 0 : i32
    %c0_i32_1 = arith.constant 0 : i32
    return %c0_i32, %c0_i32_0 : i32, i32
  }
  func.func @transform_4(%arg0: i32) -> (i32, i32) {
    %c0_i32 = arith.constant 0 : i32
    %c0_i32_0 = arith.constant 0 : i32
    return %arg0, %c0_i32 : i32, i32
  }
}

module attributes {stable_mosaic.version = 11 : i64} {
  func.func @_mha_kernel(%arg0: i32, %arg1: memref<1x4x6x8xf32, #tpu.memory_space<vmem>>, %arg2: memref<1x4x8x8xf32, #tpu.memory_space<vmem>>, %arg3: memref<1x4x8x8xf32, #tpu.memory_space<vmem>>, %arg4: memref<6x8xf32, #tpu.memory_space<vmem>>, %arg5: memref<1x1x8xf32, #tpu.memory_space<vmem>>, %arg6: memref<1x4x6x8xf32, #tpu.memory_space<vmem>>) attributes {dimension_semantics = [#tpu.dimension_semantics<parallel>], iteration_bounds = array<i64: 2>, scalar_prefetch = 0 : i64, scratch_operands = 0 : i64, tpu.core_type = #tpu.core_type<tc>, window_params = [{transform_indices = @transform_0, window_bounds = array<i64: 1, 4, 6, 8>}, {transform_indices = @transform_1, window_bounds = array<i64: 1, 4, 8, 8>}, {transform_indices = @transform_2, window_bounds = array<i64: 1, 4, 8, 8>}, {pipeline_mode = #tpu.pipeline_mode<synchronous>, transform_indices = @transform_3, window_bounds = array<i64: 6, 8>}, {transform_indices = @transform_4, window_bounds = array<i64: 1, 1, 8>}, {transform_indices = @transform_5, window_bounds = array<i64: 1, 4, 6, 8>}]} {
    %c0 = arith.constant 0 : index
    %c0_0 = arith.constant 0 : index
    %c0_1 = arith.constant 0 : index
    %c0_2 = arith.constant 0 : index
    %0 = vector.load %arg1[%c0, %c0_0, %c0_1, %c0_2] : memref<1x4x6x8xf32, #tpu.memory_space<vmem>>, vector<1x4x6x8xf32>
    %1 = vector.shape_cast %0 : vector<1x4x6x8xf32> to vector<4x6x8xf32>
    %2 = arith.truncf %1 : vector<4x6x8xf32> to vector<4x6x8xbf16>
    %c0_3 = arith.constant 0 : index
    %c0_4 = arith.constant 0 : index
    %c0_5 = arith.constant 0 : index
    %c0_6 = arith.constant 0 : index
    %3 = vector.load %arg2[%c0_3, %c0_4, %c0_5, %c0_6] : memref<1x4x8x8xf32, #tpu.memory_space<vmem>>, vector<1x4x8x8xf32>
    %4 = vector.shape_cast %3 : vector<1x4x8x8xf32> to vector<4x8x8xf32>
    %5 = arith.truncf %4 : vector<4x8x8xf32> to vector<4x8x8xbf16>
    %c0_7 = arith.constant 0 : index
    %c0_8 = arith.constant 0 : index
    %c0_9 = arith.constant 0 : index
    %c0_10 = arith.constant 0 : index
    %6 = vector.load %arg3[%c0_7, %c0_8, %c0_9, %c0_10] : memref<1x4x8x8xf32, #tpu.memory_space<vmem>>, vector<1x4x8x8xf32>
    %7 = vector.shape_cast %6 : vector<1x4x8x8xf32> to vector<4x8x8xf32>
    %8 = arith.truncf %7 : vector<4x8x8xf32> to vector<4x8x8xbf16>
    %cst = arith.constant dense<0.000000e+00> : vector<4x6x8xf32>
    %9 = tpu.matmul %2, %5, %cst {dimension_numbers = #tpu.dot_dimension_numbers<[2], [2], [1], [1], [0, 0, 0, 1, 1, 1], [0], [0]>} : vector<4x6x8xbf16>, vector<4x8x8xbf16>, vector<4x6x8xf32> -> vector<4x6x8xf32>
    %cst_11 = arith.constant 0.353553385 : f32
    %10 = vector.broadcast %cst_11 : f32 to vector<4x6x8xf32>
    %11 = arith.mulf %9, %10 : vector<4x6x8xf32>
    %c0_12 = arith.constant 0 : index
    %c0_13 = arith.constant 0 : index
    %12 = vector.load %arg4[%c0_12, %c0_13] : memref<6x8xf32, #tpu.memory_space<vmem>>, vector<6x8xf32>
    %13 = vector.shape_cast %12 : vector<6x8xf32> to vector<1x6x8xf32>
    %14 = vector.broadcast %13 : vector<1x6x8xf32> to vector<4x6x8xf32>
    %15 = arith.addf %11, %14 : vector<4x6x8xf32>
    %c0_14 = arith.constant 0 : index
    %c0_15 = arith.constant 0 : index
    %c0_16 = arith.constant 0 : index
    %16 = vector.load %arg5[%c0_14, %c0_15, %c0_16] : memref<1x1x8xf32, #tpu.memory_space<vmem>>, vector<1x1x8xf32>
    %17 = vector.broadcast %16 : vector<1x1x8xf32> to vector<4x6x8xf32>
    %18 = arith.addf %15, %17 : vector<4x6x8xf32>
    %cst_17 = arith.constant dense<0xFF800000> : vector<4x6xf32>
    %19 = vector.multi_reduction <maximumf>, %18, %cst_17 [2] : vector<4x6x8xf32> to vector<4x6xf32>
    %20 = vector.shape_cast %19 : vector<4x6xf32> to vector<4x6x1xf32>
    %cst_18 = arith.constant 0xFF800000 : f32
    %21 = vector.broadcast %cst_18 : f32 to vector<4x6x1xf32>
    %22 = arith.cmpf oeq, %20, %21 : vector<4x6x1xf32>
    %cst_19 = arith.constant 0.000000e+00 : f32
    %23 = vector.broadcast %cst_19 : f32 to vector<4x6x1xf32>
    %24 = arith.select %22, %23, %20 : vector<4x6x1xi1>, vector<4x6x1xf32>
    %25 = vector.broadcast %24 : vector<4x6x1xf32> to vector<4x6x8xf32>
    %26 = arith.subf %18, %25 : vector<4x6x8xf32>
    %27 = math.exp %26 : vector<4x6x8xf32>
    %cst_20 = arith.constant dense<0.000000e+00> : vector<4x6xf32>
    %28 = vector.multi_reduction <add>, %27, %cst_20 [2] : vector<4x6x8xf32> to vector<4x6xf32>
    %29 = vector.shape_cast %28 : vector<4x6xf32> to vector<4x6x1xf32>
    %cst_21 = arith.constant 1.000000e-30 : f32
    %30 = vector.broadcast %cst_21 : f32 to vector<4x6x1xf32>
    %31 = arith.maximumf %29, %30 : vector<4x6x1xf32>
    %32 = tpu.reciprocal %31 {approx = true} : vector<4x6x1xf32> -> vector<4x6x1xf32>
    %33 = vector.broadcast %32 : vector<4x6x1xf32> to vector<4x6x8xf32>
    %34 = arith.mulf %27, %33 : vector<4x6x8xf32>
    %35 = arith.truncf %34 : vector<4x6x8xf32> to vector<4x6x8xbf16>
    %cst_22 = arith.constant dense<0.000000e+00> : vector<4x6x8xf32>
    %36 = tpu.matmul %35, %8, %cst_22 {dimension_numbers = #tpu.dot_dimension_numbers<[2], [1], [1], [2], [0, 0, 0, 1, 1, 2], [0], [0]>} : vector<4x6x8xbf16>, vector<4x8x8xbf16>, vector<4x6x8xf32> -> vector<4x6x8xf32>
    %c0_23 = arith.constant 0 : index
    %c0_24 = arith.constant 0 : index
    %c0_25 = arith.constant 0 : index
    %c0_26 = arith.constant 0 : index
    %37 = vector.load %arg6[%c0_23, %c0_24, %c0_25, %c0_26] : memref<1x4x6x8xf32, #tpu.memory_space<vmem>>, vector<1x4x6x8xf32>
    %38 = vector.shape_cast %37 : vector<1x4x6x8xf32> to vector<4x6x8xf32>
    %39 = vector.shape_cast %36 : vector<4x6x8xf32> to vector<1x4x6x8xf32>
    tpu.vector_store %arg6[%c0_23, %c0_24, %c0_25, %c0_26], %39 {strides = array<i32>} : memref<1x4x6x8xf32, #tpu.memory_space<vmem>>, vector<1x4x6x8xf32>,
    return
  }
  func.func @transform_0(%arg0: i32) -> (i32, i32, i32, i32) {
    %c0_i32 = arith.constant 0 : i32
    %c0_i32_0 = arith.constant 0 : i32
    %c0_i32_1 = arith.constant 0 : i32
    %c0_i32_2 = arith.constant 0 : i32
    return %arg0, %c0_i32, %c0_i32_0, %c0_i32_1 : i32, i32, i32, i32
  }
  func.func @transform_1(%arg0: i32) -> (i32, i32, i32, i32) {
    %c0_i32 = arith.constant 0 : i32
    %c0_i32_0 = arith.constant 0 : i32
    %c0_i32_1 = arith.constant 0 : i32
    %c0_i32_2 = arith.constant 0 : i32
    return %arg0, %c0_i32, %c0_i32_0, %c0_i32_1 : i32, i32, i32, i32
  }
  func.func @transform_2(%arg0: i32) -> (i32, i32, i32, i32) {
    %c0_i32 = arith.constant 0 : i32
    %c0_i32_0 = arith.constant 0 : i32
    %c0_i32_1 = arith.constant 0 : i32
    %c0_i32_2 = arith.constant 0 : i32
    return %arg0, %c0_i32, %c0_i32_0, %c0_i32_1 : i32, i32, i32, i32
  }
  func.func @transform_3(%arg0: i32) -> (i32, i32) {
    %c0_i32 = arith.constant 0 : i32
    %c0_i32_0 = arith.constant 0 : i32
    %c0_i32_1 = arith.constant 0 : i32
    return %c0_i32, %c0_i32_0 : i32, i32
  }
  func.func @transform_4(%arg0: i32) -> (i32, i32, i32) {
    %c0_i32 = arith.constant 0 : i32
    %c0_i32_0 = arith.constant 0 : i32
    %c0_i32_1 = arith.constant 0 : i32
    return %arg0, %c0_i32, %c0_i32_0 : i32, i32, i32
  }
  func.func @transform_5(%arg0: i32) -> (i32, i32, i32, i32) {
    %c0_i32 = arith.constant 0 : i32
    %c0_i32_0 = arith.constant 0 : i32
    %c0_i32_1 = arith.constant 0 : i32
    %c0_i32_2 = arith.constant 0 : i32
    return %arg0, %c0_i32, %c0_i32_0, %c0_i32_1 : i32, i32, i32, i32
  }
}

module attributes {stable_mosaic.version = 11 : i64} {
  func.func @_ffn_kernel(%arg0: i32, %arg1: memref<12x32xf32, #tpu.memory_space<vmem>>, %arg2: memref<32x64xf32, #tpu.memory_space<vmem>>, %arg3: memref<1x64xf32, #tpu.memory_space<vmem>>, %arg4: memref<64x32xf32, #tpu.memory_space<vmem>>, %arg5: memref<1x32xf32, #tpu.memory_space<vmem>>, %arg6: memref<12x32xf32, #tpu.memory_space<vmem>>) attributes {dimension_semantics = [#tpu.dimension_semantics<parallel>], iteration_bounds = array<i64: 1>, scalar_prefetch = 0 : i64, scratch_operands = 0 : i64, tpu.core_type = #tpu.core_type<tc>, window_params = [{transform_indices = @transform_0, window_bounds = array<i64: 12, 32>}, {pipeline_mode = #tpu.pipeline_mode<synchronous>, transform_indices = @transform_1, window_bounds = array<i64: 32, 64>}, {pipeline_mode = #tpu.pipeline_mode<synchronous>, transform_indices = @transform_2, window_bounds = array<i64: 1, 64>}, {pipeline_mode = #tpu.pipeline_mode<synchronous>, transform_indices = @transform_3, window_bounds = array<i64: 64, 32>}, {pipeline_mode = #tpu.pipeline_mode<synchronous>, transform_indices = @transform_4, window_bounds = array<i64: 1, 32>}, {transform_indices = @transform_5, window_bounds = array<i64: 12, 32>}]} {
    %c0 = arith.constant 0 : index
    %c0_0 = arith.constant 0 : index
    %0 = vector.load %arg1[%c0, %c0_0] : memref<12x32xf32, #tpu.memory_space<vmem>>, vector<12x32xf32>
    %1 = arith.truncf %0 : vector<12x32xf32> to vector<12x32xbf16>
    %c0_1 = arith.constant 0 : index
    %c0_2 = arith.constant 0 : index
    %2 = vector.load %arg2[%c0_1, %c0_2] : memref<32x64xf32, #tpu.memory_space<vmem>>, vector<32x64xf32>
    %3 = arith.truncf %2 : vector<32x64xf32> to vector<32x64xbf16>
    %cst = arith.constant dense<0.000000e+00> : vector<12x64xf32>
    %4 = tpu.matmul %1, %3, %cst {dimension_numbers = #tpu.dot_dimension_numbers<[1], [0], [0], [1], [0, 0, 1, 1], [], []>} : vector<12x32xbf16>, vector<32x64xbf16>, vector<12x64xf32> -> vector<12x64xf32>
    %c0_3 = arith.constant 0 : index
    %c0_4 = arith.constant 0 : index
    %5 = vector.load %arg3[%c0_3, %c0_4] : memref<1x64xf32, #tpu.memory_space<vmem>>, vector<1x64xf32>
    %6 = vector.broadcast %5 : vector<1x64xf32> to vector<12x64xf32>
    %7 = arith.addf %4, %6 : vector<12x64xf32>
    %cst_5 = arith.constant 0.000000e+00 : f32
    %8 = vector.broadcast %cst_5 : f32 to vector<12x64xf32>
    %9 = arith.maximumf %7, %8 : vector<12x64xf32>
    %10 = arith.truncf %9 : vector<12x64xf32> to vector<12x64xbf16>
    %c0_6 = arith.constant 0 : index
    %c0_7 = arith.constant 0 : index
    %11 = vector.load %arg4[%c0_6, %c0_7] : memref<64x32xf32, #tpu.memory_space<vmem>>, vector<64x32xf32>
    %12 = arith.truncf %11 : vector<64x32xf32> to vector<64x32xbf16>
    %cst_8 = arith.constant dense<0.000000e+00> : vector<12x32xf32>
    %13 = tpu.matmul %10, %12, %cst_8 {dimension_numbers = #tpu.dot_dimension_numbers<[1], [0], [0], [1], [0, 0, 1, 1], [], []>} : vector<12x64xbf16>, vector<64x32xbf16>, vector<12x32xf32> -> vector<12x32xf32>
    %c0_9 = arith.constant 0 : index
    %c0_10 = arith.constant 0 : index
    %14 = vector.load %arg5[%c0_9, %c0_10] : memref<1x32xf32, #tpu.memory_space<vmem>>, vector<1x32xf32>
    %15 = vector.broadcast %14 : vector<1x32xf32> to vector<12x32xf32>
    %16 = arith.addf %13, %15 : vector<12x32xf32>
    %c0_11 = arith.constant 0 : index
    %c0_12 = arith.constant 0 : index
    %17 = vector.load %arg6[%c0_11, %c0_12] : memref<12x32xf32, #tpu.memory_space<vmem>>, vector<12x32xf32>
    tpu.vector_store %arg6[%c0_11, %c0_12], %16 {strides = array<i32>} : memref<12x32xf32, #tpu.memory_space<vmem>>, vector<12x32xf32>,
    return
  }
  func.func @transform_0(%arg0: i32) -> (i32, i32) {
    %c0_i32 = arith.constant 0 : i32
    %c0_i32_0 = arith.constant 0 : i32
    return %arg0, %c0_i32 : i32, i32
  }
  func.func @transform_1(%arg0: i32) -> (i32, i32) {
    %c0_i32 = arith.constant 0 : i32
    %c0_i32_0 = arith.constant 0 : i32
    %c0_i32_1 = arith.constant 0 : i32
    return %c0_i32, %c0_i32_0 : i32, i32
  }
  func.func @transform_2(%arg0: i32) -> (i32, i32) {
    %c0_i32 = arith.constant 0 : i32
    %c0_i32_0 = arith.constant 0 : i32
    %c0_i32_1 = arith.constant 0 : i32
    return %c0_i32, %c0_i32_0 : i32, i32
  }
  func.func @transform_3(%arg0: i32) -> (i32, i32) {
    %c0_i32 = arith.constant 0 : i32
    %c0_i32_0 = arith.constant 0 : i32
    %c0_i32_1 = arith.constant 0 : i32
    return %c0_i32, %c0_i32_0 : i32, i32
  }
  func.func @transform_4(%arg0: i32) -> (i32, i32) {
    %c0_i32 = arith.constant 0 : i32
    %c0_i32_0 = arith.constant 0 : i32
    %c0_i32_1 = arith.constant 0 : i32
    return %c0_i32, %c0_i32_0 : i32, i32
  }
  func.func @transform_5(%arg0: i32) -> (i32, i32) {
    %c0_i32 = arith.constant 0 : i32
    %c0_i32_0 = arith.constant 0 : i32
    return %arg0, %c0_i32 : i32, i32
  }
}

module attributes {stable_mosaic.version = 11 : i64} {
  func.func @_ln_kernel(%arg0: i32, %arg1: memref<12x32xf32, #tpu.memory_space<vmem>>, %arg2: memref<1x32xf32, #tpu.memory_space<vmem>>, %arg3: memref<1x32xf32, #tpu.memory_space<vmem>>, %arg4: memref<12x32xf32, #tpu.memory_space<vmem>>) attributes {dimension_semantics = [#tpu.dimension_semantics<parallel>], iteration_bounds = array<i64: 1>, scalar_prefetch = 0 : i64, scratch_operands = 0 : i64, tpu.core_type = #tpu.core_type<tc>, window_params = [{transform_indices = @transform_0, window_bounds = array<i64: 12, 32>}, {pipeline_mode = #tpu.pipeline_mode<synchronous>, transform_indices = @transform_1, window_bounds = array<i64: 1, 32>}, {pipeline_mode = #tpu.pipeline_mode<synchronous>, transform_indices = @transform_2, window_bounds = array<i64: 1, 32>}, {transform_indices = @transform_3, window_bounds = array<i64: 12, 32>}]} {
    %c0 = arith.constant 0 : index
    %c0_0 = arith.constant 0 : index
    %0 = vector.load %arg1[%c0, %c0_0] : memref<12x32xf32, #tpu.memory_space<vmem>>, vector<12x32xf32>
    %cst = arith.constant dense<0.000000e+00> : vector<12xf32>
    %1 = vector.multi_reduction <add>, %0, %cst [1] : vector<12x32xf32> to vector<12xf32>
    %2 = vector.shape_cast %1 : vector<12xf32> to vector<12x1xf32>
    %cst_1 = arith.constant 3.200000e+01 : f32
    %3 = vector.broadcast %cst_1 : f32 to vector<12x1xf32>
    %4 = arith.divf %2, %3 : vector<12x1xf32>
    %5 = vector.broadcast %4 : vector<12x1xf32> to vector<12x32xf32>
    %6 = arith.subf %0, %5 : vector<12x32xf32>
    %7 = arith.mulf %6, %6 : vector<12x32xf32>
    %cst_2 = arith.constant dense<0.000000e+00> : vector<12xf32>
    %8 = vector.multi_reduction <add>, %7, %cst_2 [1] : vector<12x32xf32> to vector<12xf32>
    %9 = vector.shape_cast %8 : vector<12xf32> to vector<12x1xf32>
    %cst_3 = arith.constant 3.200000e+01 : f32
    %10 = vector.broadcast %cst_3 : f32 to vector<12x1xf32>
    %11 = arith.divf %9, %10 : vector<12x1xf32>
    %12 = vector.broadcast %4 : vector<12x1xf32> to vector<12x32xf32>
    %13 = arith.subf %0, %12 : vector<12x32xf32>
    %cst_4 = arith.constant 9.99999974E-6 : f32
    %14 = vector.broadcast %cst_4 : f32 to vector<12x1xf32>
    %15 = arith.addf %11, %14 : vector<12x1xf32>
    %16 = math.rsqrt %15 : vector<12x1xf32>
    %17 = vector.broadcast %16 : vector<12x1xf32> to vector<12x32xf32>
    %18 = arith.mulf %13, %17 : vector<12x32xf32>
    %c0_5 = arith.constant 0 : index
    %c0_6 = arith.constant 0 : index
    %19 = vector.load %arg2[%c0_5, %c0_6] : memref<1x32xf32, #tpu.memory_space<vmem>>, vector<1x32xf32>
    %20 = vector.broadcast %19 : vector<1x32xf32> to vector<12x32xf32>
    %21 = arith.mulf %18, %20 : vector<12x32xf32>
    %c0_7 = arith.constant 0 : index
    %c0_8 = arith.constant 0 : index
    %22 = vector.load %arg3[%c0_7, %c0_8] : memref<1x32xf32, #tpu.memory_space<vmem>>, vector<1x32xf32>
    %23 = vector.broadcast %22 : vector<1x32xf32> to vector<12x32xf32>
    %24 = arith.addf %21, %23 : vector<12x32xf32>
    %c0_9 = arith.constant 0 : index
    %c0_10 = arith.constant 0 : index
    %25 = vector.load %arg4[%c0_9, %c0_10] : memref<12x32xf32, #tpu.memory_space<vmem>>, vector<12x32xf32>
    tpu.vector_store %arg4[%c0_9, %c0_10], %24 {strides = array<i32>} : memref<12x32xf32, #tpu.memory_space<vmem>>, vector<12x32xf32>,
    return
  }
  func.func @transform_0(%arg0: i32) -> (i32, i32) {
    %c0_i32 = arith.constant 0 : i32
    %c0_i32_0 = arith.constant 0 : i32
    return %arg0, %c0_i32 : i32, i32
  }
  func.func @transform_1(%arg0: i32) -> (i32, i32) {
    %c0_i32 = arith.constant 0 : i32
    %c0_i32_0 = arith.constant 0 : i32
    %c0_i32_1 = arith.constant 0 : i32
    return %c0_i32, %c0_i32_0 : i32, i32
  }
  func.func @transform_2(%arg0: i32) -> (i32, i32) {
    %c0_i32 = arith.constant 0 : i32
    %c0_i32_0 = arith.constant 0 : i32
    %c0_i32_1 = arith.constant 0 : i32
    return %c0_i32, %c0_i32_0 : i32, i32
  }
  func.func @transform_3(%arg0: i32) -> (i32, i32) {
    %c0_i32 = arith.constant 0 : i32
    %c0_i32_0 = arith.constant 0 : i32
    return %arg0, %c0_i32 : i32, i32
  }
}

module attributes {stable_mosaic.version = 11 : i64} {
  func.func @_linear_kernel(%arg0: i32, %arg1: i32, %arg2: i32, %arg3: memref<12x32xf32, #tpu.memory_space<vmem>>, %arg4: memref<32x60xf32, #tpu.memory_space<vmem>>, %arg5: memref<1x60xf32, #tpu.memory_space<vmem>>, %arg6: memref<12x60xf32, #tpu.memory_space<vmem>>, %arg7: memref<12x60xf32, #tpu.memory_space<vmem>>) attributes {dimension_semantics = [#tpu.dimension_semantics<parallel>, #tpu.dimension_semantics<parallel>, #tpu.dimension_semantics<arbitrary>], iteration_bounds = array<i64: 1, 1, 1>, scalar_prefetch = 0 : i64, scratch_operands = 1 : i64, tpu.core_type = #tpu.core_type<tc>, window_params = [{transform_indices = @transform_0, window_bounds = array<i64: 12, 32>}, {transform_indices = @transform_1, window_bounds = array<i64: 32, 60>}, {transform_indices = @transform_2, window_bounds = array<i64: 1, 60>}, {transform_indices = @transform_3, window_bounds = array<i64: 12, 60>}]} {
    %c0_i32 = arith.constant 0 : i32
    %0 = arith.cmpi eq, %arg2, %c0_i32 : i32
    %1 = arith.extui %0 : i1 to i32
    %c0_i32_0 = arith.constant 0 : i32
    %2 = arith.cmpi ne, %1, %c0_i32_0 : i32
    scf.if %2 {
      %cst_10 = arith.constant 0.000000e+00 : f32
      %14 = vector.broadcast %cst_10 : f32 to vector<12x60xf32>
      %c0_11 = arith.constant 0 : index
      %c0_12 = arith.constant 0 : index
      %15 = vector.load %arg7[%c0_11, %c0_12] : memref<12x60xf32, #tpu.memory_space<vmem>>, vector<12x60xf32>
      tpu.vector_store %arg7[%c0_11, %c0_12], %14 {strides = array<i32>} : memref<12x60xf32, #tpu.memory_space<vmem>>, vector<12x60xf32>,
    } else {
    }
    %c0 = arith.constant 0 : index
    %c0_1 = arith.constant 0 : index
    %3 = vector.load %arg7[%c0, %c0_1] : memref<12x60xf32, #tpu.memory_space<vmem>>, vector<12x60xf32>
    %c0_2 = arith.constant 0 : index
    %c0_3 = arith.constant 0 : index
    %4 = vector.load %arg3[%c0_2, %c0_3] : memref<12x32xf32, #tpu.memory_space<vmem>>, vector<12x32xf32>
    %5 = arith.truncf %4 : vector<12x32xf32> to vector<12x32xbf16>
    %c0_4 = arith.constant 0 : index
    %c0_5 = arith.constant 0 : index
    %6 = vector.load %arg4[%c0_4, %c0_5] : memref<32x60xf32, #tpu.memory_space<vmem>>, vector<32x60xf32>
    %7 = arith.truncf %6 : vector<32x60xf32> to vector<32x60xbf16>
    %cst = arith.constant dense<0.000000e+00> : vector<12x60xf32>
    %8 = tpu.matmul %5, %7, %cst {dimension_numbers = #tpu.dot_dimension_numbers<[1], [0], [0], [1], [0, 0, 1, 1], [], []>} : vector<12x32xbf16>, vector<32x60xbf16>, vector<12x60xf32> -> vector<12x60xf32>
    %9 = arith.addf %3, %8 : vector<12x60xf32>
    %c0_6 = arith.constant 0 : index
    %c0_7 = arith.constant 0 : index
    %10 = vector.load %arg7[%c0_6, %c0_7] : memref<12x60xf32, #tpu.memory_space<vmem>>, vector<12x60xf32>
    tpu.vector_store %arg7[%c0_6, %c0_7], %9 {strides = array<i32>} : memref<12x60xf32, #tpu.memory_space<vmem>>, vector<12x60xf32>,
    %c0_i32_8 = arith.constant 0 : i32
    %11 = arith.cmpi eq, %arg2, %c0_i32_8 : i32
    %12 = arith.extui %11 : i1 to i32
    %c0_i32_9 = arith.constant 0 : i32
    %13 = arith.cmpi ne, %12, %c0_i32_9 : i32
    scf.if %13 {
      %c0_10 = arith.constant 0 : index
      %c0_11 = arith.constant 0 : index
      %14 = vector.load %arg7[%c0_10, %c0_11] : memref<12x60xf32, #tpu.memory_space<vmem>>, vector<12x60xf32>
      %c0_12 = arith.constant 0 : index
      %c0_13 = arith.constant 0 : index
      %15 = vector.load %arg5[%c0_12, %c0_13] : memref<1x60xf32, #tpu.memory_space<vmem>>, vector<1x60xf32>
      %16 = vector.broadcast %15 : vector<1x60xf32> to vector<12x60xf32>
      %17 = arith.addf %14, %16 : vector<12x60xf32>
      %c0_14 = arith.constant 0 : index
      %c0_15 = arith.constant 0 : index
      %18 = vector.load %arg6[%c0_14, %c0_15] : memref<12x60xf32, #tpu.memory_space<vmem>>, vector<12x60xf32>
      tpu.vector_store %arg6[%c0_14, %c0_15], %17 {strides = array<i32>} : memref<12x60xf32, #tpu.memory_space<vmem>>, vector<12x60xf32>,
    } else {
    }
    return
  }
  func.func @transform_0(%arg0: i32, %arg1: i32, %arg2: i32) -> (i32, i32) {
    %c0_i32 = arith.constant 0 : i32
    return %arg0, %arg2 : i32, i32
  }
  func.func @transform_1(%arg0: i32, %arg1: i32, %arg2: i32) -> (i32, i32) {
    %c0_i32 = arith.constant 0 : i32
    return %arg2, %arg1 : i32, i32
  }
  func.func @transform_2(%arg0: i32, %arg1: i32, %arg2: i32) -> (i32, i32) {
    %c0_i32 = arith.constant 0 : i32
    %c0_i32_0 = arith.constant 0 : i32
    return %c0_i32, %arg1 : i32, i32
  }
  func.func @transform_3(%arg0: i32, %arg1: i32, %arg2: i32) -> (i32, i32) {
    %c0_i32 = arith.constant 0 : i32
    return %arg0, %arg1 : i32, i32
  }
}

</mosaic_0001>

<bundles_post_ra>
// kernel: transformer_forward.49
= control target key start
LH: loop header
LB: loop body
LE: loop exit
PB: predicated region body
PF: predicated region fallthrough
CT: control target
= control target key end

     0   :  { %s219_s9 = smov 0   ;;  %s247_s0 = inlined_call_operand.vmem [shape: f32[2,8,32], index: 0, kind: input, shape index: {}]   ;;  %s248_s1 = inlined_call_operand.vmem [shape: f32[8,32], index: 1, kind: input, shape index: {}]   ;;  %s249_s2 = inlined_call_operand.vmem [shape: f32[2,8,32], index: 2, kind: output, shape index: {}]  }
   0x1 LB: > { %s198_s10 = sadd.s32 4294967295, %s221_s9   ;;  %p202_p0 = scmp.ge.s32.totalorder %s221_s9, 1  ;;  %s221_s9 = sphi %s219_s9, %s12_s9  }
   0x2   : > { %p111_p1 = scmp.lt.s32.totalorder %s221_s9, 3 }
   0x4   : > { %p112_p2 = pnand %p202_p0, %p111_p1 }
   0x5   : > { %p131_p3 = scmp.lt.s32.totalorder (!%p112_p2), %s198_s10, 1  ;;  %v141_v1 = vld [vmem:[%s248_s1] sm:$0xff] (!%p112_p2)  ;;  %vm143_vm0 = vcmask (!%p112_p2), 261120  }
   0x6   : > { %115 = sbr.rel (%p112_p2) target bundleno = 22 (0x16), region = 28 }
   0xd   : > { %s251_s10 = smov (!%p131_p3, %s198_s10), 1 }
   0xe   : > { %s203_s11 = sshll.u32 %s251_s10, 3 }
   0xf   : > { %s134_s14 = scalar_lea.vmem %s247_s0, %s203_s11  ;;  %s138_s19 = scalar_lea.vmem %s249_s2, %s203_s11 }
  0x10   : > { %v139_v0 = vld [vmem:[%s134_s14] sm:$0xff] }
  0x11   : > { %v140_v2 = vmul.f32 5.656854, %v139_v0 }
  0x13   : > { %v142_v3 = vadd.f32 %v141_v1, %v140_v2 }
  0x15   : > { %144 = vst.msk [vmem:[%s138_s19] sm:$0xff] %vm143_vm0, %v142_v3 }
  0x16 PF: > { %s12_s9 = sadd.s32 1, %s221_s9  }
  0x17   : > { %p9_p4 = scmp.ge.s32.totalorder %s12_s9, 4  }
  0x19   :  { %11 = sbr.rel (!%p9_p4) target bundleno = 1 (0x1), region = 58 }

// kernel: transformer_forward.52
= control target key start
LH: loop header
LB: loop body
LE: loop exit
PB: predicated region body
PF: predicated region fallthrough
CT: control target
= control target key end

     0   :  { %vm19_vm0 = vcmask 261120   ;;  %v117_v0 = vmov 0.0   ;;  %vm118_vm1 = vmmov 0   ;;  %s173_s1 = inlined_call_operand.vmem [shape: f32[32,32], index: 1, kind: input, shape index: {}]   ;;  %s174_s0 = inlined_call_operand.vmem [shape: f32[16,32], index: 0, kind: input, shape index: {}]   ;;  %s175_s2 = inlined_call_operand.vmem [shape: f32[1,32], index: 2, kind: input, shape index: {}]   ;;  %s176_s3 = inlined_call_operand.vmem [shape: f32[16,32], index: 3, kind: output, shape index: {}]  }
   0x1   :  { %107 = vmatprep.subr.bf16.mxu0 %v117_v0  ;;  %v27_v1 = vld [vmem:[%s173_s1] sm:$0xff]  ;;  %v28_v2 = vld [vmem:[%s173_s1 + $0x8] sm:$0xff]  ;;  %v29_v3 = vld [vmem:[%s173_s1 + $0x10] sm:$0xff]  ;;  %111 = vmatprep.mubr.msk.bf16.mxu0 %vm118_vm1, %v117_v0  ;;  %20 = vst.msk [vmem:[#allocation2] sm:$0xff] %vm19_vm0, %v117_v0 }
   0x2   :  { %21 = vst.msk [vmem:[#allocation2 + $0x8] sm:$0xff] %vm19_vm0, %v117_v0  ;;  %v31_v4 = vpack.c.bf16 %v28_v2, %v27_v1  ;;  %v30_v5 = vld [vmem:[%s173_s1 + $0x18] sm:$0xff]  ;;  %v24_v7 = vld [vmem:[%s174_s0] sm:$0xff]  ;;  %v25_v8 = vld [vmem:[%s174_s0 + $0x8] sm:$0xff] }
   0x3   :  { %v32_v6 = vpack.c.bf16 %v30_v5, %v29_v3  ;;  %v26_v9 = vpack.c.bf16 %v25_v8, %v24_v7  ;;  %v103_v18 = vld [vmem:[%s175_s2] ss:$0 sm:$0xff] }
   0x4   :  { %108 = vmatpush3.bf16.msra.mxu0 %v31_v4 }
   0x5   :  { %109 = vmatprep.subr.bf16.mxu0 %v117_v0 }
   0x8   :  { %110 = vmatpush3.bf16.msra.mxu0 %v32_v6  ;;  %v22_v10 = vld [vmem:[#allocation2] sm:$0xff] }
   0x9   :  { %v23_v12 = vld [vmem:[#allocation2 + $0x8] sm:$0xff] }
   0xb   :  { %112 = vmatmul.mubr.msk.bf16.vlgmr.msra.gmra.mrb[0].mxu0 %vm19_vm0, %v26_v9 }
  0xde   :  { %v71_v11 = vpop.f32.mrb[0].mxu0 }
  0xdf   :  { %v78_v13 = vadd.f32 %v71_v11, %v22_v10  ;;  %v113_v14 = vpop.f32.mrb[1].mxu0 }
  0xe0   :  { %v74_v15 = vpop.f32.mrb[2].mxu0 }
  0xe1   :  { %80 = vst.msk [vmem:[#allocation2] sm:$0xff] %vm19_vm0, %v78_v13  ;;  %v79_v16 = vadd.f32 %v74_v15, %v23_v12  ;;  %v114_v17 = vpop.f32.mrb[3].mxu0 }
  0xe3   :  { %81 = vst.msk [vmem:[#allocation2 + $0x8] sm:$0xff] %vm19_vm0, %v79_v16 }
  0xe8   :  { %v85_v19 = vld [vmem:[#allocation2] sm:$0xff] }
  0xe9   :  { %v94_v20 = vadd.f32 %v103_v18, %v85_v19 }
  0xea   :  { %v86_v21 = vld [vmem:[#allocation2 + $0x8] sm:$0xff] }
  0xeb   :  { %96 = vst.msk [vmem:[%s176_s3] sm:$0xff] %vm19_vm0, %v94_v20  ;;  %v95_v22 = vadd.f32 %v103_v18, %v86_v21 }
  0xed   :  { %97 = vst.msk [vmem:[%s176_s3 + $0x8] sm:$0xff] %vm19_vm0, %v95_v22 }

// kernel: transformer_forward.54
= control target key start
LH: loop header
LB: loop body
LE: loop exit
PB: predicated region body
PF: predicated region fallthrough
CT: control target
= control target key end

     0   :  { %s1004_s18 = smov 0   ;;  %s1091_s0 = inlined_call_operand.vmem [shape: f32[2,4,8,8], index: 0, kind: input, shape index: {}]   ;;  %s1092_s1 = inlined_call_operand.vmem [shape: f32[2,4,8,8], index: 1, kind: input, shape index: {}]   ;;  %s1093_s2 = inlined_call_operand.vmem [shape: f32[2,4,8,8], index: 2, kind: input, shape index: {}]   ;;  %s1094_s3 = inlined_call_operand.vmem [shape: f32[8,8], index: 3, kind: input, shape index: {}]   ;;  %s1095_s4 = inlined_call_operand.vmem [shape: f32[2,1,8], index: 4, kind: input, shape index: {}]   ;;  %s1096_s5 = inlined_call_operand.vmem [shape: f32[2,4,8,8], index: 5, kind: output, shape index: {}]  }
   0x1 LB: > { %s846_s19 = sadd.s32 4294967295, %s970_s18   ;;  %p850_p0 = scmp.ge.s32.totalorder %s970_s18, 1  ;;  %s970_s18 = sphi %s1004_s18, %s15_s18  }
   0x2   : > { %p215_p1 = scmp.lt.s32.totalorder %s970_s18, 3 }
   0x4   : > { %p216_p2 = pnand %p850_p0, %p215_p1 }
   0x5   : > { %p256_p3 = scmp.lt.s32.totalorder (!%p216_p2), %s846_s19, 1  ;;  %v972_v0 = vmov (!%p216_p2), 0.0   ;;  %vm973_vm0 = vmmov (!%p216_p2), 0   ;;  %vm304_vm1 = vcmask (!%p216_p2), 64512   ;;  %v493_v22 = vld [vmem:[%s1094_s3] sm:$0xff] (!%p216_p2)  ;;  %vm572_vm6 = vcmask (!%p216_p2), 1043456  }
   0x6   : > { %219 = sbr.rel (%p216_p2) target bundleno = 792 (0x318), region = 40  ;;  %890 = vmatprep.subr.bf16.mxu0 (!%p216_p2), %v972_v0  ;;  %896 = vmatprep.subr.bf16.mxu1 (!%p216_p2), %v972_v0 }
   0x7   : > { %892 = vmatprep.mubr.msk.bf16.mxu0 (!%p216_p2), %vm973_vm0, %v972_v0  ;;  %898 = vmatprep.mubr.msk.bf16.mxu1 (!%p216_p2), %vm973_vm0, %v972_v0 }
   0xd   : > { %s1098_s19 = smov (!%p256_p3, %s846_s19), 1 }
   0xe   : > { %s1021_s20 = sshll.u32 %s1098_s19, 5  ;;  %s273_s29 = scalar_lea.vmem %s1095_s4, %s1098_s19 }
   0xf   : > { %s265_s23 = scalar_lea.vmem %s1092_s1, %s1021_s20  ;;  %s260_s26 = scalar_lea.vmem %s1091_s0, %s1021_s20  ;;  %v863_v30 = vld [vmem:[%s273_s29] ss:$0 sm:$0xff] }
  0x10   : > { %v288_v1 = vld [vmem:[%s265_s23] sm:$0xff]  ;;  %v289_v2 = vld [vmem:[%s265_s23 + $0x8] sm:$0xff]  ;;  %v290_v5 = vld [vmem:[%s265_s23 + $0x10] sm:$0xff]  ;;  %s270_s9 = scalar_lea.vmem %s1093_s2, %s1021_s20  ;;  %s278_s12 = scalar_lea.vmem %s1096_s5, %s1021_s20 }
  0x11   : > { %v292_v3 = vpack.c.bf16 %v288_v1, %v288_v1  ;;  %v293_v4 = vpack.c.bf16 %v289_v2, %v289_v2  ;;  %v291_v6 = vld [vmem:[%s265_s23 + $0x18] sm:$0xff]  ;;  %v280_v9 = vld [vmem:[%s260_s26] sm:$0xff]  ;;  %v281_v10 = vld [vmem:[%s260_s26 + $0x8] sm:$0xff]  ;;  %v294_v11 = vpack.c.bf16 %v290_v5, %v290_v5 }
  0x12   : > { %v295_v12 = vpack.c.bf16 %v291_v6, %v291_v6  ;;  %v284_v13 = vpack.c.bf16 %v280_v9, %v280_v9  ;;  %v285_v14 = vpack.c.bf16 %v281_v10, %v281_v10  ;;  %v282_v17 = vld [vmem:[%s260_s26 + $0x10] sm:$0xff]  ;;  %v283_v18 = vld [vmem:[%s260_s26 + $0x18] sm:$0xff] }
  0x13   : > { %v309_v7 = vsel %vm304_vm1, %v292_v3, 0  ;;  %v355_v8 = vsel %vm304_vm1, %v293_v4, 0  ;;  %v401_v15 = vsel %vm304_vm1, %v294_v11, 0  ;;  %v286_v19 = vpack.c.bf16 %v282_v17, %v282_v17 }
  0x14   : > { %891 = vmatpush3.bf16.xpose.msra.mxu0 %v309_v7  ;;  %897 = vmatpush3.bf16.xpose.msra.mxu1 %v355_v8  ;;  %v447_v16 = vsel %vm304_vm1, %v295_v12, 0  ;;  %v287_v20 = vpack.c.bf16 %v283_v18, %v283_v18 }
  0x15   : > { %902 = vmatprep.subr.bf16.mxu0 %v972_v0  ;;  %908 = vmatprep.subr.bf16.mxu1 %v972_v0 }
  0x1b   : > { %893 = vmatmul.mubr.msk.bf16.vlgmr.msra.gmra.mrb[0].mxu0 %vm304_vm1, %v284_v13  ;;  %899 = vmatmul.mubr.msk.bf16.vlgmr.msra.gmra.mrb[0].mxu1 %vm304_vm1, %v285_v14 }
  0x1c   : > { %903 = vmatpush3.bf16.xpose.msra.mxu0 %v401_v15  ;;  %909 = vmatpush3.bf16.xpose.msra.mxu1 %v447_v16  ;;  %v296_v16 = vld [vmem:[%s270_s9] sm:$0xff] }
  0x1d   : > { %904 = vmatprep.mubr.msk.bf16.mxu0 %vm973_vm0, %v972_v0  ;;  %910 = vmatprep.mubr.msk.bf16.mxu1 %vm973_vm0, %v972_v0  ;;  %v300_v17 = vpack.c.bf16 %v296_v16, %v296_v16 }
  0x1e   : > { %914 = vmatprep.subr.bf16.mxu0 %v972_v0  ;;  %920 = vmatprep.subr.bf16.mxu1 %v972_v0 }
  0x1f   : > { %v574_v18 = vsel %vm572_vm6, %v300_v17, 0 }
  0x23   : > { %905 = vmatmul.mubr.msk.bf16.vlgmr.msra.gmra.mrb[4].mxu0 %vm304_vm1, %v286_v19  ;;  %911 = vmatmul.mubr.msk.bf16.vlgmr.msra.gmra.mrb[4].mxu1 %vm304_vm1, %v287_v20  ;;  %v297_v19 = vld [vmem:[%s270_s9 + $0x8] sm:$0xff] }
  0x24   : > { %916 = vmatprep.mubr.msk.bf16.mxu0 %vm973_vm0, %v972_v0  ;;  %922 = vmatprep.mubr.msk.bf16.mxu1 %vm973_vm0, %v972_v0  ;;  %v301_v20 = vpack.c.bf16 %v297_v19, %v297_v19 }
  0x25   : > { %915 = vmatpush3.bf16.msra.mxu0 %v574_v18 }
  0x26   : > { %926 = vmatprep.subr.bf16.mxu0 %v972_v0 }
  0xee   : > { %v345_v21 = vpop.f32.mrb[0].mxu0  ;;  %v391_v23 = vpop.f32.mrb[0].mxu1 }
  0xef   : > { %v489_v24 = vmul.f32 0.35355338, %v345_v21  ;;  %v894_v25 = vpop.f32.mrb[1].mxu0  ;;  %v490_v26 = vmul.f32 0.35355338, %v391_v23  ;;  %v900_v27 = vpop.f32.mrb[1].mxu1 }
  0xf0   : > { %v348_v28 = vpop.f32.mrb[2].mxu0  ;;  %v394_v29 = vpop.f32.mrb[2].mxu1  ;;  %v620_v21 = vsel %vm572_vm6, %v301_v20, 0  ;;  %v299_v25 = vld [vmem:[%s270_s9 + $0x18] sm:$0xff] }
  0xf1   : > { %v494_v31 = vadd.f32 %v493_v22, %v489_v24  ;;  %v495_v32 = vadd.f32 %v493_v22, %v490_v26  ;;  %v895_v33 = vpop.f32.mrb[3].mxu0  ;;  %v901_v34 = vpop.f32.mrb[3].mxu1  ;;  %921 = vmatpush3.bf16.msra.mxu1 %v620_v21  ;;  %v303_v26 = vpack.c.bf16 %v299_v25, %v299_v25 }
  0xf2   : > { %932 = vmatprep.subr.bf16.mxu1 %v972_v0 }
  0xf3   : > { %v505_v35 = vadd.f32 %v863_v30, %v494_v31  ;;  %v506_v36 = vadd.f32 %v863_v30, %v495_v32  ;;  %v712_v27 = vsel %vm572_vm6, %v303_v26, 0 }
  0xf5   : > { %v509_v37 = vsel %vm304_vm1, %v505_v35, -inf  ;;  %v512_v40 = vsel %vm304_vm1, %v506_v36, -inf }
  0xf6   : > { %510 = vmax.xlane.f32.xlu0 %v509_v37  ;;  %v437_v38 = vpop.f32.mrb[4].mxu0  ;;  %v483_v39 = vpop.f32.mrb[4].mxu1 }
  0xf7   : > { %v491_v41 = vmul.f32 0.35355338, %v437_v38  ;;  %v906_v42 = vpop.f32.mrb[5].mxu0  ;;  %v492_v43 = vmul.f32 0.35355338, %v483_v39  ;;  %v912_v44 = vpop.f32.mrb[5].mxu1 }
  0xf8   : > { %v440_v45 = vpop.f32.mrb[6].mxu0  ;;  %v486_v46 = vpop.f32.mrb[6].mxu1 }
  0xf9   : > { %v496_v47 = vadd.f32 %v493_v22, %v491_v41  ;;  %v497_v48 = vadd.f32 %v493_v22, %v492_v43  ;;  %v907_v49 = vpop.f32.mrb[7].mxu0  ;;  %v913_v50 = vpop.f32.mrb[7].mxu1  ;;  %v298_v22 = vld [vmem:[%s270_s9 + $0x10] sm:$0xff] }
  0xfa   : > { %513 = vmax.xlane.f32.xlu0 %v512_v40  ;;  %v302_v23 = vpack.c.bf16 %v298_v22, %v298_v22 }
  0xfb   : > { %v507_v51 = vadd.f32 %v863_v30, %v496_v47  ;;  %v508_v52 = vadd.f32 %v863_v30, %v497_v48 }
  0xfc   : > { %v666_v24 = vsel %vm572_vm6, %v302_v23, 0 }
  0xfd   : > { %v515_v53 = vsel %vm304_vm1, %v507_v51, -inf  ;;  %v518_v54 = vsel %vm304_vm1, %v508_v52, -inf }
  0xfe   : > { %516 = vmax.xlane.f32.xlu1 %v515_v53 }
 0x102   : > { %519 = vmax.xlane.f32.xlu1 %v518_v54 }
 0x183   : > { %v511_v55 = vpop.xlane.xlu0 %510 }
 0x184   : > { %vm521_vm2 = vcmp.eq.f32.partialorder %v511_v55, -inf }
 0x185   : > { %v525_v56 = vsel %vm521_vm2, 0.0, %v511_v55 }
 0x186   : > { %v529_v57 = vsub.f32 %v505_v35, %v525_v56 }
 0x187   : > { %v514_v58 = vpop.xlane.xlu0 %513 }
 0x188   : > { %v533_v59 = vmul.f32 1.442695, %v529_v57  ;;  %vm522_vm3 = vcmp.eq.f32.partialorder %v514_v58, -inf }
 0x189   : > { %v526_v60 = vsel %vm522_vm3, 0.0, %v514_v58 }
 0x18a   : > { %948 = vpow2.f32 %v533_v59  ;;  %v530_v61 = vsub.f32 %v506_v36, %v526_v60 }
 0x18b   : > { %v517_v62 = vpop.xlane.xlu1 %516 }
 0x18c   : > { %v535_v63 = vmul.f32 1.442695, %v530_v61  ;;  %vm523_vm4 = vcmp.eq.f32.partialorder %v517_v62, -inf }
 0x18d   : > { %v527_v1 = vsel %vm523_vm4, 0.0, %v517_v62 }
 0x18e   : > { %950 = vpow2.f32 %v535_v63  ;;  %v531_v2 = vsub.f32 %v507_v51, %v527_v1 }
 0x18f   : > { %v520_v3 = vpop.xlane.xlu1 %519 }
 0x190   : > { %v537_v4 = vmul.f32 1.442695, %v531_v2  ;;  %vm524_vm5 = vcmp.eq.f32.partialorder %v520_v3, -inf }
 0x191   : > { %v528_v5 = vsel %vm524_vm5, 0.0, %v520_v3 }
 0x192   : > { %952 = vpow2.f32 %v537_v4  ;;  %v532_v6 = vsub.f32 %v508_v52, %v528_v5 }
 0x194   : > { %v949_v7 = vpop.eup %948  ;;  %v539_v8 = vmul.f32 1.442695, %v532_v6 }
 0x195   : > { %v541_v9 = vsel %vm304_vm1, %v949_v7, 0.0 }
 0x196   : > { %954 = vpow2.f32 %v539_v8  ;;  %542 = vadd.xlane.f32.xlu0 %v541_v9 }
 0x198   : > { %v951_v10 = vpop.eup %950 }
 0x199   : > { %v544_v11 = vsel %vm304_vm1, %v951_v10, 0.0 }
 0x19a   : > { %545 = vadd.xlane.f32.xlu1 %v544_v11 }
 0x19c   : > { %v953_v12 = vpop.eup %952 }
 0x19d   : > { %v547_v13 = vsel %vm304_vm1, %v953_v12, 0.0 }
 0x19e   : > { %548 = vadd.xlane.f32.xlu0 %v547_v13 }
 0x1a0   : > { %v955_v14 = vpop.eup %954 }
 0x1a1   : > { %v550_v15 = vsel %vm304_vm1, %v955_v14, 0.0 }
 0x1a2   : > { %551 = vadd.xlane.f32.xlu1 %v550_v15 }
 0x223   : > { %v543_v28 = vpop.xlane.xlu0 %542 }
 0x224   : > { %v553_v29 = vmax.f32 %v543_v28, 1e-30 }
 0x226   : > { %956 = vrcp.f32 %v553_v29 }
 0x227   : > { %v546_v30 = vpop.xlane.xlu1 %545 }
 0x228   : > { %v554_v31 = vmax.f32 %v546_v30, 1e-30 }
 0x22a   : > { %958 = vrcp.f32 %v554_v31 }
 0x22b   : > { %v549_v32 = vpop.xlane.xlu0 %548 }
 0x22c   : > { %v555_v33 = vmax.f32 %v549_v32, 1e-30 }
 0x22e   : > { %960 = vrcp.f32 %v555_v33 }
 0x22f   : > { %v552_v34 = vpop.xlane.xlu1 %551 }
 0x230   : > { %v957_v35 = vpop.eup %956  ;;  %v556_v36 = vmax.f32 %v552_v34, 1e-30 }
 0x231   : > { %v561_v37 = vmul.f32 %v957_v35, %v949_v7 }
 0x232   : > { %962 = vrcp.f32 %v556_v36 }
 0x233   : > { %v565_v38 = vpack.c.bf16 %v561_v37, %v561_v37 }
 0x234   : > { %v959_v39 = vpop.eup %958 }
 0x235   : > { %v562_v40 = vmul.f32 %v959_v39, %v951_v10  ;;  %917 = vmatmul.mubr.msk.bf16.vlgmr.msra.gmra.mrb[8].mxu0 %vm304_vm1, %v565_v38 }
 0x236   : > { %927 = vmatpush3.bf16.msra.mxu0 %v666_v24  ;;  %928 = vmatprep.mubr.msk.bf16.mxu0 %vm973_vm0, %v972_v0 }
 0x237   : > { %v566_v41 = vpack.c.bf16 %v562_v40, %v562_v40 }
 0x238   : > { %v961_v42 = vpop.eup %960 }
 0x239   : > { %v563_v43 = vmul.f32 %v961_v42, %v953_v12  ;;  %923 = vmatmul.mubr.msk.bf16.vlgmr.msra.gmra.mrb[8].mxu1 %vm304_vm1, %v566_v41 }
 0x23a   : > { %933 = vmatpush3.bf16.msra.mxu1 %v712_v27  ;;  %934 = vmatprep.mubr.msk.bf16.mxu1 %vm973_vm0, %v972_v0 }
 0x23b   : > { %v567_v44 = vpack.c.bf16 %v563_v43, %v563_v43 }
 0x23c   : > { %v963_v45 = vpop.eup %962 }
 0x23d   : > { %v564_v46 = vmul.f32 %v963_v45, %v955_v14  ;;  %929 = vmatmul.mubr.msk.bf16.vlgmr.msra.gmra.mrb[12].mxu0 %vm304_vm1, %v567_v44 }
 0x23f   : > { %v568_v47 = vpack.c.bf16 %v564_v46, %v564_v46 }
 0x241   : > { %935 = vmatmul.mubr.msk.bf16.vlgmr.msra.gmra.mrb[12].mxu1 %vm304_vm1, %v568_v47 }
 0x308   : > { %v610_v48 = vpop.f32.mrb[8].mxu0 }
 0x309   : > { %754 = vst.msk [vmem:[%s278_s12] sm:$0xff] %vm304_vm1, %v610_v48  ;;  %v918_v49 = vpop.f32.mrb[9].mxu0 }
 0x30a   : > { %v613_v50 = vpop.f32.mrb[10].mxu0 }
 0x30b   : > { %v919_v51 = vpop.f32.mrb[11].mxu0 }
 0x30c   : > { %v656_v52 = vpop.f32.mrb[8].mxu1 }
 0x30d   : > { %755 = vst.msk [vmem:[%s278_s12 + $0x8] sm:$0xff] %vm304_vm1, %v656_v52  ;;  %v924_v0 = vpop.f32.mrb[9].mxu1 }
 0x30e   : > { %v659_v53 = vpop.f32.mrb[10].mxu1 }
 0x30f   : > { %v925_v54 = vpop.f32.mrb[11].mxu1 }
 0x310   : > { %v702_v55 = vpop.f32.mrb[12].mxu0 }
 0x311   : > { %756 = vst.msk [vmem:[%s278_s12 + $0x10] sm:$0xff] %vm304_vm1, %v702_v55  ;;  %v930_v56 = vpop.f32.mrb[13].mxu0 }
 0x312   : > { %v705_v57 = vpop.f32.mrb[14].mxu0 }
 0x313   : > { %v931_v58 = vpop.f32.mrb[15].mxu0 }
 0x314   : > { %v748_v59 = vpop.f32.mrb[12].mxu1 }
 0x315   : > { %757 = vst.msk [vmem:[%s278_s12 + $0x18] sm:$0xff] %vm304_vm1, %v748_v59  ;;  %v936_v60 = vpop.f32.mrb[13].mxu1 }
 0x316   : > { %v751_v61 = vpop.f32.mrb[14].mxu1 }
 0x317   : > { %v937_v62 = vpop.f32.mrb[15].mxu1 }
 0x318 PF: > { %s15_s18 = sadd.s32 1, %s970_s18  }
 0x319   : > { %p12_p4 = scmp.ge.s32.totalorder %s15_s18, 4  }
 0x31b   :  { %14 = sbr.rel (!%p12_p4) target bundleno = 1 (0x1), region = 79 }

// kernel: transformer_forward.56
= control target key start
LH: loop header
LB: loop body
LE: loop exit
PB: predicated region body
PF: predicated region fallthrough
CT: control target
= control target key end

     0   :  { %vm23_vm0 = vcmask 261120   ;;  %s136_s0 = inlined_call_operand.vmem [shape: f32[16,32], index: 0, kind: input, shape index: {}]   ;;  %s137_s1 = inlined_call_operand.vmem [shape: f32[16,32], index: 1, kind: input, shape index: {}]   ;;  %s138_s2 = inlined_call_operand.vmem [shape: f32[1,32], index: 2, kind: input, shape index: {}]   ;;  %s139_s3 = inlined_call_operand.vmem [shape: f32[1,32], index: 3, kind: input, shape index: {}]   ;;  %s140_s4 = inlined_call_operand.vmem [shape: f32[16,32], index: 4, kind: output, shape index: {}]  }
   0x1   :  { %v17_v0 = vld [vmem:[%s136_s0] sm:$0xff]  ;;  %v18_v2 = vld [vmem:[%s136_s0 + $0x8] sm:$0xff] }
   0x2   :  { %v19_v1 = vld [vmem:[%s137_s1] sm:$0xff]  ;;  %v20_v4 = vld [vmem:[%s137_s1 + $0x8] sm:$0xff] }
   0x3   :  { %v21_v3 = vadd.f32 %v19_v1, %v17_v0  ;;  %v22_v5 = vadd.f32 %v20_v4, %v18_v2  ;;  %v75_v25 = vld [vmem:[%s138_s2] ss:$0 sm:$0xff] }
   0x4   :  { %v76_v27 = vld [vmem:[%s139_s3] ss:$0 sm:$0xff] }
   0x5   :  { %v24_v6 = vsel %vm23_vm0, %v21_v3, 0.0  ;;  %v27_v7 = vsel %vm23_vm0, %v22_v5, 0.0 }
   0x6   :  { %25 = vadd.xlane.f32.xlu0 %v24_v6 }
   0xa   :  { %28 = vadd.xlane.f32.xlu0 %v27_v7 }
  0x93   :  { %v26_v8 = vpop.xlane.xlu0 %25 }
  0x94   :  { %v31_v9 = vmul.f32 0.03125, %v26_v8 }
  0x96   :  { %v33_v10 = vsub.f32 %v21_v3, %v31_v9 }
  0x97   :  { %v29_v11 = vpop.xlane.xlu0 %28 }
  0x98   :  { %v32_v12 = vmul.f32 0.03125, %v29_v11  ;;  %v35_v13 = vmul.f32 %v33_v10, %v33_v10 }
  0x9a   :  { %v34_v14 = vsub.f32 %v22_v5, %v32_v12  ;;  %v37_v15 = vsel %vm23_vm0, %v35_v13, 0.0 }
  0x9b   :  { %38 = vadd.xlane.f32.xlu1 %v37_v15 }
  0x9c   :  { %v36_v16 = vmul.f32 %v34_v14, %v34_v14 }
  0x9e   :  { %v40_v17 = vsel %vm23_vm0, %v36_v16, 0.0 }
  0x9f   :  { %41 = vadd.xlane.f32.xlu1 %v40_v17 }
 0x128   :  { %v39_v18 = vpop.xlane.xlu1 %38 }
 0x129   :  { %v43_v19 = vmul.f32 0.03125, %v39_v18 }
 0x12b   :  { %v45_v20 = vadd.f32 1e-05, %v43_v19 }
 0x12c   :  { %v42_v21 = vpop.xlane.xlu1 %41 }
 0x12d   :  { %77 = vrsqrt.f32 %v45_v20  ;;  %v44_v22 = vmul.f32 0.03125, %v42_v21 }
 0x12f   :  { %v46_v23 = vadd.f32 1e-05, %v44_v22 }
 0x131   :  { %79 = vrsqrt.f32 %v46_v23 }
 0x137   :  { %v78_v24 = vpop.eup %77 }
 0x138   :  { %v49_v26 = vmul.f32 %v78_v24, %v33_v10 }
 0x13a   :  { %v58_v28 = vmul.f32 %v75_v25, %v49_v26 }
 0x13b   :  { %v80_v29 = vpop.eup %79 }
 0x13c   :  { %v67_v30 = vadd.f32 %v76_v27, %v58_v28  ;;  %v50_v31 = vmul.f32 %v80_v29, %v34_v14 }
 0x13e   :  { %69 = vst.msk [vmem:[%s140_s4] sm:$0xff] %vm23_vm0, %v67_v30  ;;  %v59_v32 = vmul.f32 %v75_v25, %v50_v31 }
 0x140   :  { %v68_v33 = vadd.f32 %v76_v27, %v59_v32 }
 0x142   :  { %70 = vst.msk [vmem:[%s140_s4 + $0x8] sm:$0xff] %vm23_vm0, %v68_v33 }

// kernel: transformer_forward.67
= control target key start
LH: loop header
LB: loop body
LE: loop exit
PB: predicated region body
PF: predicated region fallthrough
CT: control target
= control target key end

     0   :  { %vm16_vm0 = vcmask 261120   ;;  %s118_s0 = inlined_call_operand.vmem [shape: f32[16,32], index: 0, kind: input, shape index: {}]   ;;  %s119_s1 = inlined_call_operand.vmem [shape: f32[1,32], index: 1, kind: input, shape index: {}]   ;;  %s120_s2 = inlined_call_operand.vmem [shape: f32[1,32], index: 2, kind: input, shape index: {}]   ;;  %s121_s3 = inlined_call_operand.vmem [shape: f32[16,32], index: 3, kind: output, shape index: {}]  }
   0x1   :  { %v14_v0 = vld [vmem:[%s118_s0] sm:$0xff]  ;;  %v15_v1 = vld [vmem:[%s118_s0 + $0x8] sm:$0xff] }
   0x2   :  { %v17_v2 = vsel %vm16_vm0, %v14_v0, 0.0  ;;  %v20_v3 = vsel %vm16_vm0, %v15_v1, 0.0  ;;  %v68_v21 = vld [vmem:[%s119_s1] ss:$0 sm:$0xff] }
   0x3   :  { %18 = vadd.xlane.f32.xlu0 %v17_v2  ;;  %v69_v23 = vld [vmem:[%s120_s2] ss:$0 sm:$0xff] }
   0x7   :  { %21 = vadd.xlane.f32.xlu0 %v20_v3 }
  0x90   :  { %v19_v4 = vpop.xlane.xlu0 %18 }
  0x91   :  { %v24_v5 = vmul.f32 0.03125, %v19_v4 }
  0x93   :  { %v26_v6 = vsub.f32 %v14_v0, %v24_v5 }
  0x94   :  { %v22_v7 = vpop.xlane.xlu0 %21 }
  0x95   :  { %v25_v8 = vmul.f32 0.03125, %v22_v7  ;;  %v28_v9 = vmul.f32 %v26_v6, %v26_v6 }
  0x97   :  { %v27_v10 = vsub.f32 %v15_v1, %v25_v8  ;;  %v30_v11 = vsel %vm16_vm0, %v28_v9, 0.0 }
  0x98   :  { %31 = vadd.xlane.f32.xlu1 %v30_v11 }
  0x99   :  { %v29_v12 = vmul.f32 %v27_v10, %v27_v10 }
  0x9b   :  { %v33_v13 = vsel %vm16_vm0, %v29_v12, 0.0 }
  0x9c   :  { %34 = vadd.xlane.f32.xlu1 %v33_v13 }
 0x125   :  { %v32_v14 = vpop.xlane.xlu1 %31 }
 0x126   :  { %v36_v15 = vmul.f32 0.03125, %v32_v14 }
 0x128   :  { %v38_v16 = vadd.f32 1e-05, %v36_v15 }
 0x129   :  { %v35_v17 = vpop.xlane.xlu1 %34 }
 0x12a   :  { %70 = vrsqrt.f32 %v38_v16  ;;  %v37_v18 = vmul.f32 0.03125, %v35_v17 }
 0x12c   :  { %v39_v19 = vadd.f32 1e-05, %v37_v18 }
 0x12e   :  { %72 = vrsqrt.f32 %v39_v19 }
 0x134   :  { %v71_v20 = vpop.eup %70 }
 0x135   :  { %v42_v22 = vmul.f32 %v71_v20, %v26_v6 }
 0x137   :  { %v51_v24 = vmul.f32 %v68_v21, %v42_v22 }
 0x138   :  { %v73_v25 = vpop.eup %72 }
 0x139   :  { %v60_v26 = vadd.f32 %v69_v23, %v51_v24  ;;  %v43_v27 = vmul.f32 %v73_v25, %v27_v10 }
 0x13b   :  { %62 = vst.msk [vmem:[%s121_s3] sm:$0xff] %vm16_vm0, %v60_v26  ;;  %v52_v28 = vmul.f32 %v68_v21, %v43_v27 }
 0x13d   :  { %v61_v29 = vadd.f32 %v69_v23, %v52_v28 }
 0x13f   :  { %63 = vst.msk [vmem:[%s121_s3 + $0x8] sm:$0xff] %vm16_vm0, %v61_v29 }

// kernel: transformer_forward.57
= control target key start
LH: loop header
LB: loop body
LE: loop exit
PB: predicated region body
PF: predicated region fallthrough
CT: control target
= control target key end

     0   :  { %v189_v0 = vmov 0.0   ;;  %vm190_vm0 = vmmov 0   ;;  %vm37_vm1 = vcmask 261120   ;;  %vm104_vm2 = vcmask 523264   ;;  %s278_s1 = inlined_call_operand.vmem [shape: f32[32,64], index: 1, kind: input, shape index: {}]   ;;  %s279_s3 = inlined_call_operand.vmem [shape: f32[64,32], index: 3, kind: input, shape index: {}]   ;;  %s280_s0 = inlined_call_operand.vmem [shape: f32[16,32], index: 0, kind: input, shape index: {}]   ;;  %s281_s2 = inlined_call_operand.vmem [shape: f32[1,64], index: 2, kind: input, shape index: {}]   ;;  %s282_s4 = inlined_call_operand.vmem [shape: f32[1,32], index: 4, kind: input, shape index: {}]   ;;  %s283_s5 = inlined_call_operand.vmem [shape: f32[16,32], index: 5, kind: output, shape index: {}]  }
   0x1   :  { %167 = vmatprep.subr.bf16.mxu0 %v189_v0  ;;  %v24_v1 = vld [vmem:[%s278_s1] sm:$0xff]  ;;  %v25_v2 = vld [vmem:[%s278_s1 + $0x8] sm:$0xff]  ;;  %v26_v3 = vld [vmem:[%s278_s1 + $0x10] sm:$0xff]  ;;  %171 = vmatprep.mubr.msk.bf16.mxu0 %vm190_vm0, %v189_v0 }
   0x2   :  { %v28_v4 = vpack.c.bf16 %v25_v2, %v24_v1  ;;  %v27_v5 = vld [vmem:[%s278_s1 + $0x18] sm:$0xff]  ;;  %175 = vmatprep.subr.bf16.mxu1 %v189_v0  ;;  %183 = vmatprep.mubr.msk.bf16.mxu1 %vm190_vm0, %v189_v0  ;;  %v85_v6 = vld [vmem:[%s279_s3] sm:$0xff]  ;;  %v86_v7 = vld [vmem:[%s279_s3 + $0x8] sm:$0xff] }
   0x3   :  { %v87_v8 = vld [vmem:[%s279_s3 + $0x10] sm:$0xff]  ;;  %v29_v9 = vpack.c.bf16 %v27_v5, %v26_v3  ;;  %v21_v10 = vld [vmem:[%s280_s0] sm:$0xff]  ;;  %v22_v11 = vld [vmem:[%s280_s0 + $0x8] sm:$0xff]  ;;  %v93_v12 = vpack.c.bf16 %v86_v7, %v85_v6 }
   0x4   :  { %168 = vmatpush3.bf16.msra.mxu0 %v28_v4  ;;  %v88_v13 = vld [vmem:[%s279_s3 + $0x18] sm:$0xff]  ;;  %v23_v15 = vpack.c.bf16 %v22_v11, %v21_v10  ;;  %v89_v16 = vld [vmem:[%s279_s3 + $0x20] sm:$0xff]  ;;  %v90_v17 = vld [vmem:[%s279_s3 + $0x28] sm:$0xff] }
   0x5   :  { %169 = vmatprep.subr.bf16.mxu0 %v189_v0  ;;  %176 = vmatpush3.bf16.msra.mxu1 %v93_v12  ;;  %v94_v14 = vpack.c.bf16 %v88_v13, %v87_v8  ;;  %v95_v18 = vpack.c.bf16 %v90_v17, %v89_v16  ;;  %v91_v19 = vld [vmem:[%s279_s3 + $0x30] sm:$0xff]  ;;  %v92_v20 = vld [vmem:[%s279_s3 + $0x38] sm:$0xff]  ;;  %v155_v22 = vld [vmem:[%s281_s2] ss:$0 sm:$0xff] }
   0x6   :  { %177 = vmatprep.subr.bf16.mxu1 %v189_v0  ;;  %v96_v21 = vpack.c.bf16 %v92_v20, %v91_v19  ;;  %v157_v32 = vld [vmem:[%s282_s4] ss:$0 sm:$0xff] }
   0x8   :  { %170 = vmatpush3.bf16.msra.mxu0 %v29_v9 }
   0x9   :  { %178 = vmatpush3.bf16.msra.mxu1 %v94_v14 }
   0xa   :  { %179 = vmatprep.subr.bf16.mxu1 %v189_v0 }
   0xb   :  { %172 = vmatmul.mubr.msk.bf16.vlgmr.msra.gmra.mrb[0].mxu0 %vm37_vm1, %v23_v15 }
   0xd   :  { %180 = vmatpush3.bf16.msra.mxu1 %v95_v18 }
   0xe   :  { %181 = vmatprep.subr.bf16.mxu1 %v189_v0 }
  0x11   :  { %182 = vmatpush3.bf16.msra.mxu1 %v96_v21 }
  0xde   :  { %v75_v23 = vpop.f32.mrb[0].mxu0 }
  0xdf   :  { %v76_v24 = vadd.f32 %v155_v22, %v75_v23  ;;  %v173_v25 = vpop.f32.mrb[1].mxu0 }
  0xe0   :  { %v78_v26 = vpop.f32.mrb[2].mxu0 }
  0xe1   :  { %v79_v27 = vadd.f32 %v155_v22, %v78_v26  ;;  %v174_v28 = vpop.f32.mrb[3].mxu0  ;;  %v82_v29 = vmax.f32 %v76_v24, 0.0 }
  0xe3   :  { %v83_v30 = vmax.f32 %v79_v27, 0.0 }
  0xe5   :  { %v84_v31 = vpack.c.bf16 %v83_v30, %v82_v29 }
  0xe7   :  { %184 = vmatmul.mubr.msk.bf16.vlgmr.msra.gmra.mrb[0].mxu1 %vm104_vm2, %v84_v31 }
 0x1ba   :  { %v142_v33 = vpop.f32.mrb[0].mxu1 }
 0x1bb   :  { %v143_v34 = vadd.f32 %v157_v32, %v142_v33  ;;  %v185_v35 = vpop.f32.mrb[1].mxu1 }
 0x1bc   :  { %v145_v36 = vpop.f32.mrb[2].mxu1 }
 0x1bd   :  { %149 = vst.msk [vmem:[%s283_s5] sm:$0xff] %vm37_vm1, %v143_v34  ;;  %v146_v37 = vadd.f32 %v157_v32, %v145_v36  ;;  %v186_v38 = vpop.f32.mrb[3].mxu1 }
 0x1bf   :  { %150 = vst.msk [vmem:[%s283_s5 + $0x8] sm:$0xff] %vm37_vm1, %v146_v37 }

// kernel: transformer_forward.50
= control target key start
LH: loop header
LB: loop body
LE: loop exit
PB: predicated region body
PF: predicated region fallthrough
CT: control target
= control target key end

     0   :  { %s219_s9 = smov 0   ;;  %s247_s0 = inlined_call_operand.vmem [shape: f32[2,6,32], index: 0, kind: input, shape index: {}]   ;;  %s248_s1 = inlined_call_operand.vmem [shape: f32[6,32], index: 1, kind: input, shape index: {}]   ;;  %s249_s2 = inlined_call_operand.vmem [shape: f32[2,6,32], index: 2, kind: output, shape index: {}]  }
   0x1 LB: > { %s198_s10 = sadd.s32 4294967295, %s221_s9   ;;  %p202_p0 = scmp.ge.s32.totalorder %s221_s9, 1  ;;  %s221_s9 = sphi %s219_s9, %s12_s9  }
   0x2   : > { %p111_p1 = scmp.lt.s32.totalorder %s221_s9, 3 }
   0x4   : > { %p112_p2 = pnand %p202_p0, %p111_p1 }
   0x5   : > { %p131_p3 = scmp.lt.s32.totalorder (!%p112_p2), %s198_s10, 1  ;;  %v141_v1 = vld [vmem:[%s248_s1] sm:$0x3f] (!%p112_p2)  ;;  %vm143_vm0 = vcmask (!%p112_p2), 259072  }
   0x6   : > { %115 = sbr.rel (%p112_p2) target bundleno = 22 (0x16), region = 28 }
   0xd   : > { %s251_s10 = smov (!%p131_p3, %s198_s10), 1 }
   0xe   : > { %s203_s11 = sshll.u32 %s251_s10, 3 }
   0xf   : > { %s134_s14 = scalar_lea.vmem %s247_s0, %s203_s11  ;;  %s138_s19 = scalar_lea.vmem %s249_s2, %s203_s11 }
  0x10   : > { %v139_v0 = vld [vmem:[%s134_s14] sm:$0x3f] }
  0x11   : > { %v140_v2 = vmul.f32 5.656854, %v139_v0 }
  0x13   : > { %v142_v3 = vadd.f32 %v141_v1, %v140_v2 }
  0x15   : > { %144 = vst.msk [vmem:[%s138_s19] sm:$0x3f] %vm143_vm0, %v142_v3 }
  0x16 PF: > { %s12_s9 = sadd.s32 1, %s221_s9  }
  0x17   : > { %p9_p4 = scmp.ge.s32.totalorder %s12_s9, 4  }
  0x19   :  { %11 = sbr.rel (!%p9_p4) target bundleno = 1 (0x1), region = 58 }

// kernel: transformer_forward.69
= control target key start
LH: loop header
LB: loop body
LE: loop exit
PB: predicated region body
PF: predicated region fallthrough
CT: control target
= control target key end

     0   :  { %vm19_vm0 = vcmask 261120   ;;  %v119_v0 = vmov 0.0   ;;  %vm120_vm1 = vmmov 0   ;;  %vm21_vm2 = vcmask 257024   ;;  %s175_s1 = inlined_call_operand.vmem [shape: f32[32,32], index: 1, kind: input, shape index: {}]   ;;  %s176_s0 = inlined_call_operand.vmem [shape: f32[12,32], index: 0, kind: input, shape index: {}]   ;;  %s177_s2 = inlined_call_operand.vmem [shape: f32[1,32], index: 2, kind: input, shape index: {}]   ;;  %s178_s3 = inlined_call_operand.vmem [shape: f32[12,32], index: 3, kind: output, shape index: {}]  }
   0x1   :  { %109 = vmatprep.subr.bf16.mxu0 %v119_v0  ;;  %v28_v1 = vld [vmem:[%s175_s1] sm:$0xff]  ;;  %v29_v2 = vld [vmem:[%s175_s1 + $0x8] sm:$0xff]  ;;  %v30_v3 = vld [vmem:[%s175_s1 + $0x10] sm:$0xff]  ;;  %113 = vmatprep.mubr.msk.bf16.mxu0 %vm120_vm1, %v119_v0  ;;  %20 = vst.msk [vmem:[#allocation2] sm:$0xff] %vm19_vm0, %v119_v0 }
   0x2   :  { %v32_v4 = vpack.c.bf16 %v29_v2, %v28_v1  ;;  %v31_v5 = vld [vmem:[%s175_s1 + $0x18] sm:$0xff]  ;;  %v25_v7 = vld [vmem:[%s176_s0] sm:$0xff]  ;;  %v26_v8 = vld [vmem:[%s176_s0 + $0x8] sm:$0xf]  ;;  %22 = vst.msk [vmem:[#allocation2 + $0x8] sm:$0xf] %vm21_vm2, %v119_v0 }
   0x3   :  { %v33_v6 = vpack.c.bf16 %v31_v5, %v30_v3  ;;  %v27_v9 = vpack.c.bf16 %v26_v8, %v25_v7  ;;  %v105_v18 = vld [vmem:[%s177_s2] ss:$0 sm:$0xff] }
   0x4   :  { %110 = vmatpush3.bf16.msra.mxu0 %v32_v4 }
   0x5   :  { %111 = vmatprep.subr.bf16.mxu0 %v119_v0 }
   0x8   :  { %112 = vmatpush3.bf16.msra.mxu0 %v33_v6  ;;  %v23_v10 = vld [vmem:[#allocation2] sm:$0xff] }
   0x9   :  { %v24_v12 = vld [vmem:[#allocation2 + $0x8] sm:$0xf] }
   0xb   :  { %114 = vmatmul.mubr.msk.bf16.vlgmr.msra.gmra.mrb[0].mxu0 %vm19_vm0, %v27_v9 }
  0xde   :  { %v72_v11 = vpop.f32.mrb[0].mxu0 }
  0xdf   :  { %v79_v13 = vadd.f32 %v72_v11, %v23_v10  ;;  %v115_v14 = vpop.f32.mrb[1].mxu0 }
  0xe0   :  { %v75_v15 = vpop.f32.mrb[2].mxu0 }
  0xe1   :  { %81 = vst.msk [vmem:[#allocation2] sm:$0xff] %vm19_vm0, %v79_v13  ;;  %v80_v16 = vadd.f32 %v75_v15, %v24_v12  ;;  %v116_v17 = vpop.f32.mrb[3].mxu0 }
  0xe3   :  { %83 = vst.msk [vmem:[#allocation2 + $0x8] sm:$0xf] %vm21_vm2, %v80_v16 }
  0xe8   :  { %v87_v19 = vld [vmem:[#allocation2] sm:$0xff] }
  0xe9   :  { %v96_v20 = vadd.f32 %v105_v18, %v87_v19 }
  0xea   :  { %v88_v21 = vld [vmem:[#allocation2 + $0x8] sm:$0xf] }
  0xeb   :  { %v97_v22 = vadd.f32 %v105_v18, %v88_v21  ;;  %98 = vst.msk [vmem:[%s178_s3] sm:$0xff] %vm19_vm0, %v96_v20 }
  0xed   :  { %99 = vst.msk [vmem:[%s178_s3 + $0x8] sm:$0xf] %vm21_vm2, %v97_v22 }

// kernel: transformer_forward.73
= control target key start
LH: loop header
LB: loop body
LE: loop exit
PB: predicated region body
PF: predicated region fallthrough
CT: control target
= control target key end

     0   :  { %vm23_vm0 = vcmask 261120   ;;  %vm27_vm1 = vcmask 257024   ;;  %s137_s0 = inlined_call_operand.vmem [shape: f32[12,32], index: 0, kind: input, shape index: {}]   ;;  %s138_s1 = inlined_call_operand.vmem [shape: f32[12,32], index: 1, kind: input, shape index: {}]   ;;  %s139_s2 = inlined_call_operand.vmem [shape: f32[1,32], index: 2, kind: input, shape index: {}]   ;;  %s140_s3 = inlined_call_operand.vmem [shape: f32[1,32], index: 3, kind: input, shape index: {}]   ;;  %s141_s4 = inlined_call_operand.vmem [shape: f32[12,32], index: 4, kind: output, shape index: {}]  }
   0x1   :  { %v17_v0 = vld [vmem:[%s137_s0] sm:$0xff]  ;;  %v18_v2 = vld [vmem:[%s137_s0 + $0x8] sm:$0xf] }
   0x2   :  { %v19_v1 = vld [vmem:[%s138_s1] sm:$0xff]  ;;  %v20_v4 = vld [vmem:[%s138_s1 + $0x8] sm:$0xf] }
   0x3   :  { %v21_v3 = vadd.f32 %v19_v1, %v17_v0  ;;  %v22_v5 = vadd.f32 %v20_v4, %v18_v2  ;;  %v76_v25 = vld [vmem:[%s139_s2] ss:$0 sm:$0xff] }
   0x4   :  { %v77_v27 = vld [vmem:[%s140_s3] ss:$0 sm:$0xff] }
   0x5   :  { %v24_v6 = vsel %vm23_vm0, %v21_v3, 0.0  ;;  %v28_v7 = vsel %vm27_vm1, %v22_v5, 0.0 }
   0x6   :  { %25 = vadd.xlane.f32.xlu0 %v24_v6 }
   0xa   :  { %29 = vadd.xlane.f32.xlu0 %v28_v7 }
  0x93   :  { %v26_v8 = vpop.xlane.xlu0 %25 }
  0x94   :  { %v32_v9 = vmul.f32 0.03125, %v26_v8 }
  0x96   :  { %v34_v10 = vsub.f32 %v21_v3, %v32_v9 }
  0x97   :  { %v30_v11 = vpop.xlane.xlu0 %29 }
  0x98   :  { %v33_v12 = vmul.f32 0.03125, %v30_v11  ;;  %v36_v13 = vmul.f32 %v34_v10, %v34_v10 }
  0x9a   :  { %v35_v14 = vsub.f32 %v22_v5, %v33_v12  ;;  %v38_v15 = vsel %vm23_vm0, %v36_v13, 0.0 }
  0x9b   :  { %39 = vadd.xlane.f32.xlu1 %v38_v15 }
  0x9c   :  { %v37_v16 = vmul.f32 %v35_v14, %v35_v14 }
  0x9e   :  { %v41_v17 = vsel %vm27_vm1, %v37_v16, 0.0 }
  0x9f   :  { %42 = vadd.xlane.f32.xlu1 %v41_v17 }
 0x128   :  { %v40_v18 = vpop.xlane.xlu1 %39 }
 0x129   :  { %v44_v19 = vmul.f32 0.03125, %v40_v18 }
 0x12b   :  { %v46_v20 = vadd.f32 1e-05, %v44_v19 }
 0x12c   :  { %v43_v21 = vpop.xlane.xlu1 %42 }
 0x12d   :  { %78 = vrsqrt.f32 %v46_v20  ;;  %v45_v22 = vmul.f32 0.03125, %v43_v21 }
 0x12f   :  { %v47_v23 = vadd.f32 1e-05, %v45_v22 }
 0x131   :  { %80 = vrsqrt.f32 %v47_v23 }
 0x137   :  { %v79_v24 = vpop.eup %78 }
 0x138   :  { %v50_v26 = vmul.f32 %v79_v24, %v34_v10 }
 0x13a   :  { %v59_v28 = vmul.f32 %v76_v25, %v50_v26 }
 0x13b   :  { %v81_v29 = vpop.eup %80 }
 0x13c   :  { %v68_v30 = vadd.f32 %v77_v27, %v59_v28  ;;  %v51_v31 = vmul.f32 %v81_v29, %v35_v14 }
 0x13e   :  { %70 = vst.msk [vmem:[%s141_s4] sm:$0xff] %vm23_vm0, %v68_v30  ;;  %v60_v32 = vmul.f32 %v76_v25, %v51_v31 }
 0x140   :  { %v69_v33 = vadd.f32 %v77_v27, %v60_v32 }
 0x142   :  { %71 = vst.msk [vmem:[%s141_s4 + $0x8] sm:$0xf] %vm27_vm1, %v69_v33 }

// kernel: transformer_forward.71
= control target key start
LH: loop header
LB: loop body
LE: loop exit
PB: predicated region body
PF: predicated region fallthrough
CT: control target
= control target key end

     0   :  { %s1007_s18 = smov 0   ;;  %s1094_s0 = inlined_call_operand.vmem [shape: f32[2,4,6,8], index: 0, kind: input, shape index: {}]   ;;  %s1095_s1 = inlined_call_operand.vmem [shape: f32[2,4,6,8], index: 1, kind: input, shape index: {}]   ;;  %s1096_s2 = inlined_call_operand.vmem [shape: f32[2,4,6,8], index: 2, kind: input, shape index: {}]   ;;  %s1097_s3 = inlined_call_operand.vmem [shape: f32[6,6], index: 3, kind: input, shape index: {}]   ;;  %s1098_s4 = inlined_call_operand.vmem [shape: f32[2,1,6], index: 4, kind: input, shape index: {}]   ;;  %s1099_s5 = inlined_call_operand.vmem [shape: f32[2,4,6,8], index: 5, kind: output, shape index: {}]  }
   0x1 LB: > { %s849_s19 = sadd.s32 4294967295, %s973_s18   ;;  %p853_p0 = scmp.ge.s32.totalorder %s973_s18, 1  ;;  %s973_s18 = sphi %s1007_s18, %s15_s18  }
   0x2   : > { %p215_p1 = scmp.lt.s32.totalorder %s973_s18, 3 }
   0x4   : > { %p216_p2 = pnand %p853_p0, %p215_p1 }
   0x5   : > { %p256_p3 = scmp.lt.s32.totalorder (!%p216_p2), %s849_s19, 1  ;;  %v975_v0 = vmov (!%p216_p2), 0.0   ;;  %vm976_vm0 = vmmov (!%p216_p2), 0   ;;  %vm304_vm1 = vcmask (!%p216_p2), 64512   ;;  %v493_v22 = vld [vmem:[%s1097_s3] sm:$0x3f] (!%p216_p2) }
   0x6   : > { %219 = sbr.rel (%p216_p2) target bundleno = 792 (0x318), region = 40  ;;  %893 = vmatprep.subr.bf16.mxu0 (!%p216_p2), %v975_v0  ;;  %899 = vmatprep.subr.bf16.mxu1 (!%p216_p2), %v975_v0  ;;  %vm509_vm2 = vcmask (!%p216_p2), 46080   ;;  %vm574_vm7 = vcmask (!%p216_p2), 1042432   ;;  %vm570_vm8 = vcmask (!%p216_p2), 48128   ;;  %vm756_vm9 = vcmask (!%p216_p2), 62464  }
   0x7   : > { %895 = vmatprep.mubr.msk.bf16.mxu0 (!%p216_p2), %vm976_vm0, %v975_v0  ;;  %901 = vmatprep.mubr.msk.bf16.mxu1 (!%p216_p2), %vm976_vm0, %v975_v0 }
   0xd   : > { %s1101_s19 = smov (!%p256_p3, %s849_s19), 1 }
   0xe   : > { %s1024_s20 = sshll.u32 %s1101_s19, 5  ;;  %s273_s29 = scalar_lea.vmem %s1098_s4, %s1101_s19 }
   0xf   : > { %s265_s23 = scalar_lea.vmem %s1095_s1, %s1024_s20  ;;  %s260_s26 = scalar_lea.vmem %s1094_s0, %s1024_s20  ;;  %v866_v30 = vld [vmem:[%s273_s29] ss:$0 sm:$0xff] }
  0x10   : > { %v288_v1 = vld [vmem:[%s265_s23] sm:$0x3f]  ;;  %v289_v2 = vld [vmem:[%s265_s23 + $0x8] sm:$0x3f]  ;;  %v290_v5 = vld [vmem:[%s265_s23 + $0x10] sm:$0x3f]  ;;  %s270_s9 = scalar_lea.vmem %s1096_s2, %s1024_s20  ;;  %s278_s12 = scalar_lea.vmem %s1099_s5, %s1024_s20 }
  0x11   : > { %v292_v3 = vpack.c.bf16 %v288_v1, %v288_v1  ;;  %v293_v4 = vpack.c.bf16 %v289_v2, %v289_v2  ;;  %v291_v6 = vld [vmem:[%s265_s23 + $0x18] sm:$0x3f]  ;;  %v280_v9 = vld [vmem:[%s260_s26] sm:$0x3f]  ;;  %v281_v10 = vld [vmem:[%s260_s26 + $0x8] sm:$0x3f]  ;;  %v294_v11 = vpack.c.bf16 %v290_v5, %v290_v5 }
  0x12   : > { %v295_v12 = vpack.c.bf16 %v291_v6, %v291_v6  ;;  %v284_v13 = vpack.c.bf16 %v280_v9, %v280_v9  ;;  %v285_v14 = vpack.c.bf16 %v281_v10, %v281_v10  ;;  %v282_v17 = vld [vmem:[%s260_s26 + $0x10] sm:$0x3f]  ;;  %v283_v18 = vld [vmem:[%s260_s26 + $0x18] sm:$0x3f] }
  0x13   : > { %v309_v7 = vsel %vm304_vm1, %v292_v3, 0  ;;  %v355_v8 = vsel %vm304_vm1, %v293_v4, 0  ;;  %v401_v15 = vsel %vm304_vm1, %v294_v11, 0  ;;  %v286_v19 = vpack.c.bf16 %v282_v17, %v282_v17 }
  0x14   : > { %894 = vmatpush3.bf16.xpose.msra.mxu0 %v309_v7  ;;  %900 = vmatpush3.bf16.xpose.msra.mxu1 %v355_v8  ;;  %v447_v16 = vsel %vm304_vm1, %v295_v12, 0  ;;  %v287_v20 = vpack.c.bf16 %v283_v18, %v283_v18 }
  0x15   : > { %905 = vmatprep.subr.bf16.mxu0 %v975_v0  ;;  %911 = vmatprep.subr.bf16.mxu1 %v975_v0 }
  0x1b   : > { %896 = vmatmul.mubr.msk.bf16.vlgmr.msra.gmra.mrb[0].mxu0 %vm304_vm1, %v284_v13  ;;  %902 = vmatmul.mubr.msk.bf16.vlgmr.msra.gmra.mrb[0].mxu1 %vm304_vm1, %v285_v14 }
  0x1c   : > { %906 = vmatpush3.bf16.xpose.msra.mxu0 %v401_v15  ;;  %912 = vmatpush3.bf16.xpose.msra.mxu1 %v447_v16  ;;  %v296_v16 = vld [vmem:[%s270_s9] sm:$0x3f] }
  0x1d   : > { %907 = vmatprep.mubr.msk.bf16.mxu0 %vm976_vm0, %v975_v0  ;;  %913 = vmatprep.mubr.msk.bf16.mxu1 %vm976_vm0, %v975_v0  ;;  %v300_v17 = vpack.c.bf16 %v296_v16, %v296_v16 }
  0x1e   : > { %917 = vmatprep.subr.bf16.mxu0 %v975_v0  ;;  %923 = vmatprep.subr.bf16.mxu1 %v975_v0 }
  0x1f   : > { %v576_v18 = vsel %vm574_vm7, %v300_v17, 0 }
  0x23   : > { %908 = vmatmul.mubr.msk.bf16.vlgmr.msra.gmra.mrb[4].mxu0 %vm304_vm1, %v286_v19  ;;  %914 = vmatmul.mubr.msk.bf16.vlgmr.msra.gmra.mrb[4].mxu1 %vm304_vm1, %v287_v20  ;;  %v297_v19 = vld [vmem:[%s270_s9 + $0x8] sm:$0x3f] }
  0x24   : > { %919 = vmatprep.mubr.msk.bf16.mxu0 %vm976_vm0, %v975_v0  ;;  %925 = vmatprep.mubr.msk.bf16.mxu1 %vm976_vm0, %v975_v0  ;;  %v301_v20 = vpack.c.bf16 %v297_v19, %v297_v19 }
  0x25   : > { %918 = vmatpush3.bf16.msra.mxu0 %v576_v18 }
  0x26   : > { %929 = vmatprep.subr.bf16.mxu0 %v975_v0 }
  0xee   : > { %v345_v21 = vpop.f32.mrb[0].mxu0  ;;  %v391_v23 = vpop.f32.mrb[0].mxu1 }
  0xef   : > { %v489_v24 = vmul.f32 0.35355338, %v345_v21  ;;  %v897_v25 = vpop.f32.mrb[1].mxu0  ;;  %v490_v26 = vmul.f32 0.35355338, %v391_v23  ;;  %v903_v27 = vpop.f32.mrb[1].mxu1 }
  0xf0   : > { %v348_v28 = vpop.f32.mrb[2].mxu0  ;;  %v394_v29 = vpop.f32.mrb[2].mxu1  ;;  %v622_v21 = vsel %vm574_vm7, %v301_v20, 0  ;;  %v299_v25 = vld [vmem:[%s270_s9 + $0x18] sm:$0x3f] }
  0xf1   : > { %v494_v31 = vadd.f32 %v493_v22, %v489_v24  ;;  %v495_v32 = vadd.f32 %v493_v22, %v490_v26  ;;  %v898_v33 = vpop.f32.mrb[3].mxu0  ;;  %v904_v34 = vpop.f32.mrb[3].mxu1  ;;  %924 = vmatpush3.bf16.msra.mxu1 %v622_v21  ;;  %v303_v26 = vpack.c.bf16 %v299_v25, %v299_v25 }
  0xf2   : > { %935 = vmatprep.subr.bf16.mxu1 %v975_v0 }
  0xf3   : > { %v505_v35 = vadd.f32 %v866_v30, %v494_v31  ;;  %v506_v36 = vadd.f32 %v866_v30, %v495_v32  ;;  %v714_v27 = vsel %vm574_vm7, %v303_v26, 0 }
  0xf5   : > { %v510_v37 = vsel %vm509_vm2, %v505_v35, -inf  ;;  %v513_v40 = vsel %vm509_vm2, %v506_v36, -inf }
  0xf6   : > { %511 = vmax.xlane.f32.xlu0 %v510_v37  ;;  %v437_v38 = vpop.f32.mrb[4].mxu0  ;;  %v483_v39 = vpop.f32.mrb[4].mxu1 }
  0xf7   : > { %v491_v41 = vmul.f32 0.35355338, %v437_v38  ;;  %v909_v42 = vpop.f32.mrb[5].mxu0  ;;  %v492_v43 = vmul.f32 0.35355338, %v483_v39  ;;  %v915_v44 = vpop.f32.mrb[5].mxu1 }
  0xf8   : > { %v440_v45 = vpop.f32.mrb[6].mxu0  ;;  %v486_v46 = vpop.f32.mrb[6].mxu1 }
  0xf9   : > { %v496_v47 = vadd.f32 %v493_v22, %v491_v41  ;;  %v497_v48 = vadd.f32 %v493_v22, %v492_v43  ;;  %v910_v49 = vpop.f32.mrb[7].mxu0  ;;  %v916_v50 = vpop.f32.mrb[7].mxu1  ;;  %v298_v22 = vld [vmem:[%s270_s9 + $0x10] sm:$0x3f] }
  0xfa   : > { %514 = vmax.xlane.f32.xlu0 %v513_v40  ;;  %v302_v23 = vpack.c.bf16 %v298_v22, %v298_v22 }
  0xfb   : > { %v507_v51 = vadd.f32 %v866_v30, %v496_v47  ;;  %v508_v52 = vadd.f32 %v866_v30, %v497_v48 }
  0xfc   : > { %v668_v24 = vsel %vm574_vm7, %v302_v23, 0 }
  0xfd   : > { %v516_v53 = vsel %vm509_vm2, %v507_v51, -inf  ;;  %v519_v54 = vsel %vm509_vm2, %v508_v52, -inf }
  0xfe   : > { %517 = vmax.xlane.f32.xlu1 %v516_v53 }
 0x102   : > { %520 = vmax.xlane.f32.xlu1 %v519_v54 }
 0x183   : > { %v512_v55 = vpop.xlane.xlu0 %511 }
 0x184   : > { %vm522_vm3 = vcmp.eq.f32.partialorder %v512_v55, -inf }
 0x185   : > { %v526_v56 = vsel %vm522_vm3, 0.0, %v512_v55 }
 0x186   : > { %v530_v57 = vsub.f32 %v505_v35, %v526_v56 }
 0x187   : > { %v515_v58 = vpop.xlane.xlu0 %514 }
 0x188   : > { %v534_v59 = vmul.f32 1.442695, %v530_v57  ;;  %vm523_vm4 = vcmp.eq.f32.partialorder %v515_v58, -inf }
 0x189   : > { %v527_v60 = vsel %vm523_vm4, 0.0, %v515_v58 }
 0x18a   : > { %951 = vpow2.f32 %v534_v59  ;;  %v531_v61 = vsub.f32 %v506_v36, %v527_v60 }
 0x18b   : > { %v518_v62 = vpop.xlane.xlu1 %517 }
 0x18c   : > { %v536_v63 = vmul.f32 1.442695, %v531_v61  ;;  %vm524_vm5 = vcmp.eq.f32.partialorder %v518_v62, -inf }
 0x18d   : > { %v528_v1 = vsel %vm524_vm5, 0.0, %v518_v62 }
 0x18e   : > { %953 = vpow2.f32 %v536_v63  ;;  %v532_v2 = vsub.f32 %v507_v51, %v528_v1 }
 0x18f   : > { %v521_v3 = vpop.xlane.xlu1 %520 }
 0x190   : > { %v538_v4 = vmul.f32 1.442695, %v532_v2  ;;  %vm525_vm6 = vcmp.eq.f32.partialorder %v521_v3, -inf }
 0x191   : > { %v529_v5 = vsel %vm525_vm6, 0.0, %v521_v3 }
 0x192   : > { %955 = vpow2.f32 %v538_v4  ;;  %v533_v6 = vsub.f32 %v508_v52, %v529_v5 }
 0x194   : > { %v952_v7 = vpop.eup %951  ;;  %v540_v8 = vmul.f32 1.442695, %v533_v6 }
 0x195   : > { %v542_v9 = vsel %vm509_vm2, %v952_v7, 0.0 }
 0x196   : > { %957 = vpow2.f32 %v540_v8  ;;  %543 = vadd.xlane.f32.xlu0 %v542_v9 }
 0x198   : > { %v954_v10 = vpop.eup %953 }
 0x199   : > { %v545_v11 = vsel %vm509_vm2, %v954_v10, 0.0 }
 0x19a   : > { %546 = vadd.xlane.f32.xlu1 %v545_v11 }
 0x19c   : > { %v956_v12 = vpop.eup %955 }
 0x19d   : > { %v548_v13 = vsel %vm509_vm2, %v956_v12, 0.0 }
 0x19e   : > { %549 = vadd.xlane.f32.xlu0 %v548_v13 }
 0x1a0   : > { %v958_v14 = vpop.eup %957 }
 0x1a1   : > { %v551_v15 = vsel %vm509_vm2, %v958_v14, 0.0 }
 0x1a2   : > { %552 = vadd.xlane.f32.xlu1 %v551_v15 }
 0x223   : > { %v544_v28 = vpop.xlane.xlu0 %543 }
 0x224   : > { %v554_v29 = vmax.f32 %v544_v28, 1e-30 }
 0x226   : > { %959 = vrcp.f32 %v554_v29 }
 0x227   : > { %v547_v30 = vpop.xlane.xlu1 %546 }
 0x228   : > { %v555_v31 = vmax.f32 %v547_v30, 1e-30 }
 0x22a   : > { %961 = vrcp.f32 %v555_v31 }
 0x22b   : > { %v550_v32 = vpop.xlane.xlu0 %549 }
 0x22c   : > { %v556_v33 = vmax.f32 %v550_v32, 1e-30 }
 0x22e   : > { %963 = vrcp.f32 %v556_v33 }
 0x22f   : > { %v553_v34 = vpop.xlane.xlu1 %552 }
 0x230   : > { %v960_v35 = vpop.eup %959  ;;  %v557_v36 = vmax.f32 %v553_v34, 1e-30 }
 0x231   : > { %v562_v37 = vmul.f32 %v960_v35, %v952_v7 }
 0x232   : > { %965 = vrcp.f32 %v557_v36 }
 0x233   : > { %v566_v38 = vpack.c.bf16 %v562_v37, %v562_v37 }
 0x234   : > { %v962_v39 = vpop.eup %961 }
 0x235   : > { %v563_v40 = vmul.f32 %v962_v39, %v954_v10  ;;  %920 = vmatmul.mubr.msk.bf16.vlgmr.msra.gmra.mrb[8].mxu0 %vm570_vm8, %v566_v38 }
 0x236   : > { %930 = vmatpush3.bf16.msra.mxu0 %v668_v24  ;;  %931 = vmatprep.mubr.msk.bf16.mxu0 %vm976_vm0, %v975_v0 }
 0x237   : > { %v567_v41 = vpack.c.bf16 %v563_v40, %v563_v40 }
 0x238   : > { %v964_v42 = vpop.eup %963 }
 0x239   : > { %v564_v43 = vmul.f32 %v964_v42, %v956_v12  ;;  %926 = vmatmul.mubr.msk.bf16.vlgmr.msra.gmra.mrb[8].mxu1 %vm570_vm8, %v567_v41 }
 0x23a   : > { %936 = vmatpush3.bf16.msra.mxu1 %v714_v27  ;;  %937 = vmatprep.mubr.msk.bf16.mxu1 %vm976_vm0, %v975_v0 }
 0x23b   : > { %v568_v44 = vpack.c.bf16 %v564_v43, %v564_v43 }
 0x23c   : > { %v966_v45 = vpop.eup %965 }
 0x23d   : > { %v565_v46 = vmul.f32 %v966_v45, %v958_v14  ;;  %932 = vmatmul.mubr.msk.bf16.vlgmr.msra.gmra.mrb[12].mxu0 %vm570_vm8, %v568_v44 }
 0x23f   : > { %v569_v47 = vpack.c.bf16 %v565_v46, %v565_v46 }
 0x241   : > { %938 = vmatmul.mubr.msk.bf16.vlgmr.msra.gmra.mrb[12].mxu1 %vm570_vm8, %v569_v47 }
 0x308   : > { %v612_v48 = vpop.f32.mrb[8].mxu0 }
 0x309   : > { %757 = vst.msk [vmem:[%s278_s12] sm:$0x3f] %vm756_vm9, %v612_v48  ;;  %v921_v49 = vpop.f32.mrb[9].mxu0 }
 0x30a   : > { %v615_v50 = vpop.f32.mrb[10].mxu0 }
 0x30b   : > { %v922_v51 = vpop.f32.mrb[11].mxu0 }
 0x30c   : > { %v658_v0 = vpop.f32.mrb[8].mxu1 }
 0x30d   : > { %758 = vst.msk [vmem:[%s278_s12 + $0x8] sm:$0x3f] %vm756_vm9, %v658_v0  ;;  %v927_v52 = vpop.f32.mrb[9].mxu1 }
 0x30e   : > { %v661_v53 = vpop.f32.mrb[10].mxu1 }
 0x30f   : > { %v928_v54 = vpop.f32.mrb[11].mxu1 }
 0x310   : > { %v704_v55 = vpop.f32.mrb[12].mxu0 }
 0x311   : > { %759 = vst.msk [vmem:[%s278_s12 + $0x10] sm:$0x3f] %vm756_vm9, %v704_v55  ;;  %v933_v56 = vpop.f32.mrb[13].mxu0 }
 0x312   : > { %v707_v57 = vpop.f32.mrb[14].mxu0 }
 0x313   : > { %v934_v58 = vpop.f32.mrb[15].mxu0 }
 0x314   : > { %v750_v59 = vpop.f32.mrb[12].mxu1 }
 0x315   : > { %760 = vst.msk [vmem:[%s278_s12 + $0x18] sm:$0x3f] %vm756_vm9, %v750_v59  ;;  %v939_v60 = vpop.f32.mrb[13].mxu1 }
 0x316   : > { %v753_v61 = vpop.f32.mrb[14].mxu1 }
 0x317   : > { %v940_v62 = vpop.f32.mrb[15].mxu1 }
 0x318 PF: > { %s15_s18 = sadd.s32 1, %s973_s18  }
 0x319   : > { %p12_p4 = scmp.ge.s32.totalorder %s15_s18, 4  }
 0x31b   :  { %14 = sbr.rel (!%p12_p4) target bundleno = 1 (0x1), region = 79 }

// kernel: transformer_forward.80
= control target key start
LH: loop header
LB: loop body
LE: loop exit
PB: predicated region body
PF: predicated region fallthrough
CT: control target
= control target key end

     0   :  { %v190_v0 = vmov 0.0   ;;  %vm191_vm0 = vmmov 0   ;;  %vm37_vm1 = vcmask 261120   ;;  %vm104_vm2 = vcmask 523264   ;;  %s278_s1 = inlined_call_operand.vmem [shape: f32[32,64], index: 1, kind: input, shape index: {}]   ;;  %s279_s3 = inlined_call_operand.vmem [shape: f32[64,32], index: 3, kind: input, shape index: {}]   ;;  %s280_s0 = inlined_call_operand.vmem [shape: f32[12,32], index: 0, kind: input, shape index: {}]   ;;  %s281_s2 = inlined_call_operand.vmem [shape: f32[1,64], index: 2, kind: input, shape index: {}]   ;;  %s282_s4 = inlined_call_operand.vmem [shape: f32[1,32], index: 4, kind: input, shape index: {}]   ;;  %s283_s5 = inlined_call_operand.vmem [shape: f32[12,32], index: 5, kind: output, shape index: {}]  }
   0x1   :  { %168 = vmatprep.subr.bf16.mxu0 %v190_v0  ;;  %v24_v1 = vld [vmem:[%s278_s1] sm:$0xff]  ;;  %v25_v2 = vld [vmem:[%s278_s1 + $0x8] sm:$0xff]  ;;  %v26_v3 = vld [vmem:[%s278_s1 + $0x10] sm:$0xff]  ;;  %172 = vmatprep.mubr.msk.bf16.mxu0 %vm191_vm0, %v190_v0  ;;  %vm150_vm3 = vcmask 257024  }
   0x2   :  { %v28_v4 = vpack.c.bf16 %v25_v2, %v24_v1  ;;  %v27_v5 = vld [vmem:[%s278_s1 + $0x18] sm:$0xff]  ;;  %176 = vmatprep.subr.bf16.mxu1 %v190_v0  ;;  %184 = vmatprep.mubr.msk.bf16.mxu1 %vm191_vm0, %v190_v0  ;;  %v85_v6 = vld [vmem:[%s279_s3] sm:$0xff]  ;;  %v86_v7 = vld [vmem:[%s279_s3 + $0x8] sm:$0xff] }
   0x3   :  { %v87_v8 = vld [vmem:[%s279_s3 + $0x10] sm:$0xff]  ;;  %v29_v9 = vpack.c.bf16 %v27_v5, %v26_v3  ;;  %v21_v10 = vld [vmem:[%s280_s0] sm:$0xff]  ;;  %v22_v11 = vld [vmem:[%s280_s0 + $0x8] sm:$0xf]  ;;  %v93_v12 = vpack.c.bf16 %v86_v7, %v85_v6 }
   0x4   :  { %169 = vmatpush3.bf16.msra.mxu0 %v28_v4  ;;  %v88_v13 = vld [vmem:[%s279_s3 + $0x18] sm:$0xff]  ;;  %v23_v15 = vpack.c.bf16 %v22_v11, %v21_v10  ;;  %v89_v16 = vld [vmem:[%s279_s3 + $0x20] sm:$0xff]  ;;  %v90_v17 = vld [vmem:[%s279_s3 + $0x28] sm:$0xff] }
   0x5   :  { %170 = vmatprep.subr.bf16.mxu0 %v190_v0  ;;  %177 = vmatpush3.bf16.msra.mxu1 %v93_v12  ;;  %v94_v14 = vpack.c.bf16 %v88_v13, %v87_v8  ;;  %v95_v18 = vpack.c.bf16 %v90_v17, %v89_v16  ;;  %v91_v19 = vld [vmem:[%s279_s3 + $0x30] sm:$0xff]  ;;  %v92_v20 = vld [vmem:[%s279_s3 + $0x38] sm:$0xff]  ;;  %v156_v22 = vld [vmem:[%s281_s2] ss:$0 sm:$0xff] }
   0x6   :  { %178 = vmatprep.subr.bf16.mxu1 %v190_v0  ;;  %v96_v21 = vpack.c.bf16 %v92_v20, %v91_v19  ;;  %v158_v32 = vld [vmem:[%s282_s4] ss:$0 sm:$0xff] }
   0x8   :  { %171 = vmatpush3.bf16.msra.mxu0 %v29_v9 }
   0x9   :  { %179 = vmatpush3.bf16.msra.mxu1 %v94_v14 }
   0xa   :  { %180 = vmatprep.subr.bf16.mxu1 %v190_v0 }
   0xb   :  { %173 = vmatmul.mubr.msk.bf16.vlgmr.msra.gmra.mrb[0].mxu0 %vm37_vm1, %v23_v15 }
   0xd   :  { %181 = vmatpush3.bf16.msra.mxu1 %v95_v18 }
   0xe   :  { %182 = vmatprep.subr.bf16.mxu1 %v190_v0 }
  0x11   :  { %183 = vmatpush3.bf16.msra.mxu1 %v96_v21 }
  0xde   :  { %v75_v23 = vpop.f32.mrb[0].mxu0 }
  0xdf   :  { %v76_v24 = vadd.f32 %v156_v22, %v75_v23  ;;  %v174_v25 = vpop.f32.mrb[1].mxu0 }
  0xe0   :  { %v78_v26 = vpop.f32.mrb[2].mxu0 }
  0xe1   :  { %v79_v27 = vadd.f32 %v156_v22, %v78_v26  ;;  %v175_v28 = vpop.f32.mrb[3].mxu0  ;;  %v82_v29 = vmax.f32 %v76_v24, 0.0 }
  0xe3   :  { %v83_v30 = vmax.f32 %v79_v27, 0.0 }
  0xe5   :  { %v84_v31 = vpack.c.bf16 %v83_v30, %v82_v29 }
  0xe7   :  { %185 = vmatmul.mubr.msk.bf16.vlgmr.msra.gmra.mrb[0].mxu1 %vm104_vm2, %v84_v31 }
 0x1ba   :  { %v142_v33 = vpop.f32.mrb[0].mxu1 }
 0x1bb   :  { %v143_v34 = vadd.f32 %v158_v32, %v142_v33  ;;  %v186_v35 = vpop.f32.mrb[1].mxu1 }
 0x1bc   :  { %v145_v36 = vpop.f32.mrb[2].mxu1 }
 0x1bd   :  { %149 = vst.msk [vmem:[%s283_s5] sm:$0xff] %vm37_vm1, %v143_v34  ;;  %v146_v37 = vadd.f32 %v158_v32, %v145_v36  ;;  %v187_v38 = vpop.f32.mrb[3].mxu1 }
 0x1bf   :  { %151 = vst.msk [vmem:[%s283_s5 + $0x8] sm:$0xf] %vm150_vm3, %v146_v37 }

// kernel: transformer_forward.77
= control target key start
LH: loop header
LB: loop body
LE: loop exit
PB: predicated region body
PF: predicated region fallthrough
CT: control target
= control target key end

     0   :  { %s1005_s18 = smov 0   ;;  %s1092_s0 = inlined_call_operand.vmem [shape: f32[2,4,6,8], index: 0, kind: input, shape index: {}]   ;;  %s1093_s1 = inlined_call_operand.vmem [shape: f32[2,4,8,8], index: 1, kind: input, shape index: {}]   ;;  %s1094_s2 = inlined_call_operand.vmem [shape: f32[2,4,8,8], index: 2, kind: input, shape index: {}]   ;;  %s1095_s3 = inlined_call_operand.vmem [shape: f32[6,8], index: 3, kind: input, shape index: {}]   ;;  %s1096_s4 = inlined_call_operand.vmem [shape: f32[2,1,8], index: 4, kind: input, shape index: {}]   ;;  %s1097_s5 = inlined_call_operand.vmem [shape: f32[2,4,6,8], index: 5, kind: output, shape index: {}]  }
   0x1 LB: > { %s847_s19 = sadd.s32 4294967295, %s971_s18   ;;  %p851_p0 = scmp.ge.s32.totalorder %s971_s18, 1  ;;  %s971_s18 = sphi %s1005_s18, %s15_s18  }
   0x2   : > { %p215_p1 = scmp.lt.s32.totalorder %s971_s18, 3 }
   0x4   : > { %p216_p2 = pnand %p851_p0, %p215_p1 }
   0x5   : > { %p256_p3 = scmp.lt.s32.totalorder (!%p216_p2), %s847_s19, 1  ;;  %v973_v0 = vmov (!%p216_p2), 0.0   ;;  %vm974_vm0 = vmmov (!%p216_p2), 0   ;;  %vm304_vm1 = vcmask (!%p216_p2), 64512   ;;  %v493_v22 = vld [vmem:[%s1095_s3] sm:$0x3f] (!%p216_p2) }
   0x6   : > { %219 = sbr.rel (%p216_p2) target bundleno = 792 (0x318), region = 40  ;;  %891 = vmatprep.subr.bf16.mxu0 (!%p216_p2), %v973_v0  ;;  %897 = vmatprep.subr.bf16.mxu1 (!%p216_p2), %v973_v0  ;;  %vm509_vm2 = vcmask (!%p216_p2), 62464   ;;  %vm573_vm7 = vcmask (!%p216_p2), 1043456  }
   0x7   : > { %893 = vmatprep.mubr.msk.bf16.mxu0 (!%p216_p2), %vm974_vm0, %v973_v0  ;;  %899 = vmatprep.mubr.msk.bf16.mxu1 (!%p216_p2), %vm974_vm0, %v973_v0 }
   0xd   : > { %s1099_s19 = smov (!%p256_p3, %s847_s19), 1 }
   0xe   : > { %s1022_s20 = sshll.u32 %s1099_s19, 5  ;;  %s273_s29 = scalar_lea.vmem %s1096_s4, %s1099_s19 }
   0xf   : > { %s265_s23 = scalar_lea.vmem %s1093_s1, %s1022_s20  ;;  %s260_s26 = scalar_lea.vmem %s1092_s0, %s1022_s20  ;;  %v864_v30 = vld [vmem:[%s273_s29] ss:$0 sm:$0xff] }
  0x10   : > { %v288_v1 = vld [vmem:[%s265_s23] sm:$0xff]  ;;  %v289_v2 = vld [vmem:[%s265_s23 + $0x8] sm:$0xff]  ;;  %v290_v5 = vld [vmem:[%s265_s23 + $0x10] sm:$0xff]  ;;  %s270_s9 = scalar_lea.vmem %s1094_s2, %s1022_s20  ;;  %s278_s12 = scalar_lea.vmem %s1097_s5, %s1022_s20 }
  0x11   : > { %v292_v3 = vpack.c.bf16 %v288_v1, %v288_v1  ;;  %v293_v4 = vpack.c.bf16 %v289_v2, %v289_v2  ;;  %v291_v6 = vld [vmem:[%s265_s23 + $0x18] sm:$0xff]  ;;  %v280_v9 = vld [vmem:[%s260_s26] sm:$0x3f]  ;;  %v281_v10 = vld [vmem:[%s260_s26 + $0x8] sm:$0x3f]  ;;  %v294_v11 = vpack.c.bf16 %v290_v5, %v290_v5 }
  0x12   : > { %v295_v12 = vpack.c.bf16 %v291_v6, %v291_v6  ;;  %v284_v13 = vpack.c.bf16 %v280_v9, %v280_v9  ;;  %v285_v14 = vpack.c.bf16 %v281_v10, %v281_v10  ;;  %v282_v17 = vld [vmem:[%s260_s26 + $0x10] sm:$0x3f]  ;;  %v283_v18 = vld [vmem:[%s260_s26 + $0x18] sm:$0x3f] }
  0x13   : > { %v309_v7 = vsel %vm304_vm1, %v292_v3, 0  ;;  %v355_v8 = vsel %vm304_vm1, %v293_v4, 0  ;;  %v401_v15 = vsel %vm304_vm1, %v294_v11, 0  ;;  %v286_v19 = vpack.c.bf16 %v282_v17, %v282_v17 }
  0x14   : > { %892 = vmatpush3.bf16.xpose.msra.mxu0 %v309_v7  ;;  %898 = vmatpush3.bf16.xpose.msra.mxu1 %v355_v8  ;;  %v447_v16 = vsel %vm304_vm1, %v295_v12, 0  ;;  %v287_v20 = vpack.c.bf16 %v283_v18, %v283_v18 }
  0x15   : > { %903 = vmatprep.subr.bf16.mxu0 %v973_v0  ;;  %909 = vmatprep.subr.bf16.mxu1 %v973_v0 }
  0x1b   : > { %894 = vmatmul.mubr.msk.bf16.vlgmr.msra.gmra.mrb[0].mxu0 %vm304_vm1, %v284_v13  ;;  %900 = vmatmul.mubr.msk.bf16.vlgmr.msra.gmra.mrb[0].mxu1 %vm304_vm1, %v285_v14 }
  0x1c   : > { %904 = vmatpush3.bf16.xpose.msra.mxu0 %v401_v15  ;;  %910 = vmatpush3.bf16.xpose.msra.mxu1 %v447_v16  ;;  %v296_v16 = vld [vmem:[%s270_s9] sm:$0xff] }
  0x1d   : > { %905 = vmatprep.mubr.msk.bf16.mxu0 %vm974_vm0, %v973_v0  ;;  %911 = vmatprep.mubr.msk.bf16.mxu1 %vm974_vm0, %v973_v0  ;;  %v300_v17 = vpack.c.bf16 %v296_v16, %v296_v16 }
  0x1e   : > { %915 = vmatprep.subr.bf16.mxu0 %v973_v0  ;;  %921 = vmatprep.subr.bf16.mxu1 %v973_v0 }
  0x1f   : > { %v575_v18 = vsel %vm573_vm7, %v300_v17, 0 }
  0x23   : > { %906 = vmatmul.mubr.msk.bf16.vlgmr.msra.gmra.mrb[4].mxu0 %vm304_vm1, %v286_v19  ;;  %912 = vmatmul.mubr.msk.bf16.vlgmr.msra.gmra.mrb[4].mxu1 %vm304_vm1, %v287_v20  ;;  %v297_v19 = vld [vmem:[%s270_s9 + $0x8] sm:$0xff] }
  0x24   : > { %917 = vmatprep.mubr.msk.bf16.mxu0 %vm974_vm0, %v973_v0  ;;  %923 = vmatprep.mubr.msk.bf16.mxu1 %vm974_vm0, %v973_v0  ;;  %v301_v20 = vpack.c.bf16 %v297_v19, %v297_v19 }
  0x25   : > { %916 = vmatpush3.bf16.msra.mxu0 %v575_v18 }
  0x26   : > { %927 = vmatprep.subr.bf16.mxu0 %v973_v0 }
  0xee   : > { %v345_v21 = vpop.f32.mrb[0].mxu0  ;;  %v391_v23 = vpop.f32.mrb[0].mxu1 }
  0xef   : > { %v489_v24 = vmul.f32 0.35355338, %v345_v21  ;;  %v895_v25 = vpop.f32.mrb[1].mxu0  ;;  %v490_v26 = vmul.f32 0.35355338, %v391_v23  ;;  %v901_v27 = vpop.f32.mrb[1].mxu1 }
  0xf0   : > { %v348_v28 = vpop.f32.mrb[2].mxu0  ;;  %v394_v29 = vpop.f32.mrb[2].mxu1  ;;  %v621_v21 = vsel %vm573_vm7, %v301_v20, 0  ;;  %v299_v25 = vld [vmem:[%s270_s9 + $0x18] sm:$0xff] }
  0xf1   : > { %v494_v31 = vadd.f32 %v493_v22, %v489_v24  ;;  %v495_v32 = vadd.f32 %v493_v22, %v490_v26  ;;  %v896_v33 = vpop.f32.mrb[3].mxu0  ;;  %v902_v34 = vpop.f32.mrb[3].mxu1  ;;  %922 = vmatpush3.bf16.msra.mxu1 %v621_v21  ;;  %v303_v26 = vpack.c.bf16 %v299_v25, %v299_v25 }
  0xf2   : > { %933 = vmatprep.subr.bf16.mxu1 %v973_v0 }
  0xf3   : > { %v505_v35 = vadd.f32 %v864_v30, %v494_v31  ;;  %v506_v36 = vadd.f32 %v864_v30, %v495_v32  ;;  %v713_v27 = vsel %vm573_vm7, %v303_v26, 0 }
  0xf5   : > { %v510_v37 = vsel %vm509_vm2, %v505_v35, -inf  ;;  %v513_v40 = vsel %vm509_vm2, %v506_v36, -inf }
  0xf6   : > { %511 = vmax.xlane.f32.xlu0 %v510_v37  ;;  %v437_v38 = vpop.f32.mrb[4].mxu0  ;;  %v483_v39 = vpop.f32.mrb[4].mxu1 }
  0xf7   : > { %v491_v41 = vmul.f32 0.35355338, %v437_v38  ;;  %v907_v42 = vpop.f32.mrb[5].mxu0  ;;  %v492_v43 = vmul.f32 0.35355338, %v483_v39  ;;  %v913_v44 = vpop.f32.mrb[5].mxu1 }
  0xf8   : > { %v440_v45 = vpop.f32.mrb[6].mxu0  ;;  %v486_v46 = vpop.f32.mrb[6].mxu1 }
  0xf9   : > { %v496_v47 = vadd.f32 %v493_v22, %v491_v41  ;;  %v497_v48 = vadd.f32 %v493_v22, %v492_v43  ;;  %v908_v49 = vpop.f32.mrb[7].mxu0  ;;  %v914_v50 = vpop.f32.mrb[7].mxu1  ;;  %v298_v22 = vld [vmem:[%s270_s9 + $0x10] sm:$0xff] }
  0xfa   : > { %514 = vmax.xlane.f32.xlu0 %v513_v40  ;;  %v302_v23 = vpack.c.bf16 %v298_v22, %v298_v22 }
  0xfb   : > { %v507_v51 = vadd.f32 %v864_v30, %v496_v47  ;;  %v508_v52 = vadd.f32 %v864_v30, %v497_v48 }
  0xfc   : > { %v667_v24 = vsel %vm573_vm7, %v302_v23, 0 }
  0xfd   : > { %v516_v53 = vsel %vm509_vm2, %v507_v51, -inf  ;;  %v519_v54 = vsel %vm509_vm2, %v508_v52, -inf }
  0xfe   : > { %517 = vmax.xlane.f32.xlu1 %v516_v53 }
 0x102   : > { %520 = vmax.xlane.f32.xlu1 %v519_v54 }
 0x183   : > { %v512_v55 = vpop.xlane.xlu0 %511 }
 0x184   : > { %vm522_vm3 = vcmp.eq.f32.partialorder %v512_v55, -inf }
 0x185   : > { %v526_v56 = vsel %vm522_vm3, 0.0, %v512_v55 }
 0x186   : > { %v530_v57 = vsub.f32 %v505_v35, %v526_v56 }
 0x187   : > { %v515_v58 = vpop.xlane.xlu0 %514 }
 0x188   : > { %v534_v59 = vmul.f32 1.442695, %v530_v57  ;;  %vm523_vm4 = vcmp.eq.f32.partialorder %v515_v58, -inf }
 0x189   : > { %v527_v60 = vsel %vm523_vm4, 0.0, %v515_v58 }
 0x18a   : > { %949 = vpow2.f32 %v534_v59  ;;  %v531_v61 = vsub.f32 %v506_v36, %v527_v60 }
 0x18b   : > { %v518_v62 = vpop.xlane.xlu1 %517 }
 0x18c   : > { %v536_v63 = vmul.f32 1.442695, %v531_v61  ;;  %vm524_vm5 = vcmp.eq.f32.partialorder %v518_v62, -inf }
 0x18d   : > { %v528_v1 = vsel %vm524_vm5, 0.0, %v518_v62 }
 0x18e   : > { %951 = vpow2.f32 %v536_v63  ;;  %v532_v2 = vsub.f32 %v507_v51, %v528_v1 }
 0x18f   : > { %v521_v3 = vpop.xlane.xlu1 %520 }
 0x190   : > { %v538_v4 = vmul.f32 1.442695, %v532_v2  ;;  %vm525_vm6 = vcmp.eq.f32.partialorder %v521_v3, -inf }
 0x191   : > { %v529_v5 = vsel %vm525_vm6, 0.0, %v521_v3 }
 0x192   : > { %953 = vpow2.f32 %v538_v4  ;;  %v533_v6 = vsub.f32 %v508_v52, %v529_v5 }
 0x194   : > { %v950_v7 = vpop.eup %949  ;;  %v540_v8 = vmul.f32 1.442695, %v533_v6 }
 0x195   : > { %v542_v9 = vsel %vm509_vm2, %v950_v7, 0.0 }
 0x196   : > { %955 = vpow2.f32 %v540_v8  ;;  %543 = vadd.xlane.f32.xlu0 %v542_v9 }
 0x198   : > { %v952_v10 = vpop.eup %951 }
 0x199   : > { %v545_v11 = vsel %vm509_vm2, %v952_v10, 0.0 }
 0x19a   : > { %546 = vadd.xlane.f32.xlu1 %v545_v11 }
 0x19c   : > { %v954_v12 = vpop.eup %953 }
 0x19d   : > { %v548_v13 = vsel %vm509_vm2, %v954_v12, 0.0 }
 0x19e   : > { %549 = vadd.xlane.f32.xlu0 %v548_v13 }
 0x1a0   : > { %v956_v14 = vpop.eup %955 }
 0x1a1   : > { %v551_v15 = vsel %vm509_vm2, %v956_v14, 0.0 }
 0x1a2   : > { %552 = vadd.xlane.f32.xlu1 %v551_v15 }
 0x223   : > { %v544_v28 = vpop.xlane.xlu0 %543 }
 0x224   : > { %v554_v29 = vmax.f32 %v544_v28, 1e-30 }
 0x226   : > { %957 = vrcp.f32 %v554_v29 }
 0x227   : > { %v547_v30 = vpop.xlane.xlu1 %546 }
 0x228   : > { %v555_v31 = vmax.f32 %v547_v30, 1e-30 }
 0x22a   : > { %959 = vrcp.f32 %v555_v31 }
 0x22b   : > { %v550_v32 = vpop.xlane.xlu0 %549 }
 0x22c   : > { %v556_v33 = vmax.f32 %v550_v32, 1e-30 }
 0x22e   : > { %961 = vrcp.f32 %v556_v33 }
 0x22f   : > { %v553_v34 = vpop.xlane.xlu1 %552 }
 0x230   : > { %v958_v35 = vpop.eup %957  ;;  %v557_v36 = vmax.f32 %v553_v34, 1e-30 }
 0x231   : > { %v562_v37 = vmul.f32 %v958_v35, %v950_v7 }
 0x232   : > { %963 = vrcp.f32 %v557_v36 }
 0x233   : > { %v566_v38 = vpack.c.bf16 %v562_v37, %v562_v37 }
 0x234   : > { %v960_v39 = vpop.eup %959 }
 0x235   : > { %v563_v40 = vmul.f32 %v960_v39, %v952_v10  ;;  %918 = vmatmul.mubr.msk.bf16.vlgmr.msra.gmra.mrb[8].mxu0 %vm304_vm1, %v566_v38 }
 0x236   : > { %928 = vmatpush3.bf16.msra.mxu0 %v667_v24  ;;  %929 = vmatprep.mubr.msk.bf16.mxu0 %vm974_vm0, %v973_v0 }
 0x237   : > { %v567_v41 = vpack.c.bf16 %v563_v40, %v563_v40 }
 0x238   : > { %v962_v42 = vpop.eup %961 }
 0x239   : > { %v564_v43 = vmul.f32 %v962_v42, %v954_v12  ;;  %924 = vmatmul.mubr.msk.bf16.vlgmr.msra.gmra.mrb[8].mxu1 %vm304_vm1, %v567_v41 }
 0x23a   : > { %934 = vmatpush3.bf16.msra.mxu1 %v713_v27  ;;  %935 = vmatprep.mubr.msk.bf16.mxu1 %vm974_vm0, %v973_v0 }
 0x23b   : > { %v568_v44 = vpack.c.bf16 %v564_v43, %v564_v43 }
 0x23c   : > { %v964_v45 = vpop.eup %963 }
 0x23d   : > { %v565_v46 = vmul.f32 %v964_v45, %v956_v14  ;;  %930 = vmatmul.mubr.msk.bf16.vlgmr.msra.gmra.mrb[12].mxu0 %vm304_vm1, %v568_v44 }
 0x23f   : > { %v569_v47 = vpack.c.bf16 %v565_v46, %v565_v46 }
 0x241   : > { %936 = vmatmul.mubr.msk.bf16.vlgmr.msra.gmra.mrb[12].mxu1 %vm304_vm1, %v569_v47 }
 0x308   : > { %v611_v48 = vpop.f32.mrb[8].mxu0 }
 0x309   : > { %755 = vst.msk [vmem:[%s278_s12] sm:$0x3f] %vm509_vm2, %v611_v48  ;;  %v919_v49 = vpop.f32.mrb[9].mxu0 }
 0x30a   : > { %v614_v50 = vpop.f32.mrb[10].mxu0 }
 0x30b   : > { %v920_v51 = vpop.f32.mrb[11].mxu0 }
 0x30c   : > { %v657_v52 = vpop.f32.mrb[8].mxu1 }
 0x30d   : > { %756 = vst.msk [vmem:[%s278_s12 + $0x8] sm:$0x3f] %vm509_vm2, %v657_v52  ;;  %v925_v0 = vpop.f32.mrb[9].mxu1 }
 0x30e   : > { %v660_v53 = vpop.f32.mrb[10].mxu1 }
 0x30f   : > { %v926_v54 = vpop.f32.mrb[11].mxu1 }
 0x310   : > { %v703_v55 = vpop.f32.mrb[12].mxu0 }
 0x311   : > { %757 = vst.msk [vmem:[%s278_s12 + $0x10] sm:$0x3f] %vm509_vm2, %v703_v55  ;;  %v931_v56 = vpop.f32.mrb[13].mxu0 }
 0x312   : > { %v706_v57 = vpop.f32.mrb[14].mxu0 }
 0x313   : > { %v932_v58 = vpop.f32.mrb[15].mxu0 }
 0x314   : > { %v749_v59 = vpop.f32.mrb[12].mxu1 }
 0x315   : > { %758 = vst.msk [vmem:[%s278_s12 + $0x18] sm:$0x3f] %vm509_vm2, %v749_v59  ;;  %v937_v60 = vpop.f32.mrb[13].mxu1 }
 0x316   : > { %v752_v61 = vpop.f32.mrb[14].mxu1 }
 0x317   : > { %v938_v62 = vpop.f32.mrb[15].mxu1 }
 0x318 PF: > { %s15_s18 = sadd.s32 1, %s971_s18  }
 0x319   : > { %p12_p4 = scmp.ge.s32.totalorder %s15_s18, 4  }
 0x31b   :  { %14 = sbr.rel (!%p12_p4) target bundleno = 1 (0x1), region = 79 }

// kernel: transformer_forward.96
= control target key start
LH: loop header
LB: loop body
LE: loop exit
PB: predicated region body
PF: predicated region fallthrough
CT: control target
= control target key end

     0   :  { %vm16_vm0 = vcmask 261120   ;;  %vm20_vm1 = vcmask 257024   ;;  %s119_s0 = inlined_call_operand.vmem [shape: f32[12,32], index: 0, kind: input, shape index: {}]   ;;  %s120_s1 = inlined_call_operand.vmem [shape: f32[1,32], index: 1, kind: input, shape index: {}]   ;;  %s121_s2 = inlined_call_operand.vmem [shape: f32[1,32], index: 2, kind: input, shape index: {}]   ;;  %s122_s3 = inlined_call_operand.vmem [shape: f32[12,32], index: 3, kind: output, shape index: {}]  }
   0x1   :  { %v14_v0 = vld [vmem:[%s119_s0] sm:$0xff]  ;;  %v15_v1 = vld [vmem:[%s119_s0 + $0x8] sm:$0xf] }
   0x2   :  { %v17_v2 = vsel %vm16_vm0, %v14_v0, 0.0  ;;  %v21_v3 = vsel %vm20_vm1, %v15_v1, 0.0  ;;  %v69_v21 = vld [vmem:[%s120_s1] ss:$0 sm:$0xff] }
   0x3   :  { %18 = vadd.xlane.f32.xlu0 %v17_v2  ;;  %v70_v23 = vld [vmem:[%s121_s2] ss:$0 sm:$0xff] }
   0x7   :  { %22 = vadd.xlane.f32.xlu0 %v21_v3 }
  0x90   :  { %v19_v4 = vpop.xlane.xlu0 %18 }
  0x91   :  { %v25_v5 = vmul.f32 0.03125, %v19_v4 }
  0x93   :  { %v27_v6 = vsub.f32 %v14_v0, %v25_v5 }
  0x94   :  { %v23_v7 = vpop.xlane.xlu0 %22 }
  0x95   :  { %v26_v8 = vmul.f32 0.03125, %v23_v7  ;;  %v29_v9 = vmul.f32 %v27_v6, %v27_v6 }
  0x97   :  { %v28_v10 = vsub.f32 %v15_v1, %v26_v8  ;;  %v31_v11 = vsel %vm16_vm0, %v29_v9, 0.0 }
  0x98   :  { %32 = vadd.xlane.f32.xlu1 %v31_v11 }
  0x99   :  { %v30_v12 = vmul.f32 %v28_v10, %v28_v10 }
  0x9b   :  { %v34_v13 = vsel %vm20_vm1, %v30_v12, 0.0 }
  0x9c   :  { %35 = vadd.xlane.f32.xlu1 %v34_v13 }
 0x125   :  { %v33_v14 = vpop.xlane.xlu1 %32 }
 0x126   :  { %v37_v15 = vmul.f32 0.03125, %v33_v14 }
 0x128   :  { %v39_v16 = vadd.f32 1e-05, %v37_v15 }
 0x129   :  { %v36_v17 = vpop.xlane.xlu1 %35 }
 0x12a   :  { %71 = vrsqrt.f32 %v39_v16  ;;  %v38_v18 = vmul.f32 0.03125, %v36_v17 }
 0x12c   :  { %v40_v19 = vadd.f32 1e-05, %v38_v18 }
 0x12e   :  { %73 = vrsqrt.f32 %v40_v19 }
 0x134   :  { %v72_v20 = vpop.eup %71 }
 0x135   :  { %v43_v22 = vmul.f32 %v72_v20, %v27_v6 }
 0x137   :  { %v52_v24 = vmul.f32 %v69_v21, %v43_v22 }
 0x138   :  { %v74_v25 = vpop.eup %73 }
 0x139   :  { %v61_v26 = vadd.f32 %v70_v23, %v52_v24  ;;  %v44_v27 = vmul.f32 %v74_v25, %v28_v10 }
 0x13b   :  { %63 = vst.msk [vmem:[%s122_s3] sm:$0xff] %vm16_vm0, %v61_v26  ;;  %v53_v28 = vmul.f32 %v69_v21, %v44_v27 }
 0x13d   :  { %v62_v29 = vadd.f32 %v70_v23, %v53_v28 }
 0x13f   :  { %64 = vst.msk [vmem:[%s122_s3 + $0x8] sm:$0xf] %vm20_vm1, %v62_v29 }

// kernel: transformer_forward.97
= control target key start
LH: loop header
LB: loop body
LE: loop exit
PB: predicated region body
PF: predicated region fallthrough
CT: control target
= control target key end

     0   :  { %vm19_vm0 = vcmask 490496   ;;  %v120_v0 = vmov 0.0   ;;  %vm121_vm1 = vmmov 0   ;;  %vm34_vm2 = vcmask 261120   ;;  %s175_s1 = inlined_call_operand.vmem [shape: f32[32,60], index: 1, kind: input, shape index: {}]   ;;  %s176_s0 = inlined_call_operand.vmem [shape: f32[12,32], index: 0, kind: input, shape index: {}]   ;;  %s177_s2 = inlined_call_operand.vmem [shape: f32[1,60], index: 2, kind: input, shape index: {}]   ;;  %s178_s3 = inlined_call_operand.vmem [shape: f32[12,60], index: 3, kind: output, shape index: {}]  }
   0x1   :  { %110 = vmatprep.subr.bf16.mxu0 %v120_v0  ;;  %v28_v1 = vld [vmem:[%s175_s1] sm:$0xff]  ;;  %v29_v2 = vld [vmem:[%s175_s1 + $0x8] sm:$0xff]  ;;  %v30_v3 = vld [vmem:[%s175_s1 + $0x10] sm:$0xff]  ;;  %114 = vmatprep.mubr.msk.bf16.mxu0 %vm121_vm1, %v120_v0  ;;  %20 = vst.msk [vmem:[#allocation2] sm:$0xff] %vm19_vm0, %v120_v0  ;;  %vm21_vm3 = vcmask 486400  }
   0x2   :  { %v32_v4 = vpack.c.bf16 %v29_v2, %v28_v1  ;;  %v31_v5 = vld [vmem:[%s175_s1 + $0x18] sm:$0xff]  ;;  %v25_v7 = vld [vmem:[%s176_s0] sm:$0xff]  ;;  %v26_v8 = vld [vmem:[%s176_s0 + $0x8] sm:$0xf]  ;;  %22 = vst.msk [vmem:[#allocation2 + $0x8] sm:$0xf] %vm21_vm3, %v120_v0 }
   0x3   :  { %v33_v6 = vpack.c.bf16 %v31_v5, %v30_v3  ;;  %v27_v9 = vpack.c.bf16 %v26_v8, %v25_v7  ;;  %v106_v18 = vld [vmem:[%s177_s2] ss:$0 sm:$0xff] }
   0x4   :  { %111 = vmatpush3.bf16.msra.mxu0 %v32_v4 }
   0x5   :  { %112 = vmatprep.subr.bf16.mxu0 %v120_v0 }
   0x8   :  { %113 = vmatpush3.bf16.msra.mxu0 %v33_v6  ;;  %v23_v10 = vld [vmem:[#allocation2] sm:$0xff] }
   0x9   :  { %v24_v12 = vld [vmem:[#allocation2 + $0x8] sm:$0xf] }
   0xb   :  { %115 = vmatmul.mubr.msk.bf16.vlgmr.msra.gmra.mrb[0].mxu0 %vm34_vm2, %v27_v9 }
  0xde   :  { %v72_v11 = vpop.f32.mrb[0].mxu0 }
  0xdf   :  { %v79_v13 = vadd.f32 %v72_v11, %v23_v10  ;;  %v116_v14 = vpop.f32.mrb[1].mxu0 }
  0xe0   :  { %v75_v15 = vpop.f32.mrb[2].mxu0 }
  0xe1   :  { %82 = vst.msk [vmem:[#allocation2] sm:$0xff] %vm19_vm0, %v79_v13  ;;  %v80_v16 = vadd.f32 %v75_v15, %v24_v12  ;;  %v117_v17 = vpop.f32.mrb[3].mxu0 }
  0xe3   :  { %84 = vst.msk [vmem:[#allocation2 + $0x8] sm:$0xf] %vm21_vm3, %v80_v16 }
  0xe8   :  { %v88_v19 = vld [vmem:[#allocation2] sm:$0xff] }
  0xe9   :  { %v97_v20 = vadd.f32 %v106_v18, %v88_v19 }
  0xea   :  { %v89_v21 = vld [vmem:[#allocation2 + $0x8] sm:$0xf] }
  0xeb   :  { %99 = vst.msk [vmem:[%s178_s3] sm:$0xff] %vm19_vm0, %v97_v20  ;;  %v98_v22 = vadd.f32 %v106_v18, %v89_v21 }
  0xed   :  { %100 = vst.msk [vmem:[%s178_s3 + $0x8] sm:$0xf] %vm21_vm3, %v98_v22 }

</bundles_post_ra>
